<compile_context>
chip_gen: v5e
topology: v5e:2x2
jax: 0.10.0
libtpu: 0.0.40
codegen_flags: <defaults>
</compile_context>

<pallas_src>
import math
import jax
import jax.numpy as jnp
from jax.experimental import pallas as pl
from jax.experimental.pallas import tpu as pltpu

# ----------------------------- config (small) --------------------------------
NUM_LAYERS = 2
B, S, H = 2, 8, 32          # batch, seq_len, hidden_size
NH = 4                      # num_attention_heads
HD = H // NH                # attention head size
INTER = 64                  # intermediate_size
LN_EPS = 1e-12              # BertLayerNorm eps
OUTPUT_ATTENTIONS = False
OUTPUT_HIDDEN_STATES = False

_PARAM_ORDER = ("wq", "bq", "wk", "bk", "wv", "bv",
                "wao", "bao", "g1", "b1",
                "wi", "bi", "wo2", "bo2", "g2", "b2")


# ------------------------------ in-kernel math --------------------------------
def _gelu(x):
    # tanh-approximate GELU: transcendental lands on the EUP slot instead of a
    # ~12-op polynomial on the VPU.
    # TODO(synk): tiny numeric difference vs. the exact erf-based GELU in
    # mmpretrain's bert.py (acceptable for inference).
    c = math.sqrt(2.0 / math.pi)
    return 0.5 * x * (1.0 + jnp.tanh(c * (x + 0.044715 * x * x * x)))


def _layer_norm(x, g, b):
    # matches BertLayerNorm: (x - mean) / sqrt(var + eps) * weight + bias
    u = jnp.mean(x, axis=-1, keepdims=True)
    d = x - u
    s = jnp.mean(d * d, axis=-1, keepdims=True)
    return d * jax.lax.rsqrt(s + LN_EPS) * g + b


# ------------------------------- kernel body ----------------------------------
def bert_encoder_kernel(x_ref, mask_ref,
                        wq, bq, wk, bk, wv, bv,
                        wao, bao, g1, b1,
                        wi, bi, wo2, bo2, g2, b2,
                        out_ref):
    h = x_ref[0]            # (S, H) f32 — stays resident across all layers
    mask = mask_ref[0]      # (1, S) additive f32
    scale = 1.0 / math.sqrt(HD)
    bf16 = jnp.bfloat16

    # Static unroll over layers: the hidden state never leaves VMEM between
    # layers; all (stacked) weights are already resident.
    for l in range(NUM_LAYERS):
        hb = h.astype(bf16)

        # ---- self-attention: Q/K/V projections (bf16 MXU, f32 accumulate) ----
        q = jnp.dot(hb, wq[l], preferred_element_type=jnp.float32) + bq[l]
        k = jnp.dot(hb, wk[l], preferred_element_type=jnp.float32) + bk[l]
        v = jnp.dot(hb, wv[l], preferred_element_type=jnp.float32) + bv[l]

        qh = q.reshape(S, NH, HD).astype(bf16)
        kh = k.reshape(S, NH, HD).astype(bf16)
        vh = v.reshape(S, NH, HD).astype(bf16)

        # scores: single batched contraction over heads, (NH, S, S)
        scores = jnp.einsum('qhd,khd->hqk', qh, kh,
                            preferred_element_type=jnp.float32) * scale
        scores = scores + mask[None, :, :]        # mask keys (broadcast over heads/queries)

        # softmax over keys (dropout is identity in eval)
        m = jnp.max(scores, axis=-1, keepdims=True)
        e = jnp.exp(scores - m)
        p = e * pl.reciprocal(jnp.sum(e, axis=-1, keepdims=True), approx=True)
        # TODO(synk): head_mask multiplication skipped — encoder is driven with
        # head_mask=[None]*num_layers (the usual BertModel default).

        # context: batched p @ v, then fold heads back into the feature dim
        ctx = jnp.einsum('hqk,khd->qhd', p.astype(bf16), vh,
                         preferred_element_type=jnp.float32).reshape(S, H)

        # ---- BertSelfOutput: dense + residual + LayerNorm ----
        attn = jnp.dot(ctx.astype(bf16), wao[l],
                       preferred_element_type=jnp.float32) + bao[l]
        h1 = _layer_norm(attn + h, g1[l], b1[l])

        # ---- BertIntermediate: dense + gelu ----
        inter = _gelu(jnp.dot(h1.astype(bf16), wi[l],
                              preferred_element_type=jnp.float32) + bi[l])

        # ---- BertOutput: dense + residual + LayerNorm ----
        out = jnp.dot(inter.astype(bf16), wo2[l],
                      preferred_element_type=jnp.float32) + bo2[l]
        h = _layer_norm(out + h1, g2[l], b2[l])

    out_ref[0] = h


# ------------------------------ pallas wrapper ---------------------------------
def bert_encoder_pallas(hidden, mask, params):
    """hidden: (B,S,H) f32; mask: (B,1,S) additive f32; params: dict of stacked
    per-layer arrays (leading dim = NUM_LAYERS)."""
    plist = [params[name] for name in _PARAM_ORDER]

    in_specs = [
        pl.BlockSpec((1, S, H), lambda b: (b, 0, 0)),   # hidden_states (per batch)
        pl.BlockSpec((1, 1, S), lambda b: (b, 0, 0)),   # attention_mask (per batch)
    ]
    # stacked weights / biases: whole (small) arrays resident in VMEM,
    # same block for every grid step (no re-DMA)
    for w in plist:
        in_specs.append(pl.BlockSpec(w.shape, lambda b: (0, 0, 0)))

    return pl.pallas_call(
        bert_encoder_kernel,
        out_shape=jax.ShapeDtypeStruct((B, S, H), jnp.float32),
        grid=(B,),
        in_specs=in_specs,
        out_specs=pl.BlockSpec((1, S, H), lambda b: (b, 0, 0)),
        compiler_params=pltpu.CompilerParams(
            dimension_semantics=("parallel",)),   # shards batch across TCs on v7x
    )(hidden, mask, *plist)


def bert_encoder_forward(hidden_states, attention_mask, stacked_params):
    """Mirrors BertEncoder.forward (output_attentions/hidden_states = False)."""
    all_hidden_states = ()
    if OUTPUT_HIDDEN_STATES:
        all_hidden_states = all_hidden_states + (hidden_states,)
    hidden_states = bert_encoder_pallas(hidden_states, attention_mask,
                                        stacked_params)
    if OUTPUT_HIDDEN_STATES:
        all_hidden_states = all_hidden_states + (hidden_states,)
    outputs = (hidden_states,)
    if OUTPUT_HIDDEN_STATES:
        outputs = outputs + (all_hidden_states,)
    return outputs


# ---------------------------- deterministic params -----------------------------
def init_layer_params(key):
    ks = jax.random.split(key, 6)
    std = 0.02

    def w(k, shape):  # matmul weights stored bf16 (MXU-native, half the DMA bytes)
        return (jax.random.normal(k, shape, jnp.float32) * std).astype(jnp.bfloat16)

    return {
        "wq":  w(ks[0], (H, H)),  "bq":  jnp.zeros((1, H), jnp.float32),
        "wk":  w(ks[1], (H, H)),  "bk":  jnp.zeros((1, H), jnp.float32),
        "wv":  w(ks[2], (H, H)),  "bv":  jnp.zeros((1, H), jnp.float32),
        "wao": w(ks[3], (H, H)),  "bao": jnp.zeros((1, H), jnp.float32),
        "g1":  jnp.ones((1, H), jnp.float32),
        "b1":  jnp.zeros((1, H), jnp.float32),
        "wi":  w(ks[4], (H, INTER)),  "bi":  jnp.zeros((1, INTER), jnp.float32),
        "wo2": w(ks[5], (INTER, H)),  "bo2": jnp.zeros((1, H), jnp.float32),
        "g2":  jnp.ones((1, H), jnp.float32),
        "b2":  jnp.zeros((1, H), jnp.float32),
    }


def stack_layer_params(per_layer):
    """Stack per-layer dicts into {name: (NUM_LAYERS, ...)} arrays."""
    return {name: jnp.stack([p[name] for p in per_layer], axis=0)
            for name in _PARAM_ORDER}


if __name__ == "__main__":
    root = jax.random.PRNGKey(0)
    k_x, k_p = jax.random.split(root)

    # inputs
    hidden_states = jax.random.normal(k_x, (B, S, H), jnp.float32)
    # valid-token mask: batch 0 fully valid, batch 1 has last 2 tokens padded
    valid = jnp.ones((B, S), jnp.float32).at[1, S - 2:].set(0.0)
    attention_mask = ((1.0 - valid) * -10000.0).reshape(B, 1, S)

    # per-layer parameters, stacked along a leading layer axis
    layer_keys = jax.random.split(k_p, NUM_LAYERS)
    stacked = stack_layer_params(
        [init_layer_params(layer_keys[i]) for i in range(NUM_LAYERS)])

    outputs = bert_encoder_forward(hidden_states, attention_mask, stacked)
    out = jax.block_until_ready(outputs[0])

    assert out.shape == (B, S, H)
    assert bool(jnp.all(jnp.isfinite(out)))
    print("KERNEL_OK")
</pallas_src>

<mosaic_0001>
module attributes {stable_mosaic.version = 11 : i64} {
  func.func @bert_encoder_kernel(%arg0: i32, %arg1: memref<1x8x32xf32, #tpu.memory_space<vmem>>, %arg2: memref<1x1x8xf32, #tpu.memory_space<vmem>>, %arg3: memref<2x32x32xbf16, #tpu.memory_space<vmem>>, %arg4: memref<2x1x32xf32, #tpu.memory_space<vmem>>, %arg5: memref<2x32x32xbf16, #tpu.memory_space<vmem>>, %arg6: memref<2x1x32xf32, #tpu.memory_space<vmem>>, %arg7: memref<2x32x32xbf16, #tpu.memory_space<vmem>>, %arg8: memref<2x1x32xf32, #tpu.memory_space<vmem>>, %arg9: memref<2x32x32xbf16, #tpu.memory_space<vmem>>, %arg10: memref<2x1x32xf32, #tpu.memory_space<vmem>>, %arg11: memref<2x1x32xf32, #tpu.memory_space<vmem>>, %arg12: memref<2x1x32xf32, #tpu.memory_space<vmem>>, %arg13: memref<2x32x64xbf16, #tpu.memory_space<vmem>>, %arg14: memref<2x1x64xf32, #tpu.memory_space<vmem>>, %arg15: memref<2x64x32xbf16, #tpu.memory_space<vmem>>, %arg16: memref<2x1x32xf32, #tpu.memory_space<vmem>>, %arg17: memref<2x1x32xf32, #tpu.memory_space<vmem>>, %arg18: memref<2x1x32xf32, #tpu.memory_space<vmem>>, %arg19: memref<1x8x32xf32, #tpu.memory_space<vmem>>) attributes {dimension_semantics = [#tpu.dimension_semantics<parallel>], iteration_bounds = array<i64: 2>, scalar_prefetch = 0 : i64, scratch_operands = 0 : i64, tpu.core_type = #tpu.core_type<tc>, window_params = [{transform_indices = @transform_0, window_bounds = array<i64: 1, 8, 32>}, {transform_indices = @transform_1, window_bounds = array<i64: 1, 1, 8>}, {pipeline_mode = #tpu.pipeline_mode<synchronous>, transform_indices = @transform_2, window_bounds = array<i64: 2, 32, 32>}, {pipeline_mode = #tpu.pipeline_mode<synchronous>, transform_indices = @transform_3, window_bounds = array<i64: 2, 1, 32>}, {pipeline_mode = #tpu.pipeline_mode<synchronous>, transform_indices = @transform_4, window_bounds = array<i64: 2, 32, 32>}, {pipeline_mode = #tpu.pipeline_mode<synchronous>, transform_indices = @transform_5, window_bounds = array<i64: 2, 1, 32>}, {pipeline_mode = #tpu.pipeline_mode<synchronous>, transform_indices = @transform_6, window_bounds = array<i64: 2, 32, 32>}, {pipeline_mode = #tpu.pipeline_mode<synchronous>, transform_indices = @transform_7, window_bounds = array<i64: 2, 1, 32>}, {pipeline_mode = #tpu.pipeline_mode<synchronous>, transform_indices = @transform_8, window_bounds = array<i64: 2, 32, 32>}, {pipeline_mode = #tpu.pipeline_mode<synchronous>, transform_indices = @transform_9, window_bounds = array<i64: 2, 1, 32>}, {pipeline_mode = #tpu.pipeline_mode<synchronous>, transform_indices = @transform_10, window_bounds = array<i64: 2, 1, 32>}, {pipeline_mode = #tpu.pipeline_mode<synchronous>, transform_indices = @transform_11, window_bounds = array<i64: 2, 1, 32>}, {pipeline_mode = #tpu.pipeline_mode<synchronous>, transform_indices = @transform_12, window_bounds = array<i64: 2, 32, 64>}, {pipeline_mode = #tpu.pipeline_mode<synchronous>, transform_indices = @transform_13, window_bounds = array<i64: 2, 1, 64>}, {pipeline_mode = #tpu.pipeline_mode<synchronous>, transform_indices = @transform_14, window_bounds = array<i64: 2, 64, 32>}, {pipeline_mode = #tpu.pipeline_mode<synchronous>, transform_indices = @transform_15, window_bounds = array<i64: 2, 1, 32>}, {pipeline_mode = #tpu.pipeline_mode<synchronous>, transform_indices = @transform_16, window_bounds = array<i64: 2, 1, 32>}, {pipeline_mode = #tpu.pipeline_mode<synchronous>, transform_indices = @transform_17, window_bounds = array<i64: 2, 1, 32>}, {transform_indices = @transform_18, window_bounds = array<i64: 1, 8, 32>}]} {
    %c0 = arith.constant 0 : index
    %c0_0 = arith.constant 0 : index
    %c0_1 = arith.constant 0 : index
    %0 = vector.load %arg1[%c0, %c0_0, %c0_1] : memref<1x8x32xf32, #tpu.memory_space<vmem>>, vector<1x8x32xf32>
    %1 = vector.shape_cast %0 : vector<1x8x32xf32> to vector<8x32xf32>
    %c0_2 = arith.constant 0 : index
    %c0_3 = arith.constant 0 : index
    %c0_4 = arith.constant 0 : index
    %2 = vector.load %arg2[%c0_2, %c0_3, %c0_4] : memref<1x1x8xf32, #tpu.memory_space<vmem>>, vector<1x1x8xf32>
    %3 = vector.shape_cast %2 : vector<1x1x8xf32> to vector<1x8xf32>
    %4 = arith.truncf %1 : vector<8x32xf32> to vector<8x32xbf16>
    %c0_5 = arith.constant 0 : index
    %c0_6 = arith.constant 0 : index
    %c0_7 = arith.constant 0 : index
    %5 = vector.load %arg3[%c0_5, %c0_6, %c0_7] : memref<2x32x32xbf16, #tpu.memory_space<vmem>>, vector<1x32x32xbf16>
    %6 = vector.shape_cast %5 : vector<1x32x32xbf16> to vector<32x32xbf16>
    %cst = arith.constant dense<0.000000e+00> : vector<8x32xf32>
    %7 = tpu.matmul %4, %6, %cst {dimension_numbers = #tpu.dot_dimension_numbers<[1], [0], [0], [1], [0, 0, 1, 1], [], []>} : vector<8x32xbf16>, vector<32x32xbf16>, vector<8x32xf32> -> vector<8x32xf32>
    %c0_8 = arith.constant 0 : index
    %c0_9 = arith.constant 0 : index
    %c0_10 = arith.constant 0 : index
    %8 = vector.load %arg4[%c0_8, %c0_9, %c0_10] : memref<2x1x32xf32, #tpu.memory_space<vmem>>, vector<1x1x32xf32>
    %9 = vector.shape_cast %8 : vector<1x1x32xf32> to vector<1x32xf32>
    %10 = vector.broadcast %9 : vector<1x32xf32> to vector<8x32xf32>
    %11 = arith.addf %7, %10 : vector<8x32xf32>
    %c0_11 = arith.constant 0 : index
    %c0_12 = arith.constant 0 : index
    %c0_13 = arith.constant 0 : index
    %12 = vector.load %arg5[%c0_11, %c0_12, %c0_13] : memref<2x32x32xbf16, #tpu.memory_space<vmem>>, vector<1x32x32xbf16>
    %13 = vector.shape_cast %12 : vector<1x32x32xbf16> to vector<32x32xbf16>
    %cst_14 = arith.constant dense<0.000000e+00> : vector<8x32xf32>
    %14 = tpu.matmul %4, %13, %cst_14 {dimension_numbers = #tpu.dot_dimension_numbers<[1], [0], [0], [1], [0, 0, 1, 1], [], []>} : vector<8x32xbf16>, vector<32x32xbf16>, vector<8x32xf32> -> vector<8x32xf32>
    %c0_15 = arith.constant 0 : index
    %c0_16 = arith.constant 0 : index
    %c0_17 = arith.constant 0 : index
    %15 = vector.load %arg6[%c0_15, %c0_16, %c0_17] : memref<2x1x32xf32, #tpu.memory_space<vmem>>, vector<1x1x32xf32>
    %16 = vector.shape_cast %15 : vector<1x1x32xf32> to vector<1x32xf32>
    %17 = vector.broadcast %16 : vector<1x32xf32> to vector<8x32xf32>
    %18 = arith.addf %14, %17 : vector<8x32xf32>
    %c0_18 = arith.constant 0 : index
    %c0_19 = arith.constant 0 : index
    %c0_20 = arith.constant 0 : index
    %19 = vector.load %arg7[%c0_18, %c0_19, %c0_20] : memref<2x32x32xbf16, #tpu.memory_space<vmem>>, vector<1x32x32xbf16>
    %20 = vector.shape_cast %19 : vector<1x32x32xbf16> to vector<32x32xbf16>
    %cst_21 = arith.constant dense<0.000000e+00> : vector<8x32xf32>
    %21 = tpu.matmul %4, %20, %cst_21 {dimension_numbers = #tpu.dot_dimension_numbers<[1], [0], [0], [1], [0, 0, 1, 1], [], []>} : vector<8x32xbf16>, vector<32x32xbf16>, vector<8x32xf32> -> vector<8x32xf32>
    %c0_22 = arith.constant 0 : index
    %c0_23 = arith.constant 0 : index
    %c0_24 = arith.constant 0 : index
    %22 = vector.load %arg8[%c0_22, %c0_23, %c0_24] : memref<2x1x32xf32, #tpu.memory_space<vmem>>, vector<1x1x32xf32>
    %23 = vector.shape_cast %22 : vector<1x1x32xf32> to vector<1x32xf32>
    %24 = vector.broadcast %23 : vector<1x32xf32> to vector<8x32xf32>
    %25 = arith.addf %21, %24 : vector<8x32xf32>
    %26 = vector.shape_cast %11 : vector<8x32xf32> to vector<8x4x8xf32>
    %27 = arith.truncf %26 : vector<8x4x8xf32> to vector<8x4x8xbf16>
    %28 = vector.shape_cast %18 : vector<8x32xf32> to vector<8x4x8xf32>
    %29 = arith.truncf %28 : vector<8x4x8xf32> to vector<8x4x8xbf16>
    %30 = vector.shape_cast %25 : vector<8x32xf32> to vector<8x4x8xf32>
    %31 = arith.truncf %30 : vector<8x4x8xf32> to vector<8x4x8xbf16>
    "tpu.trace_start"() <{level = 10 : i32, message = "qhd,khd->hqk"}> : () -> ()
    %cst_25 = arith.constant dense<0.000000e+00> : vector<4x8x8xf32>
    %32 = tpu.matmul %27, %29, %cst_25 {dimension_numbers = #tpu.dot_dimension_numbers<[2], [2], [0], [0], [0, 1, 0, 0, 1, 0], [1], [1]>} : vector<8x4x8xbf16>, vector<8x4x8xbf16>, vector<4x8x8xf32> -> vector<4x8x8xf32>
    "tpu.trace_stop"() : () -> ()
    %cst_26 = arith.constant 0.353553385 : f32
    %33 = vector.broadcast %cst_26 : f32 to vector<4x8x8xf32>
    %34 = arith.mulf %32, %33 : vector<4x8x8xf32>
    %35 = vector.shape_cast %3 : vector<1x8xf32> to vector<1x1x8xf32>
    %36 = vector.broadcast %35 : vector<1x1x8xf32> to vector<4x8x8xf32>
    %37 = arith.addf %34, %36 : vector<4x8x8xf32>
    %cst_27 = arith.constant dense<0xFF800000> : vector<4x8xf32>
    %38 = vector.multi_reduction <maximumf>, %37, %cst_27 [2] : vector<4x8x8xf32> to vector<4x8xf32>
    %39 = vector.shape_cast %38 : vector<4x8xf32> to vector<4x8x1xf32>
    %40 = vector.broadcast %39 : vector<4x8x1xf32> to vector<4x8x8xf32>
    %41 = arith.subf %37, %40 : vector<4x8x8xf32>
    %42 = math.exp %41 : vector<4x8x8xf32>
    %cst_28 = arith.constant dense<0.000000e+00> : vector<4x8xf32>
    %43 = vector.multi_reduction <add>, %42, %cst_28 [2] : vector<4x8x8xf32> to vector<4x8xf32>
    %44 = vector.shape_cast %43 : vector<4x8xf32> to vector<4x8x1xf32>
    %45 = tpu.reciprocal %44 {approx = true} : vector<4x8x1xf32> -> vector<4x8x1xf32>
    %46 = vector.broadcast %45 : vector<4x8x1xf32> to vector<4x8x8xf32>
    %47 = arith.mulf %42, %46 : vector<4x8x8xf32>
    %48 = arith.truncf %47 : vector<4x8x8xf32> to vector<4x8x8xbf16>
    "tpu.trace_start"() <{level = 10 : i32, message = "hqk,khd->qhd"}> : () -> ()
    %cst_29 = arith.constant dense<0.000000e+00> : vector<4x8x8xf32>
    %49 = tpu.matmul %31, %48, %cst_29 {dimension_numbers = #tpu.dot_dimension_numbers<[0], [2], [2], [1], [0, 1, 0, 2, 1, 1], [1], [0]>} : vector<8x4x8xbf16>, vector<4x8x8xbf16>, vector<4x8x8xf32> -> vector<4x8x8xf32>
    %50 = tpu.transpose %49, [2, 0, 1] : vector<4x8x8xf32> -> vector<8x4x8xf32>
    "tpu.trace_stop"() : () -> ()
    %51 = vector.shape_cast %50 : vector<8x4x8xf32> to vector<8x32xf32>
    %52 = arith.truncf %51 : vector<8x32xf32> to vector<8x32xbf16>
    %c0_30 = arith.constant 0 : index
    %c0_31 = arith.constant 0 : index
    %c0_32 = arith.constant 0 : index
    %53 = vector.load %arg9[%c0_30, %c0_31, %c0_32] : memref<2x32x32xbf16, #tpu.memory_space<vmem>>, vector<1x32x32xbf16>
    %54 = vector.shape_cast %53 : vector<1x32x32xbf16> to vector<32x32xbf16>
    %cst_33 = arith.constant dense<0.000000e+00> : vector<8x32xf32>
    %55 = tpu.matmul %52, %54, %cst_33 {dimension_numbers = #tpu.dot_dimension_numbers<[1], [0], [0], [1], [0, 0, 1, 1], [], []>} : vector<8x32xbf16>, vector<32x32xbf16>, vector<8x32xf32> -> vector<8x32xf32>
    %c0_34 = arith.constant 0 : index
    %c0_35 = arith.constant 0 : index
    %c0_36 = arith.constant 0 : index
    %56 = vector.load %arg10[%c0_34, %c0_35, %c0_36] : memref<2x1x32xf32, #tpu.memory_space<vmem>>, vector<1x1x32xf32>
    %57 = vector.shape_cast %56 : vector<1x1x32xf32> to vector<1x32xf32>
    %58 = vector.broadcast %57 : vector<1x32xf32> to vector<8x32xf32>
    %59 = arith.addf %55, %58 : vector<8x32xf32>
    %60 = arith.addf %59, %1 : vector<8x32xf32>
    %c0_37 = arith.constant 0 : index
    %c0_38 = arith.constant 0 : index
    %c0_39 = arith.constant 0 : index
    %61 = vector.load %arg11[%c0_37, %c0_38, %c0_39] : memref<2x1x32xf32, #tpu.memory_space<vmem>>, vector<1x1x32xf32>
    %62 = vector.shape_cast %61 : vector<1x1x32xf32> to vector<1x32xf32>
    %c0_40 = arith.constant 0 : index
    %c0_41 = arith.constant 0 : index
    %c0_42 = arith.constant 0 : index
    %63 = vector.load %arg12[%c0_40, %c0_41, %c0_42] : memref<2x1x32xf32, #tpu.memory_space<vmem>>, vector<1x1x32xf32>
    %64 = vector.shape_cast %63 : vector<1x1x32xf32> to vector<1x32xf32>
    %cst_43 = arith.constant dense<0.000000e+00> : vector<8xf32>
    %65 = vector.multi_reduction <add>, %60, %cst_43 [1] : vector<8x32xf32> to vector<8xf32>
    %66 = vector.shape_cast %65 : vector<8xf32> to vector<8x1xf32>
    %cst_44 = arith.constant 3.200000e+01 : f32
    %67 = vector.broadcast %cst_44 : f32 to vector<8x1xf32>
    %68 = arith.divf %66, %67 : vector<8x1xf32>
    %69 = vector.broadcast %68 : vector<8x1xf32> to vector<8x32xf32>
    %70 = arith.subf %60, %69 : vector<8x32xf32>
    %71 = arith.mulf %70, %70 : vector<8x32xf32>
    %cst_45 = arith.constant dense<0.000000e+00> : vector<8xf32>
    %72 = vector.multi_reduction <add>, %71, %cst_45 [1] : vector<8x32xf32> to vector<8xf32>
    %73 = vector.shape_cast %72 : vector<8xf32> to vector<8x1xf32>
    %cst_46 = arith.constant 3.200000e+01 : f32
    %74 = vector.broadcast %cst_46 : f32 to vector<8x1xf32>
    %75 = arith.divf %73, %74 : vector<8x1xf32>
    %cst_47 = arith.constant 9.99999996E-13 : f32
    %76 = vector.broadcast %cst_47 : f32 to vector<8x1xf32>
    %77 = arith.addf %75, %76 : vector<8x1xf32>
    %78 = math.rsqrt %77 : vector<8x1xf32>
    %79 = vector.broadcast %78 : vector<8x1xf32> to vector<8x32xf32>
    %80 = arith.mulf %70, %79 : vector<8x32xf32>
    %81 = vector.broadcast %62 : vector<1x32xf32> to vector<8x32xf32>
    %82 = arith.mulf %80, %81 : vector<8x32xf32>
    %83 = vector.broadcast %64 : vector<1x32xf32> to vector<8x32xf32>
    %84 = arith.addf %82, %83 : vector<8x32xf32>
    %85 = arith.truncf %84 : vector<8x32xf32> to vector<8x32xbf16>
    %c0_48 = arith.constant 0 : index
    %c0_49 = arith.constant 0 : index
    %c0_50 = arith.constant 0 : index
    %86 = vector.load %arg13[%c0_48, %c0_49, %c0_50] : memref<2x32x64xbf16, #tpu.memory_space<vmem>>, vector<1x32x64xbf16>
    %87 = vector.shape_cast %86 : vector<1x32x64xbf16> to vector<32x64xbf16>
    %cst_51 = arith.constant dense<0.000000e+00> : vector<8x64xf32>
    %88 = tpu.matmul %85, %87, %cst_51 {dimension_numbers = #tpu.dot_dimension_numbers<[1], [0], [0], [1], [0, 0, 1, 1], [], []>} : vector<8x32xbf16>, vector<32x64xbf16>, vector<8x64xf32> -> vector<8x64xf32>
    %c0_52 = arith.constant 0 : index
    %c0_53 = arith.constant 0 : index
    %c0_54 = arith.constant 0 : index
    %89 = vector.load %arg14[%c0_52, %c0_53, %c0_54] : memref<2x1x64xf32, #tpu.memory_space<vmem>>, vector<1x1x64xf32>
    %90 = vector.shape_cast %89 : vector<1x1x64xf32> to vector<1x64xf32>
    %91 = vector.broadcast %90 : vector<1x64xf32> to vector<8x64xf32>
    %92 = arith.addf %88, %91 : vector<8x64xf32>
    %cst_55 = arith.constant 5.000000e-01 : f32
    %93 = vector.broadcast %cst_55 : f32 to vector<8x64xf32>
    %94 = arith.mulf %93, %92 : vector<8x64xf32>
    %cst_56 = arith.constant 4.471500e-02 : f32
    %95 = vector.broadcast %cst_56 : f32 to vector<8x64xf32>
    %96 = arith.mulf %95, %92 : vector<8x64xf32>
    %97 = arith.mulf %96, %92 : vector<8x64xf32>
    %98 = arith.mulf %97, %92 : vector<8x64xf32>
    %99 = arith.addf %92, %98 : vector<8x64xf32>
    %cst_57 = arith.constant 0.797884583 : f32
    %100 = vector.broadcast %cst_57 : f32 to vector<8x64xf32>
    %101 = arith.mulf %100, %99 : vector<8x64xf32>
    %102 = math.tanh %101 : vector<8x64xf32>
    %cst_58 = arith.constant 1.000000e+00 : f32
    %103 = vector.broadcast %cst_58 : f32 to vector<8x64xf32>
    %104 = arith.addf %103, %102 : vector<8x64xf32>
    %105 = arith.mulf %94, %104 : vector<8x64xf32>
    %106 = arith.truncf %105 : vector<8x64xf32> to vector<8x64xbf16>
    %c0_59 = arith.constant 0 : index
    %c0_60 = arith.constant 0 : index
    %c0_61 = arith.constant 0 : index
    %107 = vector.load %arg15[%c0_59, %c0_60, %c0_61] : memref<2x64x32xbf16, #tpu.memory_space<vmem>>, vector<1x64x32xbf16>
    %108 = vector.shape_cast %107 : vector<1x64x32xbf16> to vector<64x32xbf16>
    %cst_62 = arith.constant dense<0.000000e+00> : vector<8x32xf32>
    %109 = tpu.matmul %106, %108, %cst_62 {dimension_numbers = #tpu.dot_dimension_numbers<[1], [0], [0], [1], [0, 0, 1, 1], [], []>} : vector<8x64xbf16>, vector<64x32xbf16>, vector<8x32xf32> -> vector<8x32xf32>
    %c0_63 = arith.constant 0 : index
    %c0_64 = arith.constant 0 : index
    %c0_65 = arith.constant 0 : index
    %110 = vector.load %arg16[%c0_63, %c0_64, %c0_65] : memref<2x1x32xf32, #tpu.memory_space<vmem>>, vector<1x1x32xf32>
    %111 = vector.shape_cast %110 : vector<1x1x32xf32> to vector<1x32xf32>
    %112 = vector.broadcast %111 : vector<1x32xf32> to vector<8x32xf32>
    %113 = arith.addf %109, %112 : vector<8x32xf32>
    %114 = arith.addf %113, %84 : vector<8x32xf32>
    %c0_66 = arith.constant 0 : index
    %c0_67 = arith.constant 0 : index
    %c0_68 = arith.constant 0 : index
    %115 = vector.load %arg17[%c0_66, %c0_67, %c0_68] : memref<2x1x32xf32, #tpu.memory_space<vmem>>, vector<1x1x32xf32>
    %116 = vector.shape_cast %115 : vector<1x1x32xf32> to vector<1x32xf32>
    %c0_69 = arith.constant 0 : index
    %c0_70 = arith.constant 0 : index
    %c0_71 = arith.constant 0 : index
    %117 = vector.load %arg18[%c0_69, %c0_70, %c0_71] : memref<2x1x32xf32, #tpu.memory_space<vmem>>, vector<1x1x32xf32>
    %118 = vector.shape_cast %117 : vector<1x1x32xf32> to vector<1x32xf32>
    %cst_72 = arith.constant dense<0.000000e+00> : vector<8xf32>
    %119 = vector.multi_reduction <add>, %114, %cst_72 [1] : vector<8x32xf32> to vector<8xf32>
    %120 = vector.shape_cast %119 : vector<8xf32> to vector<8x1xf32>
    %cst_73 = arith.constant 3.200000e+01 : f32
    %121 = vector.broadcast %cst_73 : f32 to vector<8x1xf32>
    %122 = arith.divf %120, %121 : vector<8x1xf32>
    %123 = vector.broadcast %122 : vector<8x1xf32> to vector<8x32xf32>
    %124 = arith.subf %114, %123 : vector<8x32xf32>
    %125 = arith.mulf %124, %124 : vector<8x32xf32>
    %cst_74 = arith.constant dense<0.000000e+00> : vector<8xf32>
    %126 = vector.multi_reduction <add>, %125, %cst_74 [1] : vector<8x32xf32> to vector<8xf32>
    %127 = vector.shape_cast %126 : vector<8xf32> to vector<8x1xf32>
    %cst_75 = arith.constant 3.200000e+01 : f32
    %128 = vector.broadcast %cst_75 : f32 to vector<8x1xf32>
    %129 = arith.divf %127, %128 : vector<8x1xf32>
    %cst_76 = arith.constant 9.99999996E-13 : f32
    %130 = vector.broadcast %cst_76 : f32 to vector<8x1xf32>
    %131 = arith.addf %129, %130 : vector<8x1xf32>
    %132 = math.rsqrt %131 : vector<8x1xf32>
    %133 = vector.broadcast %132 : vector<8x1xf32> to vector<8x32xf32>
    %134 = arith.mulf %124, %133 : vector<8x32xf32>
    %135 = vector.broadcast %116 : vector<1x32xf32> to vector<8x32xf32>
    %136 = arith.mulf %134, %135 : vector<8x32xf32>
    %137 = vector.broadcast %118 : vector<1x32xf32> to vector<8x32xf32>
    %138 = arith.addf %136, %137 : vector<8x32xf32>
    %139 = arith.truncf %138 : vector<8x32xf32> to vector<8x32xbf16>
    %c1 = arith.constant 1 : index
    %c0_77 = arith.constant 0 : index
    %c0_78 = arith.constant 0 : index
    %140 = vector.load %arg3[%c1, %c0_77, %c0_78] : memref<2x32x32xbf16, #tpu.memory_space<vmem>>, vector<1x32x32xbf16>
    %141 = vector.shape_cast %140 : vector<1x32x32xbf16> to vector<32x32xbf16>
    %cst_79 = arith.constant dense<0.000000e+00> : vector<8x32xf32>
    %142 = tpu.matmul %139, %141, %cst_79 {dimension_numbers = #tpu.dot_dimension_numbers<[1], [0], [0], [1], [0, 0, 1, 1], [], []>} : vector<8x32xbf16>, vector<32x32xbf16>, vector<8x32xf32> -> vector<8x32xf32>
    %c1_80 = arith.constant 1 : index
    %c0_81 = arith.constant 0 : index
    %c0_82 = arith.constant 0 : index
    %143 = vector.load %arg4[%c1_80, %c0_81, %c0_82] : memref<2x1x32xf32, #tpu.memory_space<vmem>>, vector<1x1x32xf32>
    %144 = vector.shape_cast %143 : vector<1x1x32xf32> to vector<1x32xf32>
    %145 = vector.broadcast %144 : vector<1x32xf32> to vector<8x32xf32>
    %146 = arith.addf %142, %145 : vector<8x32xf32>
    %c1_83 = arith.constant 1 : index
    %c0_84 = arith.constant 0 : index
    %c0_85 = arith.constant 0 : index
    %147 = vector.load %arg5[%c1_83, %c0_84, %c0_85] : memref<2x32x32xbf16, #tpu.memory_space<vmem>>, vector<1x32x32xbf16>
    %148 = vector.shape_cast %147 : vector<1x32x32xbf16> to vector<32x32xbf16>
    %cst_86 = arith.constant dense<0.000000e+00> : vector<8x32xf32>
    %149 = tpu.matmul %139, %148, %cst_86 {dimension_numbers = #tpu.dot_dimension_numbers<[1], [0], [0], [1], [0, 0, 1, 1], [], []>} : vector<8x32xbf16>, vector<32x32xbf16>, vector<8x32xf32> -> vector<8x32xf32>
    %c1_87 = arith.constant 1 : index
    %c0_88 = arith.constant 0 : index
    %c0_89 = arith.constant 0 : index
    %150 = vector.load %arg6[%c1_87, %c0_88, %c0_89] : memref<2x1x32xf32, #tpu.memory_space<vmem>>, vector<1x1x32xf32>
    %151 = vector.shape_cast %150 : vector<1x1x32xf32> to vector<1x32xf32>
    %152 = vector.broadcast %151 : vector<1x32xf32> to vector<8x32xf32>
    %153 = arith.addf %149, %152 : vector<8x32xf32>
    %c1_90 = arith.constant 1 : index
    %c0_91 = arith.constant 0 : index
    %c0_92 = arith.constant 0 : index
    %154 = vector.load %arg7[%c1_90, %c0_91, %c0_92] : memref<2x32x32xbf16, #tpu.memory_space<vmem>>, vector<1x32x32xbf16>
    %155 = vector.shape_cast %154 : vector<1x32x32xbf16> to vector<32x32xbf16>
    %cst_93 = arith.constant dense<0.000000e+00> : vector<8x32xf32>
    %156 = tpu.matmul %139, %155, %cst_93 {dimension_numbers = #tpu.dot_dimension_numbers<[1], [0], [0], [1], [0, 0, 1, 1], [], []>} : vector<8x32xbf16>, vector<32x32xbf16>, vector<8x32xf32> -> vector<8x32xf32>
    %c1_94 = arith.constant 1 : index
    %c0_95 = arith.constant 0 : index
    %c0_96 = arith.constant 0 : index
    %157 = vector.load %arg8[%c1_94, %c0_95, %c0_96] : memref<2x1x32xf32, #tpu.memory_space<vmem>>, vector<1x1x32xf32>
    %158 = vector.shape_cast %157 : vector<1x1x32xf32> to vector<1x32xf32>
    %159 = vector.broadcast %158 : vector<1x32xf32> to vector<8x32xf32>
    %160 = arith.addf %156, %159 : vector<8x32xf32>
    %161 = vector.shape_cast %146 : vector<8x32xf32> to vector<8x4x8xf32>
    %162 = arith.truncf %161 : vector<8x4x8xf32> to vector<8x4x8xbf16>
    %163 = vector.shape_cast %153 : vector<8x32xf32> to vector<8x4x8xf32>
    %164 = arith.truncf %163 : vector<8x4x8xf32> to vector<8x4x8xbf16>
    %165 = vector.shape_cast %160 : vector<8x32xf32> to vector<8x4x8xf32>
    %166 = arith.truncf %165 : vector<8x4x8xf32> to vector<8x4x8xbf16>
    "tpu.trace_start"() <{level = 10 : i32, message = "qhd,khd->hqk"}> : () -> ()
    %cst_97 = arith.constant dense<0.000000e+00> : vector<4x8x8xf32>
    %167 = tpu.matmul %162, %164, %cst_97 {dimension_numbers = #tpu.dot_dimension_numbers<[2], [2], [0], [0], [0, 1, 0, 0, 1, 0], [1], [1]>} : vector<8x4x8xbf16>, vector<8x4x8xbf16>, vector<4x8x8xf32> -> vector<4x8x8xf32>
    "tpu.trace_stop"() : () -> ()
    %cst_98 = arith.constant 0.353553385 : f32
    %168 = vector.broadcast %cst_98 : f32 to vector<4x8x8xf32>
    %169 = arith.mulf %167, %168 : vector<4x8x8xf32>
    %170 = vector.shape_cast %3 : vector<1x8xf32> to vector<1x1x8xf32>
    %171 = vector.broadcast %170 : vector<1x1x8xf32> to vector<4x8x8xf32>
    %172 = arith.addf %169, %171 : vector<4x8x8xf32>
    %cst_99 = arith.constant dense<0xFF800000> : vector<4x8xf32>
    %173 = vector.multi_reduction <maximumf>, %172, %cst_99 [2] : vector<4x8x8xf32> to vector<4x8xf32>
    %174 = vector.shape_cast %173 : vector<4x8xf32> to vector<4x8x1xf32>
    %175 = vector.broadcast %174 : vector<4x8x1xf32> to vector<4x8x8xf32>
    %176 = arith.subf %172, %175 : vector<4x8x8xf32>
    %177 = math.exp %176 : vector<4x8x8xf32>
    %cst_100 = arith.constant dense<0.000000e+00> : vector<4x8xf32>
    %178 = vector.multi_reduction <add>, %177, %cst_100 [2] : vector<4x8x8xf32> to vector<4x8xf32>
    %179 = vector.shape_cast %178 : vector<4x8xf32> to vector<4x8x1xf32>
    %180 = tpu.reciprocal %179 {approx = true} : vector<4x8x1xf32> -> vector<4x8x1xf32>
    %181 = vector.broadcast %180 : vector<4x8x1xf32> to vector<4x8x8xf32>
    %182 = arith.mulf %177, %181 : vector<4x8x8xf32>
    %183 = arith.truncf %182 : vector<4x8x8xf32> to vector<4x8x8xbf16>
    "tpu.trace_start"() <{level = 10 : i32, message = "hqk,khd->qhd"}> : () -> ()
    %cst_101 = arith.constant dense<0.000000e+00> : vector<4x8x8xf32>
    %184 = tpu.matmul %166, %183, %cst_101 {dimension_numbers = #tpu.dot_dimension_numbers<[0], [2], [2], [1], [0, 1, 0, 2, 1, 1], [1], [0]>} : vector<8x4x8xbf16>, vector<4x8x8xbf16>, vector<4x8x8xf32> -> vector<4x8x8xf32>
    %185 = tpu.transpose %184, [2, 0, 1] : vector<4x8x8xf32> -> vector<8x4x8xf32>
    "tpu.trace_stop"() : () -> ()
    %186 = vector.shape_cast %185 : vector<8x4x8xf32> to vector<8x32xf32>
    %187 = arith.truncf %186 : vector<8x32xf32> to vector<8x32xbf16>
    %c1_102 = arith.constant 1 : index
    %c0_103 = arith.constant 0 : index
    %c0_104 = arith.constant 0 : index
    %188 = vector.load %arg9[%c1_102, %c0_103, %c0_104] : memref<2x32x32xbf16, #tpu.memory_space<vmem>>, vector<1x32x32xbf16>
    %189 = vector.shape_cast %188 : vector<1x32x32xbf16> to vector<32x32xbf16>
    %cst_105 = arith.constant dense<0.000000e+00> : vector<8x32xf32>
    %190 = tpu.matmul %187, %189, %cst_105 {dimension_numbers = #tpu.dot_dimension_numbers<[1], [0], [0], [1], [0, 0, 1, 1], [], []>} : vector<8x32xbf16>, vector<32x32xbf16>, vector<8x32xf32> -> vector<8x32xf32>
    %c1_106 = arith.constant 1 : index
    %c0_107 = arith.constant 0 : index
    %c0_108 = arith.constant 0 : index
    %191 = vector.load %arg10[%c1_106, %c0_107, %c0_108] : memref<2x1x32xf32, #tpu.memory_space<vmem>>, vector<1x1x32xf32>
    %192 = vector.shape_cast %191 : vector<1x1x32xf32> to vector<1x32xf32>
    %193 = vector.broadcast %192 : vector<1x32xf32> to vector<8x32xf32>
    %194 = arith.addf %190, %193 : vector<8x32xf32>
    %195 = arith.addf %194, %138 : vector<8x32xf32>
    %c1_109 = arith.constant 1 : index
    %c0_110 = arith.constant 0 : index
    %c0_111 = arith.constant 0 : index
    %196 = vector.load %arg11[%c1_109, %c0_110, %c0_111] : memref<2x1x32xf32, #tpu.memory_space<vmem>>, vector<1x1x32xf32>
    %197 = vector.shape_cast %196 : vector<1x1x32xf32> to vector<1x32xf32>
    %c1_112 = arith.constant 1 : index
    %c0_113 = arith.constant 0 : index
    %c0_114 = arith.constant 0 : index
    %198 = vector.load %arg12[%c1_112, %c0_113, %c0_114] : memref<2x1x32xf32, #tpu.memory_space<vmem>>, vector<1x1x32xf32>
    %199 = vector.shape_cast %198 : vector<1x1x32xf32> to vector<1x32xf32>
    %cst_115 = arith.constant dense<0.000000e+00> : vector<8xf32>
    %200 = vector.multi_reduction <add>, %195, %cst_115 [1] : vector<8x32xf32> to vector<8xf32>
    %201 = vector.shape_cast %200 : vector<8xf32> to vector<8x1xf32>
    %cst_116 = arith.constant 3.200000e+01 : f32
    %202 = vector.broadcast %cst_116 : f32 to vector<8x1xf32>
    %203 = arith.divf %201, %202 : vector<8x1xf32>
    %204 = vector.broadcast %203 : vector<8x1xf32> to vector<8x32xf32>
    %205 = arith.subf %195, %204 : vector<8x32xf32>
    %206 = arith.mulf %205, %205 : vector<8x32xf32>
    %cst_117 = arith.constant dense<0.000000e+00> : vector<8xf32>
    %207 = vector.multi_reduction <add>, %206, %cst_117 [1] : vector<8x32xf32> to vector<8xf32>
    %208 = vector.shape_cast %207 : vector<8xf32> to vector<8x1xf32>
    %cst_118 = arith.constant 3.200000e+01 : f32
    %209 = vector.broadcast %cst_118 : f32 to vector<8x1xf32>
    %210 = arith.divf %208, %209 : vector<8x1xf32>
    %cst_119 = arith.constant 9.99999996E-13 : f32
    %211 = vector.broadcast %cst_119 : f32 to vector<8x1xf32>
    %212 = arith.addf %210, %211 : vector<8x1xf32>
    %213 = math.rsqrt %212 : vector<8x1xf32>
    %214 = vector.broadcast %213 : vector<8x1xf32> to vector<8x32xf32>
    %215 = arith.mulf %205, %214 : vector<8x32xf32>
    %216 = vector.broadcast %197 : vector<1x32xf32> to vector<8x32xf32>
    %217 = arith.mulf %215, %216 : vector<8x32xf32>
    %218 = vector.broadcast %199 : vector<1x32xf32> to vector<8x32xf32>
    %219 = arith.addf %217, %218 : vector<8x32xf32>
    %220 = arith.truncf %219 : vector<8x32xf32> to vector<8x32xbf16>
    %c1_120 = arith.constant 1 : index
    %c0_121 = arith.constant 0 : index
    %c0_122 = arith.constant 0 : index
    %221 = vector.load %arg13[%c1_120, %c0_121, %c0_122] : memref<2x32x64xbf16, #tpu.memory_space<vmem>>, vector<1x32x64xbf16>
    %222 = vector.shape_cast %221 : vector<1x32x64xbf16> to vector<32x64xbf16>
    %cst_123 = arith.constant dense<0.000000e+00> : vector<8x64xf32>
    %223 = tpu.matmul %220, %222, %cst_123 {dimension_numbers = #tpu.dot_dimension_numbers<[1], [0], [0], [1], [0, 0, 1, 1], [], []>} : vector<8x32xbf16>, vector<32x64xbf16>, vector<8x64xf32> -> vector<8x64xf32>
    %c1_124 = arith.constant 1 : index
    %c0_125 = arith.constant 0 : index
    %c0_126 = arith.constant 0 : index
    %224 = vector.load %arg14[%c1_124, %c0_125, %c0_126] : memref<2x1x64xf32, #tpu.memory_space<vmem>>, vector<1x1x64xf32>
    %225 = vector.shape_cast %224 : vector<1x1x64xf32> to vector<1x64xf32>
    %226 = vector.broadcast %225 : vector<1x64xf32> to vector<8x64xf32>
    %227 = arith.addf %223, %226 : vector<8x64xf32>
    %cst_127 = arith.constant 5.000000e-01 : f32
    %228 = vector.broadcast %cst_127 : f32 to vector<8x64xf32>
    %229 = arith.mulf %228, %227 : vector<8x64xf32>
    %cst_128 = arith.constant 4.471500e-02 : f32
    %230 = vector.broadcast %cst_128 : f32 to vector<8x64xf32>
    %231 = arith.mulf %230, %227 : vector<8x64xf32>
    %232 = arith.mulf %231, %227 : vector<8x64xf32>
    %233 = arith.mulf %232, %227 : vector<8x64xf32>
    %234 = arith.addf %227, %233 : vector<8x64xf32>
    %cst_129 = arith.constant 0.797884583 : f32
    %235 = vector.broadcast %cst_129 : f32 to vector<8x64xf32>
    %236 = arith.mulf %235, %234 : vector<8x64xf32>
    %237 = math.tanh %236 : vector<8x64xf32>
    %cst_130 = arith.constant 1.000000e+00 : f32
    %238 = vector.broadcast %cst_130 : f32 to vector<8x64xf32>
    %239 = arith.addf %238, %237 : vector<8x64xf32>
    %240 = arith.mulf %229, %239 : vector<8x64xf32>
    %241 = arith.truncf %240 : vector<8x64xf32> to vector<8x64xbf16>
    %c1_131 = arith.constant 1 : index
    %c0_132 = arith.constant 0 : index
    %c0_133 = arith.constant 0 : index
    %242 = vector.load %arg15[%c1_131, %c0_132, %c0_133] : memref<2x64x32xbf16, #tpu.memory_space<vmem>>, vector<1x64x32xbf16>
    %243 = vector.shape_cast %242 : vector<1x64x32xbf16> to vector<64x32xbf16>
    %cst_134 = arith.constant dense<0.000000e+00> : vector<8x32xf32>
    %244 = tpu.matmul %241, %243, %cst_134 {dimension_numbers = #tpu.dot_dimension_numbers<[1], [0], [0], [1], [0, 0, 1, 1], [], []>} : vector<8x64xbf16>, vector<64x32xbf16>, vector<8x32xf32> -> vector<8x32xf32>
    %c1_135 = arith.constant 1 : index
    %c0_136 = arith.constant 0 : index
    %c0_137 = arith.constant 0 : index
    %245 = vector.load %arg16[%c1_135, %c0_136, %c0_137] : memref<2x1x32xf32, #tpu.memory_space<vmem>>, vector<1x1x32xf32>
    %246 = vector.shape_cast %245 : vector<1x1x32xf32> to vector<1x32xf32>
    %247 = vector.broadcast %246 : vector<1x32xf32> to vector<8x32xf32>
    %248 = arith.addf %244, %247 : vector<8x32xf32>
    %249 = arith.addf %248, %219 : vector<8x32xf32>
    %c1_138 = arith.constant 1 : index
    %c0_139 = arith.constant 0 : index
    %c0_140 = arith.constant 0 : index
    %250 = vector.load %arg17[%c1_138, %c0_139, %c0_140] : memref<2x1x32xf32, #tpu.memory_space<vmem>>, vector<1x1x32xf32>
    %251 = vector.shape_cast %250 : vector<1x1x32xf32> to vector<1x32xf32>
    %c1_141 = arith.constant 1 : index
    %c0_142 = arith.constant 0 : index
    %c0_143 = arith.constant 0 : index
    %252 = vector.load %arg18[%c1_141, %c0_142, %c0_143] : memref<2x1x32xf32, #tpu.memory_space<vmem>>, vector<1x1x32xf32>
    %253 = vector.shape_cast %252 : vector<1x1x32xf32> to vector<1x32xf32>
    %cst_144 = arith.constant dense<0.000000e+00> : vector<8xf32>
    %254 = vector.multi_reduction <add>, %249, %cst_144 [1] : vector<8x32xf32> to vector<8xf32>
    %255 = vector.shape_cast %254 : vector<8xf32> to vector<8x1xf32>
    %cst_145 = arith.constant 3.200000e+01 : f32
    %256 = vector.broadcast %cst_145 : f32 to vector<8x1xf32>
    %257 = arith.divf %255, %256 : vector<8x1xf32>
    %258 = vector.broadcast %257 : vector<8x1xf32> to vector<8x32xf32>
    %259 = arith.subf %249, %258 : vector<8x32xf32>
    %260 = arith.mulf %259, %259 : vector<8x32xf32>
    %cst_146 = arith.constant dense<0.000000e+00> : vector<8xf32>
    %261 = vector.multi_reduction <add>, %260, %cst_146 [1] : vector<8x32xf32> to vector<8xf32>
    %262 = vector.shape_cast %261 : vector<8xf32> to vector<8x1xf32>
    %cst_147 = arith.constant 3.200000e+01 : f32
    %263 = vector.broadcast %cst_147 : f32 to vector<8x1xf32>
    %264 = arith.divf %262, %263 : vector<8x1xf32>
    %cst_148 = arith.constant 9.99999996E-13 : f32
    %265 = vector.broadcast %cst_148 : f32 to vector<8x1xf32>
    %266 = arith.addf %264, %265 : vector<8x1xf32>
    %267 = math.rsqrt %266 : vector<8x1xf32>
    %268 = vector.broadcast %267 : vector<8x1xf32> to vector<8x32xf32>
    %269 = arith.mulf %259, %268 : vector<8x32xf32>
    %270 = vector.broadcast %251 : vector<1x32xf32> to vector<8x32xf32>
    %271 = arith.mulf %269, %270 : vector<8x32xf32>
    %272 = vector.broadcast %253 : vector<1x32xf32> to vector<8x32xf32>
    %273 = arith.addf %271, %272 : vector<8x32xf32>
    %c0_149 = arith.constant 0 : index
    %c0_150 = arith.constant 0 : index
    %c0_151 = arith.constant 0 : index
    %274 = vector.load %arg19[%c0_149, %c0_150, %c0_151] : memref<1x8x32xf32, #tpu.memory_space<vmem>>, vector<1x8x32xf32>
    %275 = vector.shape_cast %274 : vector<1x8x32xf32> to vector<8x32xf32>
    %276 = vector.shape_cast %273 : vector<8x32xf32> to vector<1x8x32xf32>
    tpu.vector_store %arg19[%c0_149, %c0_150, %c0_151], %276 {strides = array<i32>} : memref<1x8x32xf32, #tpu.memory_space<vmem>>, vector<1x8x32xf32>,
    return
  }
  func.func @transform_0(%arg0: i32) -> (i32, i32, i32) {
    %c0_i32 = arith.constant 0 : i32
    %c0_i32_0 = arith.constant 0 : i32
    %c0_i32_1 = arith.constant 0 : i32
    return %arg0, %c0_i32, %c0_i32_0 : i32, i32, i32
  }
  func.func @transform_1(%arg0: i32) -> (i32, i32, i32) {
    %c0_i32 = arith.constant 0 : i32
    %c0_i32_0 = arith.constant 0 : i32
    %c0_i32_1 = arith.constant 0 : i32
    return %arg0, %c0_i32, %c0_i32_0 : i32, i32, i32
  }
  func.func @transform_2(%arg0: i32) -> (i32, i32, i32) {
    %c0_i32 = arith.constant 0 : i32
    %c0_i32_0 = arith.constant 0 : i32
    %c0_i32_1 = arith.constant 0 : i32
    %c0_i32_2 = arith.constant 0 : i32
    return %c0_i32, %c0_i32_0, %c0_i32_1 : i32, i32, i32
  }
  func.func @transform_3(%arg0: i32) -> (i32, i32, i32) {
    %c0_i32 = arith.constant 0 : i32
    %c0_i32_0 = arith.constant 0 : i32
    %c0_i32_1 = arith.constant 0 : i32
    %c0_i32_2 = arith.constant 0 : i32
    return %c0_i32, %c0_i32_0, %c0_i32_1 : i32, i32, i32
  }
  func.func @transform_4(%arg0: i32) -> (i32, i32, i32) {
    %c0_i32 = arith.constant 0 : i32
    %c0_i32_0 = arith.constant 0 : i32
    %c0_i32_1 = arith.constant 0 : i32
    %c0_i32_2 = arith.constant 0 : i32
    return %c0_i32, %c0_i32_0, %c0_i32_1 : i32, i32, i32
  }
  func.func @transform_5(%arg0: i32) -> (i32, i32, i32) {
    %c0_i32 = arith.constant 0 : i32
    %c0_i32_0 = arith.constant 0 : i32
    %c0_i32_1 = arith.constant 0 : i32
    %c0_i32_2 = arith.constant 0 : i32
    return %c0_i32, %c0_i32_0, %c0_i32_1 : i32, i32, i32
  }
  func.func @transform_6(%arg0: i32) -> (i32, i32, i32) {
    %c0_i32 = arith.constant 0 : i32
    %c0_i32_0 = arith.constant 0 : i32
    %c0_i32_1 = arith.constant 0 : i32
    %c0_i32_2 = arith.constant 0 : i32
    return %c0_i32, %c0_i32_0, %c0_i32_1 : i32, i32, i32
  }
  func.func @transform_7(%arg0: i32) -> (i32, i32, i32) {
    %c0_i32 = arith.constant 0 : i32
    %c0_i32_0 = arith.constant 0 : i32
    %c0_i32_1 = arith.constant 0 : i32
    %c0_i32_2 = arith.constant 0 : i32
    return %c0_i32, %c0_i32_0, %c0_i32_1 : i32, i32, i32
  }
  func.func @transform_8(%arg0: i32) -> (i32, i32, i32) {
    %c0_i32 = arith.constant 0 : i32
    %c0_i32_0 = arith.constant 0 : i32
    %c0_i32_1 = arith.constant 0 : i32
    %c0_i32_2 = arith.constant 0 : i32
    return %c0_i32, %c0_i32_0, %c0_i32_1 : i32, i32, i32
  }
  func.func @transform_9(%arg0: i32) -> (i32, i32, i32) {
    %c0_i32 = arith.constant 0 : i32
    %c0_i32_0 = arith.constant 0 : i32
    %c0_i32_1 = arith.constant 0 : i32
    %c0_i32_2 = arith.constant 0 : i32
    return %c0_i32, %c0_i32_0, %c0_i32_1 : i32, i32, i32
  }
  func.func @transform_10(%arg0: i32) -> (i32, i32, i32) {
    %c0_i32 = arith.constant 0 : i32
    %c0_i32_0 = arith.constant 0 : i32
    %c0_i32_1 = arith.constant 0 : i32
    %c0_i32_2 = arith.constant 0 : i32
    return %c0_i32, %c0_i32_0, %c0_i32_1 : i32, i32, i32
  }
  func.func @transform_11(%arg0: i32) -> (i32, i32, i32) {
    %c0_i32 = arith.constant 0 : i32
    %c0_i32_0 = arith.constant 0 : i32
    %c0_i32_1 = arith.constant 0 : i32
    %c0_i32_2 = arith.constant 0 : i32
    return %c0_i32, %c0_i32_0, %c0_i32_1 : i32, i32, i32
  }
  func.func @transform_12(%arg0: i32) -> (i32, i32, i32) {
    %c0_i32 = arith.constant 0 : i32
    %c0_i32_0 = arith.constant 0 : i32
    %c0_i32_1 = arith.constant 0 : i32
    %c0_i32_2 = arith.constant 0 : i32
    return %c0_i32, %c0_i32_0, %c0_i32_1 : i32, i32, i32
  }
  func.func @transform_13(%arg0: i32) -> (i32, i32, i32) {
    %c0_i32 = arith.constant 0 : i32
    %c0_i32_0 = arith.constant 0 : i32
    %c0_i32_1 = arith.constant 0 : i32
    %c0_i32_2 = arith.constant 0 : i32
    return %c0_i32, %c0_i32_0, %c0_i32_1 : i32, i32, i32
  }
  func.func @transform_14(%arg0: i32) -> (i32, i32, i32) {
    %c0_i32 = arith.constant 0 : i32
    %c0_i32_0 = arith.constant 0 : i32
    %c0_i32_1 = arith.constant 0 : i32
    %c0_i32_2 = arith.constant 0 : i32
    return %c0_i32, %c0_i32_0, %c0_i32_1 : i32, i32, i32
  }
  func.func @transform_15(%arg0: i32) -> (i32, i32, i32) {
    %c0_i32 = arith.constant 0 : i32
    %c0_i32_0 = arith.constant 0 : i32
    %c0_i32_1 = arith.constant 0 : i32
    %c0_i32_2 = arith.constant 0 : i32
    return %c0_i32, %c0_i32_0, %c0_i32_1 : i32, i32, i32
  }
  func.func @transform_16(%arg0: i32) -> (i32, i32, i32) {
    %c0_i32 = arith.constant 0 : i32
    %c0_i32_0 = arith.constant 0 : i32
    %c0_i32_1 = arith.constant 0 : i32
    %c0_i32_2 = arith.constant 0 : i32
    return %c0_i32, %c0_i32_0, %c0_i32_1 : i32, i32, i32
  }
  func.func @transform_17(%arg0: i32) -> (i32, i32, i32) {
    %c0_i32 = arith.constant 0 : i32
    %c0_i32_0 = arith.constant 0 : i32
    %c0_i32_1 = arith.constant 0 : i32
    %c0_i32_2 = arith.constant 0 : i32
    return %c0_i32, %c0_i32_0, %c0_i32_1 : i32, i32, i32
  }
  func.func @transform_18(%arg0: i32) -> (i32, i32, i32) {
    %c0_i32 = arith.constant 0 : i32
    %c0_i32_0 = arith.constant 0 : i32
    %c0_i32_1 = arith.constant 0 : i32
    return %arg0, %c0_i32, %c0_i32_0 : i32, i32, i32
  }
}

</mosaic_0001>

<bundles_post_ra>
// kernel: tpu_custom_call.1
= control target key start
LH: loop header
LB: loop body
LE: loop exit
PB: predicated region body
PF: predicated region fallthrough
CT: control target
= control target key end

     0   :  { %s6420_s0 = inlined_call_operand.hbm [shape: f32[2,8,32], index: 0, kind: input, shape index: {}]   ;;  %s6421_s1 = inlined_call_operand.hbm [shape: f32[2,1,8], index: 1, kind: input, shape index: {}]   ;;  %s6422_s2 = inlined_call_operand.vmem [shape: bf16[2,32,32], index: 2, kind: input, shape index: {}]   ;;  %s6423_s3 = inlined_call_operand.hbm [shape: f32[2,1,32], index: 3, kind: input, shape index: {}]   ;;  %s6424_s4 = inlined_call_operand.vmem [shape: bf16[2,32,32], index: 4, kind: input, shape index: {}]   ;;  %s6425_s5 = inlined_call_operand.vmem [shape: f32[2,1,32], index: 5, kind: input, shape index: {}]   ;;  %s6426_s6 = inlined_call_operand.vmem [shape: bf16[2,32,32], index: 6, kind: input, shape index: {}]   ;;  %s6427_s7 = inlined_call_operand.vmem [shape: f32[2,1,32], index: 7, kind: input, shape index: {}]   ;;  %s6428_s8 = inlined_call_operand.hbm [shape: bf16[2,32,32], index: 8, kind: input, shape index: {}]   ;;  %s6429_s9 = inlined_call_operand.vmem [shape: f32[2,1,32], index: 9, kind: input, shape index: {}]   ;;  %s6430_s10 = inlined_call_operand.vmem [shape: f32[2,1,32], index: 10, kind: input, shape index: {}]   ;;  %s6431_s11 = inlined_call_operand.hbm [shape: f32[2,1,32], index: 11, kind: input, shape index: {}]   ;;  %s6432_s12 = inlined_call_operand.hbm [shape: bf16[2,32,64], index: 12, kind: input, shape index: {}]   ;;  %s6433_s13 = inlined_call_operand.vmem [shape: f32[2,1,64], index: 13, kind: input, shape index: {}]   ;;  %s6434_s14 = inlined_call_operand.vmem [shape: bf16[2,64,32], index: 14, kind: input, shape index: {}]   ;;  %s6435_s15 = inlined_call_operand.vmem [shape: f32[2,1,32], index: 15, kind: input, shape index: {}]   ;;  %s6436_s16 = inlined_call_operand.vmem [shape: f32[2,1,32], index: 16, kind: input, shape index: {}]   ;;  %s6437_s17 = inlined_call_operand.hbm [shape: f32[2,1,32], index: 17, kind: input, shape index: {}]   ;;  %s6438_s18 = inlined_call_operand.hbm [shape: f32[2,8,32], index: 18, kind: output, shape index: {}]  }
   0x1   :  { %6456 = sst [smem:[#allocation27_spill]] %s6420_s0 }
   0x2   :  { %6457 = sst [smem:[#allocation28_spill]] %s6421_s1 }
   0x3   :  { %6458 = sst [smem:[#allocation29_spill]] %s6422_s2 }
   0x4   :  { %6459 = sst [smem:[#allocation30_spill]] %s6423_s3 }
   0x5   :  { %6460 = sst [smem:[#allocation31_spill]] %s6428_s8 }
   0x6   :  { %6461 = sst [smem:[#allocation32_spill]] %s6431_s11 }
   0x7   :  { %6462 = sst [smem:[#allocation33_spill]] %s6432_s12 }
   0x8   :  { %6463 = sst [smem:[#allocation34_spill]] %s6433_s13 }
   0x9   :  { %6464 = sst [smem:[#allocation35_spill]] %s6434_s14 }
   0xa   :  { %6465 = sst [smem:[#allocation36_spill]] %s6435_s15 }
   0xb   :  { %6466 = sst [smem:[#allocation37_spill]] %s6436_s16 }
   0xc   :  { %6467 = sst [smem:[#allocation38_spill]] %s6437_s17 }
   0xd   :  { %6468 = sst [smem:[#allocation39_spill]] %s6438_s18 }
   0xe   :  { %23 = vsyncpa [#allocation3], 0 }
   0xf   :  { %25 = vsyncpa [#allocation3 + $0x1], 0 }
  0x10   :  { %26 = vsyncpa [#allocation6], 0 }
  0x11   :  { %28 = vsyncpa [#allocation6 + $0x1], 0 }
  0x12   :  { %29 = vsyncpa [#allocation9], 0 }
  0x13   :  { %30 = vsyncpa [#allocation12], 0 }
  0x14   :  { %31 = vsyncpa [#allocation4], 0 }
  0x15   :  { %33 = vsyncpa [#allocation4 + $0x1], 0  ;;  %s5508_s27 = smov 0   ;;  %s5510_s28 = smov 0  }
  0x16   :  { %s5512_s29 = smov 0   ;;  %s5514_s30 = smov 0  }
  0x17 LB: > { %6469 = sst [smem:[#allocation21_spill]] %s5381_s27  ;;  %s5532_s20 = sadd.s32 4294967295, %s5393_s30   ;;  %s5393_s30 = sphi %s5514_s30, %s6503_s30   ;;  %s5389_s29 = sphi %s5512_s29, %s6505_s29   ;;  %s5385_s28 = sphi %s5510_s28, %s6507_s28   ;;  %s5381_s27 = sphi %s5508_s27, %s6506_s27  }
  0x18   : > { %6470 = sst [smem:[#allocation22_spill]] %s5389_s29  ;;  %p4565_p0 = scmp.ge.s32.totalorder %s5393_s30, 1 }
  0x19   : > { %6471 = sst [smem:[#allocation23_spill]] %s5393_s30  ;;  %p60_p1 = scmp.eq.s32.totalorder %s5532_s20, 0 }
  0x1a   : > { %s6472_s3 = sld [smem:[#allocation30_spill]]  ;;  %p458_p2 = scmp.lt.s32.totalorder %s5393_s30, 3 }
  0x1b   : > { %s5395_s22 = smov [#allocation7]   ;;  %s6474_s8 = sld [smem:[#allocation31_spill]] }
  0x1c   : > { %p5537_p3 = pnand %p4565_p0, %p458_p2  ;;  %s474_s2 = sshll.u32 %s5395_s22, 4  ;;  %s475_s2 = int_to_ptr.vmem [resolvable:$true] %s474_s2 }
  0x1d   : > { %s5396_s0 = smov [#allocation8]   ;;  %s5397_s22 = smov 16  }
  0x1e   : > { %p4807_p4 = pneg %p5537_p3  ;;  %s500_s19 = sshll.u32 %s5396_s0, 4  ;;  %s501_s19 = int_to_ptr.vmem [resolvable:$true] %s500_s19 }
  0x1f   : > { %s5399_s18 = smov 64   ;;  %s5400_s23 = smov 4  }
  0x20   : > { %s472_s1 = sshll.u32 %s6472_s3, 4  ;;  %p5549_p6 = pnand %p4807_p4, %p60_p1  ;;  %s473_s1 = int_to_ptr.hbm [resolvable:$true] %s472_s1 }
  0x21   : > { %s498_s25 = sshll.u32 %s6474_s8, 4  ;;  %s5398_s3 = smov 1   ;;  %s499_s25 = int_to_ptr.hbm [resolvable:$true] %s498_s25 }
  0x22   : > { %4810 = dma.hbm_to_vmem [thread:$0]  (!%p5549_p6), %s473_s1, 32, %s475_s2, [#allocation6], %s5397_s22, %s5397_s22, %s5398_s3  }
  0x23   : > { %4813 = dma.hbm_to_vmem [thread:$0]  (!%p5549_p6), %s499_s25, 512, %s501_s19, [#allocation9], %s5399_s18, %s5399_s18, %s5400_s23  }
  0x24   : > { %s6476_s12 = sld [smem:[#allocation33_spill]]  ;;  %s5401_s15 = smov [#allocation11]  }
  0x25   : > { %s534_s13 = sshll.u32 %s5401_s15, 4  ;;  %s6477_s11 = sld [smem:[#allocation32_spill]]  ;;  %s535_s13 = int_to_ptr.vmem [resolvable:$true] %s534_s13 }
  0x26   : > { %s5402_s8 = smov [#allocation10]   ;;  %s6478_s17 = sld [smem:[#allocation38_spill]] }
  0x27   : > { %s520_s2 = sshll.u32 %s5402_s8, 4  ;;  %p53_p7 = scmp.ne.s32.totalorder %s5389_s29, %s5385_s28  ;;  %s521_s2 = int_to_ptr.vmem [resolvable:$true] %s520_s2 }
  0x28   : > { %p54_p9 = scmp.eq.s32.totalorder %s5393_s30, 0  ;;  %p59_p10 = scmp.ne.s32.totalorder %s5385_s28, %s5381_s27 }
  0x29   : > { %p445_p11 = scmp.eq.s32.totalorder %s5532_s20, 1  ;;  %p4839_p4 = scmp.lt.s32.totalorder %s5393_s30, 2 }
  0x2a   : > { %s532_s16 = sshll.u32 %s6476_s12, 4  ;;  %p5588_p12 = por %p54_p9, %p53_p7  ;;  %s533_s16 = int_to_ptr.hbm [resolvable:$true] %s532_s16 }
  0x2b   : > { %s518_s1 = sshll.u32 %s6477_s11, 4  ;;  %p5594_p13 = por %p60_p1, %p59_p10  ;;  %s519_s1 = int_to_ptr.hbm [resolvable:$true] %s518_s1 }
  0x2c   : > { %4819 = dma.hbm_to_vmem [thread:$0]  (!%p5549_p6), %s533_s16, 512, %s535_s13, [#allocation12], %s5399_s18, %s5399_s18, %s5400_s23  }
  0x2d   : > { %s558_s15 = sshll.u32 %s6478_s17, 4  ;;  %s5403_s13 = smov [#allocation13]   ;;  %s559_s15 = int_to_ptr.hbm [resolvable:$true] %s558_s15 }
  0x2e   : > { %4816 = dma.hbm_to_vmem [thread:$0]  (!%p5549_p6), %s519_s1, 32, %s521_s2, [#allocation9], %s5397_s22, %s5397_s22, %s5398_s3  }
  0x2f   : > { %s560_s14 = sshll.u32 %s5403_s13, 4  ;;  %s4564_s16 = sadd.s32 4294967294, %s5393_s30   ;;  %s561_s14 = int_to_ptr.vmem [resolvable:$true] %s560_s14 }
  0x30   : > { %4822 = dma.hbm_to_vmem [thread:$0]  (!%p5549_p6), %s559_s15, 32, %s561_s14, [#allocation12], %s5397_s22, %s5397_s22, %s5398_s3  }
  0x31   : > { %s5574_s18 = sadd.s32 1, %s5393_s30   ;;  %s46_s23 = sadd.s32 1, %s5389_s29 }
  0x32   : > { %6479 = sst [smem:[#allocation24_spill]] %s5574_s18  ;;  %s43_s24 = ssub.s32 %s5393_s30, %s5574_s18 }
  0x33   : > { %p44_p8 = scmp.eq.s32.totalorder %s43_s24, 0  ;;  %p5598_p0 = por %p445_p11, %p53_p7 }
  0x34   : > { %p451_p2 = scmp.eq.s32.totalorder %s4564_s16, 1  ;;  %s5604_s22 = sand.u32 1, %s5389_s29  }
  0x35   : > { %s5586_s0 = scalar_select %p44_p8, %s5389_s29, %s46_s23  }
  0x36   : > { %p5606_p6 = por %p451_p2, %p59_p10  ;;  %s4572_s2 = sshll.u32 %s5604_s22, 3 }
  0x37   : > { %6480 = sst [smem:[#allocation25_spill]] %s5586_s0  ;;  %s4573_s25 = sshll.u32 %s5393_s30, 3 }
  0x38   : > { %s6484_s8 = scalar_select %p5606_p6, 1, 0 }
  0x39   : > { %s6486_s13 = sld [smem:[#allocation27_spill]]  ;;  %s578_s24 = scalar_lea.vmem [#allocation2], %s4572_s2 }
  0x3a   : > { %6485 = sst [smem:[#allocation26_spill]] %s6484_s8  ;;  %s586_s11 = sshll.u32 %s578_s24, 4  ;;  %s587_s11 = int_to_ptr.vmem [resolvable:$true] %s586_s11 }
  0x3b   : > { %p5617_p7 = pnand %p4839_p4, %p5588_p12  ;;  %s593_s12 = sand.u32 1, %s5393_s30  }
  0x3c   : > { %s6488_s29 = sld [smem:[#allocation28_spill]]  ;;  %s575_s27 = scalar_lea.sflag [#allocation3], %s5604_s22 }
  0x3d   : > { %p5255_p9 = pneg %p5617_p7 }
  0x3f   : > { %s582_s14 = scalar_lea.hbm %s6486_s13, %s4573_s25  ;;  %s5258_s15 = scalar_lea.hbm %s6486_s13, 16 }
  0x40   : > { %s584_s23 = sshll.u32 %s582_s14, 4  ;;  %s585_s23 = int_to_ptr.hbm [resolvable:$true] %s584_s23 }
  0x41   : > { %s5251_s19 = sshra.s32 %s585_s23, 4  ;;  %s5252_s19 = int_to_ptr.hbm [resolvable:$true] %s5251_s19 }
  0x42   : > { %s6489_s18 = smov %s6488_s29  ;;  %s599_s8 = scalar_lea.hbm %s6488_s29, %s5393_s30 }
  0x43   : > { %s5253_s25 = scalar_lea.hbm %s5252_s19, 8  ;;  %p5259_p12 = scmp.lt.s32.totalorder %s5252_s19, %s6486_s13 }
  0x44   : > { %p5254_p8 = scmp.ne.s32.totalorder %s5252_s19, %s5253_s25  ;;  %p5260_p2 = scmp.lt.s32.totalorder %s5258_s15, %s5253_s25 }
  0x46   : > { %p5256_p10 = pnand %p5255_p9, %p5254_p8  ;;  %p5261_p4 = por %p5260_p2, %p5259_p12 }
  0x48   : > { %p5257_p11 = pneg %p5256_p10 }
  0x4a   : > { %p5262_p5 = pnand %p5261_p4, %p5257_p11 }
  0x4c   : > { %5265 = shalt.err (!%p5262_p5)
}
  0x4d   : > { %4826 = dma.hbm_to_vmem [thread:$0]  (!%p5617_p7), %s585_s23, 128, %s587_s11, %s575_s27  }
  0x4e   : > { %s601_s17 = sshll.u32 %s599_s8, 4  ;;  %s596_s29 = scalar_lea.vmem [#allocation5], %s5604_s22  ;;  %s602_s17 = int_to_ptr.hbm [resolvable:$true] %s601_s17 }
  0x4f   : > { %s603_s0 = sshll.u32 %s596_s29, 4  ;;  %s594_s1 = scalar_lea.sflag [#allocation6], %s593_s12  ;;  %s604_s0 = int_to_ptr.vmem [resolvable:$true] %s603_s0 }
  0x50   : > { %s5281_s2 = sshra.s32 %s602_s17, 4  ;;  %s5288_s15 = scalar_lea.hbm %s6489_s18, 2  ;;  %s5282_s2 = int_to_ptr.hbm [resolvable:$true] %s5281_s2 }
  0x51   : > { %s5283_s30 = scalar_lea.hbm %s5282_s2, 1  ;;  %p5289_p5 = scmp.lt.s32.totalorder %s5282_s2, %s6489_s18 }
  0x52   : > { %p5284_p8 = scmp.ne.s32.totalorder %s5282_s2, %s5283_s30  ;;  %p5290_p12 = scmp.lt.s32.totalorder %s5288_s15, %s5283_s30 }
  0x54   : > { %p5286_p10 = pnand %p5284_p8, %p5255_p9  ;;  %p5291_p2 = por %p5290_p12, %p5289_p5 }
  0x56   : > { %p5287_p11 = pneg %p5286_p10 }
  0x58   : > { %p5292_p4 = pnand %p5291_p2, %p5287_p11 }
  0x5a   : > { %5295 = shalt.err (!%p5292_p4)
}
  0x5b   : > { %4829 = dma.hbm_to_vmem [thread:$0]  (!%p5617_p7), %s602_s17, 16, %s604_s0, %s594_s1  }
  0x5c   : > { %612 = sbr.rel (%p5537_p3) target bundleno = 5672 (0x1628), region = 92  ;;  %s5655_s12 = sand.u32 (!%p5537_p3), 1, %s5385_s28  }
  0x5d   : > { %s6453_s27 = sshll.u32 (!%p5537_p3), %s5655_s12, 3  ;;  %s615_s22 = scalar_lea.sflag (!%p5537_p3), [#allocation3], %s5655_s12 }
  0x5e   : > { %s5661_s30 = scalar_lea.vmem (!%p5537_p3), [#allocation2], %s6453_s27 }
  0x61   : > { %5356 = dma.done.wait (%p5594_p13), %s615_s22, 128  }
  0x62   : > { %5358 = vsyncadd (%p5594_p13), %s615_s22, 4294967168  ;;  %s624_s21 = sand.u32 1, %s5532_s20   ;;  %s627_s23 = scalar_lea.vmem [#allocation5], %s5655_s12 }
  0x63   : > { %s625_s8 = scalar_lea.sflag [#allocation6], %s624_s21 }
  0x64   : > { %5360 = dma.done.wait (%p5594_p13), %s625_s8, 16  }
  0x65   : > { %5362 = vsyncadd (%p5594_p13), %s625_s8, 4294967280 }
  0x66   : > { %5364 = dma.done.wait (%p60_p1), [#allocation6], 32  }
  0x67   : > { %5366 = vsyncadd (%p60_p1), [#allocation6], 4294967264 }
  0x68   : > { %5368 = dma.done.wait (%p60_p1), [#allocation9], 544  }
  0x69   : > { %5370 = vsyncadd (%p60_p1), [#allocation9], 4294966752 }
  0x6a   : > { %5372 = dma.done.wait (%p60_p1), [#allocation12], 544  }
  0x6b   : > { %5374 = vsyncadd (%p60_p1), [#allocation12], 4294966752  ;;  %s6490_s24 = sld [smem:[#allocation29_spill]]  ;;  %v4756_v1 = vld [vmem:[%s6424_s4 + $0x8] sm:$0xff]  ;;  %v4755_v3 = vld [vmem:[%s6424_s4] sm:$0xff]  ;;  %vm734_vm0 = vcmask 261120  }
  0x6c   : > { %777 = vmatpush.bf16.msra.mxu1 %v4756_v1  ;;  %v711_v4 = vld [vmem:[%s5661_s30] sm:$0xff]  ;;  %v5032_v6 = vld [vmem:[#allocation7] ss:$0 sm:$0xff]  ;;  %s5404_s14 = smov 112   ;;  %s5405_s11 = smov 120   ;;  %vm828_vm1 = vcmask 1047556  }
  0x6d   : > { %v713_v5 = vpack.c.bf16 %v711_v4, %v711_v4  ;;  %v5033_v7 = vld [vmem:[%s6425_s5] ss:$0 sm:$0xff]  ;;  %s5406_s22 = smov 104   ;;  %v5407_v16 = vmov 1983009808   ;;  %v4758_v24 = vld [vmem:[%s6426_s6 + $0x8] sm:$0xff] }
  0x6e   : > { %v833_v17 = vunpack.c.l.s4 %v5407_v16  ;;  %v5408_v26 = vmov 1934713408   ;;  %810 = vmatpush.bf16.msra.mxu2 %v4758_v24  ;;  %v4757_v29 = vld [vmem:[%s6426_s6] sm:$0xff]  ;;  %vm1493_vm2 = vcmask 1043456   ;;  %vm1489_vm3 = vcmask 64512   ;;  %s5409_s0 = smov 24  }
  0x6f   : > { %v857_v27 = vunpack.c.l.s4 %v5408_v26  ;;  %s6455_s1 = smov 16   ;;  %s6454_s2 = smov 8   ;;  %vm2349_vm4 = vcmask 130048   ;;  %vm2351_vm5 = vcmask 195584   ;;  %vm2513_vm10 = vcmask 523264  }
  0x70   : > { %778 = vmatpush.bf16.msra.mxu1 %v4755_v3  ;;  %v5717_v23 = vunpack.c.0.s8 %v833_v17  ;;  %s6491_s3 = sld [smem:[#allocation35_spill]] }
  0x71   : > { %v4754_v0 = vld [vmem:[%s6490_s24 + $0x8] sm:$0xff]  ;;  %v4753_v2 = vld [vmem:[%s6490_s24] sm:$0xff]  ;;  %v5729_v35 = vunpack.c.0.s8 %v857_v27  ;;  %s6492_s21 = sld [smem:[#allocation34_spill]] }
  0x72   : > { %744 = vmatpush.bf16.msra.mxu0 %v4754_v0  ;;  %811 = vmatpush.bf16.msra.mxu2 %v4757_v29  ;;  %s6493_s16 = sld [smem:[#allocation36_spill]] }
  0x73   : > { %4599 = vmatmul.msk.bf16.vlgmr.msra.gmra.mxu1 %vm734_vm0, %v713_v5  ;;  %s6494_s19 = sld [smem:[#allocation37_spill]] }
  0x75   : > { %4608 = vmatmul.msk.bf16.vlgmr.msra.gmra.mxu2 %vm734_vm0, %v713_v5 }
  0x76   : > { %745 = vmatpush.bf16.msra.mxu0 %v4753_v2 }
  0x79   : > { %4590 = vmatmul.msk.bf16.vlgmr.msra.gmra.mxu0 %vm734_vm0, %v713_v5 }
  0xf0   : > { %v780_v9 = vpop.f32.mrf.mxu1 }
  0xf1   : > { %v781_v11 = vadd.f32 %v5033_v7, %v780_v9 }
  0xf3   : > { %896 = vrot.lane.b32.xlu1 %v781_v11, %s5404_s14  ;;  %v904_v20 = vrot.slane %v781_v11, 4 }
  0xf6   : > { %v747_v8 = vpop.f32.mrf.mxu0 }
  0xf7   : > { %v5703_v10 = vadd.f32 %v5032_v6, %v747_v8 }
  0xf8   : > { %v782_v14 = vpop.f32.mrf.mxu1 }
  0xf9   : > { %821 = vrot.lane.b32.xlu2 %v5703_v10, %s5404_s14  ;;  %v4898_v12 = vpack.i.bf16 %v5703_v10, %v781_v11 }
  0xfb   : > { %4899 = vrot.lane.b32.xlu0 %v4898_v12, %s5405_s11 }
  0xfe   : > { %v749_v13 = vpop.f32.mrf.mxu0 }
 0x103   : > { %899 = vrot.lane.b32.xlu0 %v781_v11, %s5406_s22 }
 0x10b   : > { %824 = vrot.lane.b32.xlu0 %v5703_v10, %s5406_s22 }
 0x153   : > { %v5747_v3 = vpop.permute.xlu2 %821 }
 0x165   : > { %v897_v15 = vpop.permute.xlu1 %896 }
 0x166   : > { %v902_v19 = vrot.slane %v897_v15, 4  ;;  %v905_v21 = vsel %vm828_vm1, %v897_v15, %v904_v20 }
 0x167   : > { %v913_v28 = vperm.slane %v905_v21, %v5717_v23 }
 0x168   : > { %v903_v25 = vsel %vm828_vm1, %v902_v19, %v781_v11 }
 0x169   : > { %v909_v31 = vperm.slane %v903_v25, %v5717_v23  ;;  %v940_v36 = vrot.slane %v913_v28, 4 }
 0x16b   : > { %v928_v39 = vrot.slane %v909_v31, 4 }
 0x16d   : > { %v5713_v18 = vpop.permute.xlu0 %4899 }
 0x16e   : > { %v4901_v22 = vunpack.i.l.bf16 %v5713_v18 }
 0x170   : > { %v916_v30 = vrot.slane %v4901_v22, 4 }
 0x175   : > { %v900_v32 = vpop.permute.xlu0 %899 }
 0x176   : > { %v914_v33 = vrot.slane %v900_v32, 4  ;;  %v917_v34 = vsel %vm828_vm1, %v900_v32, %v916_v30 }
 0x177   : > { %v925_v37 = vperm.slane %v917_v34, %v5717_v23 }
 0x178   : > { %v915_v38 = vsel %vm828_vm1, %v914_v33, %v4901_v22 }
 0x179   : > { %v921_v40 = vperm.slane %v915_v38, %v5717_v23  ;;  %v938_v41 = vrot.slane %v925_v37, 4  ;;  %v941_v42 = vsel %vm828_vm1, %v925_v37, %v940_v36 }
 0x17a   : > { %v949_v43 = vperm.slane %v941_v42, %v5729_v35 }
 0x17b   : > { %v939_v44 = vsel %vm828_vm1, %v938_v41, %v913_v28  ;;  %v929_v45 = vsel %vm828_vm1, %v921_v40, %v928_v39  ;;  %v926_v49 = vrot.slane %v921_v40, 4 }
 0x17c   : > { %v956_v46 = vrot.slane %v949_v43, 4  ;;  %v945_v47 = vperm.slane %v939_v44, %v5729_v35  ;;  %v937_v48 = vperm.slane %v929_v45, %v5729_v35  ;;  %v964_v52 = vpack.c.bf16 %v949_v43, %v949_v43 }
 0x17d   : > { %v927_v58 = vsel %vm828_vm1, %v926_v49, %v909_v31  ;;  %v5749_v5 = vpop.permute.xlu0 %824  ;;  %v5034_v49 = vld [vmem:[%s6427_s7] ss:$0 sm:$0xff] }
 0x17e   : > { %v957_v50 = vsel %vm828_vm1, 0.0, %v956_v46  ;;  %v954_v51 = vrot.slane %v945_v47, 4  ;;  %v952_v54 = vrot.slane %v937_v48, 4  ;;  %v962_v56 = vpack.c.bf16 %v945_v47, %v945_v47 }
 0x17f   : > { %v965_v53 = vpack.c.bf16 %v957_v50, %v957_v50  ;;  %v960_v60 = vpack.c.bf16 %v937_v48, %v937_v48  ;;  %v933_v62 = vperm.slane %v927_v58, %v5729_v35  ;;  %v813_v50 = vpop.f32.mrf.mxu2 }
 0x180   : > { %v955_v55 = vsel %vm828_vm1, 0.0, %v954_v51  ;;  %v953_v59 = vsel %vm828_vm1, 0.0, %v952_v54  ;;  %v5770_v51 = vadd.f32 %v5034_v49, %v813_v50 }
 0x181   : > { %4903 = vxpose.binary.xlu2.c.b16.start.end [1/2] (short) (narrow) %v965_v53, %v964_v52, 16  ;;  %v963_v57 = vpack.c.bf16 %v955_v55, %v955_v55  ;;  %v961_v61 = vpack.c.bf16 %v953_v59, %v953_v59  ;;  %v950_v63 = vrot.slane %v933_v62, 4  ;;  %v958_v1 = vpack.c.bf16 %v933_v62, %v933_v62 }
 0x183   : > { %4906 = vxpose.binary.xlu1.c.b16.start.end [1/2] (short) (narrow) %v963_v57, %v962_v56, 16  ;;  %v951_v0 = vsel %vm828_vm1, 0.0, %v950_v63 }
 0x184   : > { %4912 = vxpose.binary.xlu0.c.b16.start.end [1/2] (short) (narrow) %v961_v61, %v960_v60, 16  ;;  %v959_v2 = vpack.c.bf16 %v951_v0, %v951_v0 }
 0x187   : > { %v815_v55 = vpop.f32.mrf.mxu2 }
 0x191   : > { %4909 = vxpose.binary.xlu2.c.b16.start.end [1/2] (short) (narrow) %v959_v2, %v958_v1, 16 }
 0x1fa   : > { %973 = vrot.lane.b32.xlu2 %v5770_v51, %s5406_s22 }
 0x202   : > { %970 = vrot.lane.b32.xlu2 %v5770_v51, %s5404_s14 }
 0x222   : > { %v4904_v4 = vpop.trf.xlu2 }
 0x223   : > { %v1227_v8 = vrot.slane %v4904_v4, 4 }
 0x22a   : > { %v4905_v6 = vpop.trf.xlu2 }
 0x22b   : > { %v1255_v20 = vrot.slane %v4905_v6, 4 }
 0x22f   : > { %v4907_v7 = vpop.trf.xlu1 }
 0x230   : > { %v1221_v9 = vrot.slane %v4907_v7, 4  ;;  %v4913_v11 = vpop.trf.xlu0 }
 0x231   : > { %v1228_v12 = vsel %vm828_vm1, %v1227_v8, %v4913_v11  ;;  %v830_v11 = vrot.slane %v5703_v10, 4 }
 0x232   : > { %v4910_v13 = vpop.trf.xlu2  ;;  %v1232_v14 = vperm.slane %v1228_v12, %v5717_v23  ;;  %v827_v12 = vrot.slane %v5747_v3, 4 }
 0x233   : > { %v1222_v15 = vsel %vm828_vm1, %v1221_v9, %v4910_v13  ;;  %v4902_v9 = vunpack.i.h.bf16 %v5713_v18  ;;  %v831_v13 = vsel %vm828_vm1, %v5747_v3, %v830_v11 }
 0x234   : > { %v1233_v16 = vrot.slane %v1232_v14, 4  ;;  %v1226_v17 = vperm.slane %v1222_v15, %v5717_v23 }
 0x236   : > { %v1234_v26 = vsel %vm828_vm1, %v1233_v16, %v1226_v17  ;;  %v1235_v40 = vrot.slane %v1226_v17, 4  ;;  %v840_v16 = vrot.slane %v5749_v5, 4 }
 0x237   : > { %v4908_v19 = vpop.trf.xlu1  ;;  %v1240_v31 = vperm.slane %v1234_v26, %v5729_v35 }
 0x238   : > { %v1249_v21 = vrot.slane %v4908_v19, 4  ;;  %v4914_v22 = vpop.trf.xlu0  ;;  %v1236_v42 = vsel %vm828_vm1, %v1232_v14, %v1235_v40  ;;  %v842_v14 = vrot.slane %v4902_v9, 4  ;;  %v839_v19 = vperm.slane %v831_v13, %v5717_v23 }
 0x239   : > { %v1256_v24 = vsel %vm828_vm1, %v1255_v20, %v4914_v22  ;;  %v1281_v34 = vshrl.u32 %v1240_v31, 16  ;;  %v1244_v44 = vperm.slane %v1236_v42, %v5729_v35  ;;  %v1245_v53 = vrot.slane %v1240_v31, 4 }
 0x23a   : > { %v4911_v25 = vpop.trf.xlu2  ;;  %v1260_v27 = vperm.slane %v1256_v24, %v5717_v23  ;;  %v843_v17 = vsel %vm828_vm1, %v5749_v5, %v842_v14  ;;  %v829_v20 = vsel %vm828_vm1, %v827_v12, %v5703_v10  ;;  %v866_v24 = vrot.slane %v839_v19, 4 }
 0x23b   : > { %v1250_v28 = vsel %vm828_vm1, %v1249_v21, %v4911_v25  ;;  %v1297_v46 = vshrl.u32 %v1244_v44, 16  ;;  %v1246_v56 = vsel %vm828_vm1, 0, %v1245_v53  ;;  %v1247_v62 = vrot.slane %v1244_v44, 4 }
 0x23c   : > { %v1254_v29 = vperm.slane %v1250_v28, %v5717_v23  ;;  %v1261_v30 = vrot.slane %v1260_v27, 4  ;;  %v1289_v58 = vshrl.u32 %v1246_v56, 16  ;;  %v851_v18 = vperm.slane %v843_v17, %v5717_v23 }
 0x23d   : > { %v1248_v0 = vsel %vm828_vm1, 0, %v1247_v62  ;;  %v841_v21 = vsel %vm828_vm1, %v840_v16, %v4902_v9  ;;  %v835_v22 = vperm.slane %v829_v20, %v5717_v23 }
 0x23e   : > { %v1262_v32 = vsel %vm828_vm1, %v1261_v30, %v1254_v29  ;;  %v1263_v39 = vrot.slane %v1254_v29, 4  ;;  %v1305_v2 = vshrl.u32 %v1248_v0, 16  ;;  %v847_v25 = vperm.slane %v841_v21, %v5717_v23 }
 0x23f   : > { %v1268_v33 = vperm.slane %v1262_v32, %v5729_v35  ;;  %v864_v26 = vrot.slane %v851_v18, 4  ;;  %v854_v28 = vrot.slane %v835_v22, 4 }
 0x240   : > { %v1264_v41 = vsel %vm828_vm1, %v1260_v27, %v1263_v39  ;;  %v867_v27 = vsel %vm828_vm1, %v851_v18, %v866_v24  ;;  %v852_v29 = vrot.slane %v847_v25, 4 }
 0x241   : > { %v1282_v36 = vshrl.u32 %v1268_v33, 16  ;;  %v1279_v37 = vpack.i.b16 %v1268_v33, %v1240_v31  ;;  %v1272_v43 = vperm.slane %v1264_v41, %v5729_v35  ;;  %v1273_v52 = vrot.slane %v1268_v33, 4 }
 0x242   : > { %v875_v5 = vperm.slane %v867_v27, %v5729_v35  ;;  %v855_v30 = vsel %vm828_vm1, %v847_v25, %v854_v28  ;;  %v865_v10 = vsel %vm828_vm1, %v864_v26, %v839_v19 }
 0x243   : > { %v1283_v38 = vpack.i.b16 %v1282_v36, %v1281_v34  ;;  %v1298_v45 = vshrl.u32 %v1272_v43, 16  ;;  %v1295_v47 = vpack.i.b16 %v1272_v43, %v1244_v44  ;;  %v1274_v54 = vsel %vm828_vm1, 0, %v1273_v52 }
 0x244   : > { %v1290_v57 = vshrl.u32 %v1274_v54, 16  ;;  %v1287_v59 = vpack.i.b16 %v1274_v54, %v1246_v56  ;;  %v1275_v61 = vrot.slane %v1272_v43, 4  ;;  %v863_v31 = vperm.slane %v855_v30, %v5729_v35 }
 0x245   : > { %4915 = vxpose.binary.xlu1.c.b16.start.end [1/2] (short) (narrow) %v1283_v38, %v1279_v37, 16  ;;  %v1299_v48 = vpack.i.b16 %v1298_v45, %v1297_v46  ;;  %v871_v32 = vperm.slane %v865_v10, %v5729_v35  ;;  %v882_v33 = vrot.slane %v875_v5, 4  ;;  %v853_v36 = vsel %vm828_vm1, %v852_v29, %v835_v22 }
 0x246   : > { %v1291_v60 = vpack.i.b16 %v1290_v57, %v1289_v58  ;;  %v1276_v63 = vsel %vm828_vm1, 0, %v1275_v61  ;;  %v859_v37 = vperm.slane %v853_v36, %v5729_v35  ;;  %v878_v38 = vrot.slane %v863_v31, 4 }
 0x247   : > { %v1306_v1 = vshrl.u32 %v1276_v63, 16  ;;  %v1303_v4 = vpack.i.b16 %v1276_v63, %v1248_v0  ;;  %v880_v39 = vrot.slane %v871_v32, 4  ;;  %v883_v40 = vsel %vm828_vm1, 0.0, %v882_v33 }
 0x248   : > { %v891_v41 = vpack.c.bf16 %v883_v40, %v883_v40  ;;  %v876_v42 = vrot.slane %v859_v37, 4  ;;  %v879_v43 = vsel %vm828_vm1, 0.0, %v878_v38  ;;  %v890_v45 = vpack.c.bf16 %v875_v5, %v875_v5 }
 0x249   : > { %v1307_v6 = vpack.i.b16 %v1306_v1, %v1305_v2  ;;  %v881_v44 = vsel %vm828_vm1, 0.0, %v880_v39  ;;  %v886_v52 = vpack.c.bf16 %v863_v31, %v863_v31  ;;  %v888_v53 = vpack.c.bf16 %v871_v32, %v871_v32 }
 0x24a   : > { %v1067_v49 = vrot.slane %v891_v41, 4  ;;  %v877_v50 = vsel %vm828_vm1, 0.0, %v876_v42  ;;  %v1047_v54 = vrot.slane %v890_v45, 4 }
 0x24b   : > { %v885_v55 = vpack.c.bf16 %v877_v50, %v877_v50 }
 0x24c   : > { %v1048_v61 = vsel %vm828_vm1, %v1047_v54, %v886_v52  ;;  %v978_v54 = vrot.slane %v5770_v51, 4 }
 0x254   : > { %v974_v10 = vpop.permute.xlu2 %973 }
 0x255   : > { %4918 = vxpose.binary.xlu1.c.b16.start.end [1/2] (short) (narrow) %v1299_v48, %v1295_v47, 16  ;;  %v887_v47 = vpack.c.bf16 %v879_v43, %v879_v43  ;;  %v889_v48 = vpack.c.bf16 %v881_v44, %v881_v44 }
 0x257   : > { %v1061_v56 = vrot.slane %v889_v48, 4  ;;  %v1068_v58 = vsel %vm828_vm1, %v1067_v49, %v887_v47 }
 0x258   : > { %v1072_v0 = vperm.slane %v1068_v58, %v5717_v23 }
 0x265   : > { %4921 = vxpose.binary.xlu1.c.b16.start.end [1/2] (short) (narrow) %v1291_v60, %v1287_v59, 16  ;;  %v884_v59 = vpack.c.bf16 %v859_v37, %v859_v37  ;;  %v1040_v60 = vrot.slane %v888_v53, 4 }
 0x267   : > { %v1042_v11 = vsel %vm828_vm1, %v1040_v60, %v884_v59 }
 0x268   : > { %v1046_v17 = vperm.slane %v1042_v11, %v5717_v23 }
 0x275   : > { %4924 = vxpose.binary.xlu1.c.b16.start.end [1/2] (short) (narrow) %v1307_v6, %v1303_v4, 16  ;;  %v1052_v4 = vperm.slane %v1048_v61, %v5717_v23  ;;  %v1062_v6 = vsel %vm828_vm1, %v1061_v56, %v885_v55  ;;  %v971_v55 = vpop.permute.xlu2 %970 }
 0x276   : > { %v1066_v14 = vperm.slane %v1062_v6, %v5717_v23  ;;  %v976_v60 = vrot.slane %v971_v55, 4  ;;  %v979_v61 = vsel %vm828_vm1, %v971_v55, %v978_v54 }
 0x2cf   : > { %967 = vrot.lane.b32.xlu1 %v5770_v51, %s5405_s11 }
 0x2f1   : > { %v4916_v7 = vpop.trf.xlu1 }
 0x2f9   : > { %v5782_v8 = vpop.trf.xlu1 }
 0x301   : > { %v4919_v15 = vpop.trf.xlu1 }
 0x302   : > { %v1437_v57 = vrot.slane %v4919_v15, 4  ;;  %v1073_v15 = vrot.slane %v1072_v0, 4 }
 0x304   : > { %v1438_v1 = vsel %vm828_vm1, %v1437_v57, %v4916_v7  ;;  %v1053_v7 = vrot.slane %v1052_v4, 4  ;;  %v1074_v21 = vsel %vm828_vm1, %v1073_v15, %v1066_v14 }
 0x305   : > { %v1442_v12 = vperm.slane %v1438_v1, %v5717_v23  ;;  %v5832_v27 = vperm.slane %v1074_v21, %v5729_v35  ;;  %v977_v1 = vsel %vm828_vm1, %v976_v60, %v5770_v51 }
 0x306   : > { %v1054_v26 = vsel %vm828_vm1, %v1053_v7, %v1046_v17 }
 0x307   : > { %v1058_v29 = vperm.slane %v1054_v26, %v5729_v35  ;;  %v1079_v32 = vrot.slane %v5832_v27, 4  ;;  %v1085_v11 = vshrl.u32 %v5832_v27, 16 }
 0x309   : > { %v4920_v3 = vpop.trf.xlu1  ;;  %v1080_v43 = vsel %vm828_vm1, 0, %v1079_v32  ;;  %v1083_v48 = vpack.i.b16 %v5832_v27, %v1058_v29  ;;  %v5035_v32 = vld [vmem:[%s627_s23] ss:$0 sm:$0xff] }
 0x30a   : > { %v1457_v16 = vrot.slane %v4920_v3, 4  ;;  %v1091_v53 = vshrl.u32 %v1080_v43, 16 }
 0x30c   : > { %v1458_v22 = vsel %vm828_vm1, %v1457_v16, %v5782_v8  ;;  %v1084_v16 = vshrl.u32 %v1058_v29, 16 }
 0x30d   : > { %v1462_v28 = vperm.slane %v1458_v22, %v5717_v23 }
 0x311   : > { %v4922_v34 = vpop.trf.xlu1 }
 0x319   : > { %v4923_v46 = vpop.trf.xlu1 }
 0x321   : > { %v4925_v62 = vpop.trf.xlu1 }
 0x322   : > { %v1443_v63 = vrot.slane %v4925_v62, 4  ;;  %v988_v62 = vrot.slane %v974_v10, 4 }
 0x324   : > { %v1444_v2 = vsel %vm828_vm1, %v1443_v63, %v4922_v34  ;;  %v1059_v34 = vrot.slane %v1058_v29, 4  ;;  %v987_v63 = vperm.slane %v979_v61, %v5717_v23 }
 0x325   : > { %v1448_v9 = vperm.slane %v1444_v2, %v5717_v23 }
 0x326   : > { %v1060_v49 = vsel %vm828_vm1, 0, %v1059_v34 }
 0x327   : > { %v1449_v13 = vrot.slane %v1448_v9, 4  ;;  %v1089_v57 = vpack.i.b16 %v1080_v43, %v1060_v49  ;;  %v1090_v58 = vshrl.u32 %v1060_v49, 16 }
 0x329   : > { %v4926_v19 = vpop.trf.xlu1  ;;  %v1450_v20 = vsel %vm828_vm1, %v1449_v13, %v1442_v12  ;;  %v1092_v59 = vpack.i.b16 %v1091_v53, %v1090_v58  ;;  %v983_v12 = vperm.slane %v977_v1, %v5717_v23  ;;  %v1014_v13 = vrot.slane %v987_v63, 4 }
 0x32a   : > { %v1463_v18 = vrot.slane %v4926_v19, 4  ;;  %v1454_v25 = vperm.slane %v1450_v20, %v5729_v35  ;;  %v1086_v19 = vpack.i.b16 %v1085_v11, %v1084_v16 }
 0x32b   : > { %v1002_v55 = vrot.slane %v983_v12, 4 }
 0x32c   : > { %v1464_v24 = vsel %vm828_vm1, %v1463_v18, %v4923_v46  ;;  %v1455_v30 = vrot.slane %v1454_v25, 4  ;;  %v1480_v33 = vshrl.u32 %v1454_v25, 16 }
 0x32d   : > { %v1468_v3 = vperm.slane %v1464_v24, %v5717_v23 }
 0x32e   : > { %v1456_v38 = vsel %vm828_vm1, 0, %v1455_v30 }
 0x32f   : > { %v1469_v5 = vrot.slane %v1468_v3, 4  ;;  %v1486_v45 = vshrl.u32 %v1456_v38, 16 }
 0x331   : > { %v1470_v8 = vsel %vm828_vm1, %v1469_v5, %v1462_v28 }
 0x332   : > { %v1474_v31 = vperm.slane %v1470_v8, %v5729_v35 }
 0x334   : > { %v1479_v36 = vpack.i.b16 %v1474_v31, %v1454_v25  ;;  %v1481_v37 = vshrl.u32 %v1474_v31, 16  ;;  %v1475_v39 = vrot.slane %v1474_v31, 4 }
 0x336   : > { %v1495_v40 = vsel %vm1493_vm2, %v1479_v36, 0  ;;  %v1482_v41 = vpack.i.b16 %v1481_v37, %v1480_v33  ;;  %v1476_v42 = vsel %vm828_vm1, 0, %v1475_v39 }
 0x337   : > { %1504 = vmatpush.bf16.msra.mxu3 %v1495_v40  ;;  %v1485_v44 = vpack.i.b16 %v1476_v42, %v1456_v38  ;;  %v1487_v46 = vshrl.u32 %v1476_v42, 16 }
 0x338   : > { %v1514_v47 = vsel %vm1493_vm2, %v1482_v41, 0 }
 0x339   : > { %v1533_v50 = vsel %vm1493_vm2, %v1485_v44, 0  ;;  %v1488_v52 = vpack.i.b16 %v1487_v46, %v1486_v45 }
 0x33a   : > { %4609 = vmatmul.msk.bf16.vlgmr.msra.gmra.mxu3 %vm1489_vm3, %v1083_v48  ;;  %1542 = vmatpush.bf16.msrb.mxu0 %v1533_v50 }
 0x33b   : > { %1523 = vmatpush.bf16.msrb.mxu3 %v1514_v47  ;;  %v1552_v56 = vsel %vm1493_vm2, %v1488_v52, 0 }
 0x33c   : > { %1561 = vmatpush.bf16.msrb.mxu1 %v1552_v56 }
 0x33d   : > { %4611 = vmatmul.msk.bf16.vlgmr.msrb.gmra.mxu0 %vm1489_vm3, %v1089_v57 }
 0x33f   : > { %4612 = vmatmul.msk.bf16.vlgmr.msrb.gmra.mxu1 %vm1489_vm3, %v1092_v59 }
 0x341   : > { %v968_v0 = vpop.permute.xlu1 %967 }
 0x342   : > { %v989_v2 = vsel %vm828_vm1, %v988_v62, %v968_v0  ;;  %v990_v4 = vrot.slane %v968_v0, 4 }
 0x343   : > { %v995_v6 = vperm.slane %v989_v2, %v5717_v23 }
 0x344   : > { %v991_v9 = vsel %vm828_vm1, %v974_v10, %v990_v4 }
 0x345   : > { %v999_v14 = vperm.slane %v991_v9, %v5717_v23  ;;  %v1000_v15 = vrot.slane %v995_v6, 4  ;;  %v1003_v56 = vsel %vm828_vm1, %v995_v6, %v1002_v55 }
 0x346   : > { %v1011_v57 = vperm.slane %v1003_v56, %v5729_v35 }
 0x347   : > { %v1001_v17 = vsel %vm828_vm1, %v1000_v15, %v983_v12  ;;  %v1012_v7 = vrot.slane %v999_v14, 4  ;;  %v1015_v51 = vsel %vm828_vm1, %v999_v14, %v1014_v13 }
 0x348   : > { %v1023_v20 = vperm.slane %v1015_v51, %v5729_v35  ;;  %v1007_v18 = vperm.slane %v1001_v17, %v5729_v35  ;;  %v1026_v58 = vrot.slane %v1011_v57, 4  ;;  %v1034_v60 = vpack.c.bf16 %v1011_v57, %v1011_v57 }
 0x349   : > { %v1013_v21 = vsel %vm828_vm1, %v1012_v7, %v987_v63 }
 0x34a   : > { %4610 = vmatmul.msk.bf16.vlgmr.msrb.gmra.mxu3 %vm1489_vm3, %v1086_v19  ;;  %v1030_v22 = vrot.slane %v1023_v20, 4  ;;  %v1024_v24 = vrot.slane %v1007_v18, 4  ;;  %v1019_v25 = vperm.slane %v1013_v21, %v5729_v35  ;;  %v1038_v27 = vpack.c.bf16 %v1023_v20, %v1023_v20 }
 0x34b   : > { %v1032_v30 = vpack.c.bf16 %v1007_v18, %v1007_v18  ;;  %v1027_v59 = vsel %vm828_vm1, 0.0, %v1026_v58 }
 0x34c   : > { %v1031_v26 = vsel %vm828_vm1, 0.0, %v1030_v22  ;;  %v1025_v3 = vsel %vm828_vm1, 0.0, %v1024_v24  ;;  %v1028_v29 = vrot.slane %v1019_v25, 4  ;;  %v1036_v8 = vpack.c.bf16 %v1019_v25, %v1019_v25 }
 0x34d   : > { %v1039_v28 = vpack.c.bf16 %v1031_v26, %v1031_v26  ;;  %v1033_v5 = vpack.c.bf16 %v1025_v3, %v1025_v3  ;;  %v1035_v61 = vpack.c.bf16 %v1027_v59, %v1027_v59 }
 0x34e   : > { %v1029_v10 = vsel %vm828_vm1, 0.0, %v1028_v29 }
 0x34f   : > { %4933 = vxpose.binary.xlu1.c.b16.start.end [1/2] (short) (narrow) %v1039_v28, %v1038_v27, 16  ;;  %v1037_v31 = vpack.c.bf16 %v1029_v10, %v1029_v10 }
 0x350   : > { %4930 = vxpose.binary.xlu2.c.b16.start.end [1/2] (short) (narrow) %v1033_v5, %v1032_v30, 16 }
 0x351   : > { %4927 = vxpose.binary.xlu0.c.b16.start.end [1/2] (short) (narrow) %v1037_v31, %v1036_v8, 16 }
 0x3ba   : > { %v1544_v33 = vpop.f32.mrf.mxu0 }
 0x3bb   : > { %v1569_v34 = vmul.f32 0.35355338, %v1544_v33 }
 0x3bc   : > { %v1563_v36 = vpop.f32.mrf.mxu1 }
 0x3bd   : > { %v1506_v37 = vpop.f32.mrf.mxu3  ;;  %v1576_v38 = vadd.f32 %v5035_v32, %v1569_v34  ;;  %v1570_v40 = vmul.f32 0.35355338, %v1563_v36 }
 0x3be   : > { %v1567_v45 = vmul.f32 0.35355338, %v1506_v37 }
 0x3bf   : > { %v1584_v39 = vsel %vm1489_vm3, %v1576_v38, -inf  ;;  %v5875_v43 = vadd.f32 %v5035_v32, %v1570_v40 }
 0x3c0   : > { %v5879_v47 = vadd.f32 %v5035_v32, %v1567_v45 }
 0x3c1   : > { %1585 = vmax.xlane.f32.xlu2 %v1584_v39  ;;  %v1587_v46 = vsel %vm1489_vm3, %v5875_v43, -inf }
 0x3c2   : > { %v1546_v41 = vpop.f32.mrf.mxu0  ;;  %v1578_v50 = vsel %vm1489_vm3, %v5879_v47, -inf }
 0x3c4   : > { %v1565_v42 = vpop.f32.mrf.mxu1 }
 0x3c5   : > { %v1508_v44 = vpop.f32.mrf.mxu3 }
 0x3c9   : > { %1588 = vmax.xlane.f32.xlu2 %v1587_v46 }
 0x3cd   : > { %v1525_v48 = vpop.f32.mrf.mxu3 }
 0x3ce   : > { %v1568_v49 = vmul.f32 0.35355338, %v1525_v48 }
 0x3d0   : > { %v1575_v52 = vadd.f32 %v5035_v32, %v1568_v49 }
 0x3d1   : > { %1579 = vmax.xlane.f32.xlu2 %v1578_v50 }
 0x3d2   : > { %v1581_v53 = vsel %vm1489_vm3, %v1575_v52, -inf }
 0x3d3   : > { %1582 = vmax.xlane.f32.xlu0 %v1581_v53 }
 0x3d5   : > { %v1527_v54 = vpop.f32.mrf.mxu3 }
 0x3f1   : > { %v4931_v62 = vpop.trf.xlu2 }
 0x3f9   : > { %v4932_v9 = vpop.trf.xlu2 }
 0x3fb   : > { %v4934_v20 = vpop.trf.xlu1 }
 0x3fc   : > { %4936 = vxpose.binary.xlu0.c.b16.start.end [1/2] (short) (narrow) %v1035_v61, %v1034_v60, 16  ;;  %v1760_v18 = vrot.slane %v4934_v20, 4 }
 0x3fd   : > { %v4928_v63 = vpop.trf.xlu0 }
 0x3fe   : > { %v1754_v0 = vrot.slane %v4928_v63, 4 }
 0x400   : > { %v1755_v1 = vsel %vm828_vm1, %v1754_v0, %v4931_v62 }
 0x401   : > { %v1759_v21 = vperm.slane %v1755_v1, %v5717_v23 }
 0x403   : > { %v1768_v25 = vrot.slane %v1759_v21, 4  ;;  %v4935_v3 = vpop.trf.xlu1 }
 0x404   : > { %v1788_v5 = vrot.slane %v4935_v3, 4 }
 0x405   : > { %v4929_v2 = vpop.trf.xlu0 }
 0x406   : > { %v1782_v4 = vrot.slane %v4929_v2, 4 }
 0x408   : > { %v1783_v11 = vsel %vm828_vm1, %v1782_v4, %v4932_v9 }
 0x409   : > { %v1787_v29 = vperm.slane %v1783_v11, %v5717_v23 }
 0x40b   : > { %v1796_v33 = vrot.slane %v1787_v29, 4 }
 0x434   : > { %v1586_v12 = vpop.xlane.xlu2 %1585 }
 0x435   : > { %v1592_v6 = vsub.f32 %v1576_v38, %v1586_v12 }
 0x437   : > { %v1598_v13 = vmul.f32 1.442695, %v1592_v6 }
 0x439   : > { %5053 = vpow2.f32 %v1598_v13 }
 0x43c   : > { %v1589_v20 = vpop.xlane.xlu2 %1588 }
 0x43f   : > { %v5054_v14 = vpop.eup %5053 }
 0x440   : > { %v1608_v15 = vsel %vm1489_vm3, %v5054_v14, 0.0 }
 0x441   : > { %1609 = vadd.xlane.f32.xlu1 %v1608_v15 }
 0x446   : > { %v1583_v16 = vpop.xlane.xlu0 %1582 }
 0x447   : > { %v1591_v17 = vsub.f32 %v1575_v52, %v1583_v16 }
 0x449   : > { %v1596_v7 = vmul.f32 1.442695, %v1591_v17 }
 0x44b   : > { %5055 = vpow2.f32 %v1596_v7 }
 0x451   : > { %v5890_v51 = vpop.eup %5055 }
 0x452   : > { %v1605_v19 = vsel %vm1489_vm3, %v5890_v51, 0.0 }
 0x46d   : > { %1606 = vadd.xlane.f32.xlu0 %v1605_v19 }
 0x4a8   : > { %v4937_v22 = vpop.trf.xlu0 }
 0x4a9   : > { %v1761_v24 = vsel %vm828_vm1, %v1760_v18, %v4937_v22 }
 0x4aa   : > { %v1765_v26 = vperm.slane %v1761_v24, %v5717_v23 }
 0x4ac   : > { %v1766_v27 = vrot.slane %v1765_v26, 4  ;;  %v1769_v28 = vsel %vm828_vm1, %v1765_v26, %v1768_v25 }
 0x4ad   : > { %v1777_v10 = vperm.slane %v1769_v28, %v5729_v35 }
 0x4ae   : > { %v1767_v30 = vsel %vm828_vm1, %v1766_v27, %v1759_v21  ;;  %v1580_v21 = vpop.xlane.xlu2 %1579 }
 0x4af   : > { %v5902_v8 = vperm.slane %v1767_v30, %v5729_v35  ;;  %v1780_v36 = vrot.slane %v1777_v10, 4  ;;  %v1830_v44 = vshrl.u32 %v1777_v10, 16  ;;  %v1590_v22 = vsub.f32 %v5879_v47, %v1580_v21 }
 0x4b0   : > { %v4938_v31 = vpop.trf.xlu0 }
 0x4b1   : > { %v1789_v32 = vsel %vm828_vm1, %v1788_v5, %v4938_v31  ;;  %v1778_v40 = vrot.slane %v5902_v8, 4  ;;  %v1781_v45 = vsel %vm828_vm1, 0, %v1780_v36  ;;  %v1814_v0 = vshrl.u32 %v5902_v8, 16 }
 0x4b2   : > { %v1793_v34 = vperm.slane %v1789_v32, %v5717_v23  ;;  %v1838_v58 = vshrl.u32 %v1781_v45, 16  ;;  %v1594_v24 = vmul.f32 1.442695, %v1590_v22 }
 0x4b3   : > { %v1779_v52 = vsel %vm828_vm1, 0, %v1778_v40 }
 0x4b4   : > { %v1794_v37 = vrot.slane %v1793_v34, 4  ;;  %v1797_v38 = vsel %vm828_vm1, %v1793_v34, %v1796_v33  ;;  %v1610_v39 = vpop.xlane.xlu1 %1609  ;;  %v1822_v63 = vshrl.u32 %v1779_v52, 16 }
 0x4b5   : > { %v1805_v41 = vperm.slane %v1797_v38, %v5729_v35  ;;  %5057 = vrcp.f32 %v1610_v39 }
 0x4b6   : > { %v1795_v42 = vsel %vm828_vm1, %v1794_v37, %v1787_v29 }
 0x4b7   : > { %v1801_v46 = vperm.slane %v1795_v42, %v5729_v35  ;;  %v1828_v48 = vpack.i.b16 %v1805_v41, %v1777_v10  ;;  %v1831_v49 = vshrl.u32 %v1805_v41, 16  ;;  %v1808_v50 = vrot.slane %v1805_v41, 4 }
 0x4b9   : > { %v1832_v53 = vpack.i.b16 %v1831_v49, %v1830_v44  ;;  %v1809_v54 = vsel %vm828_vm1, 0, %v1808_v50  ;;  %v1806_v55 = vrot.slane %v1801_v46, 4  ;;  %v1812_v56 = vpack.i.b16 %v1801_v46, %v5902_v8 }
 0x4ba   : > { %v1836_v57 = vpack.i.b16 %v1809_v54, %v1781_v45  ;;  %v1839_v59 = vshrl.u32 %v1809_v54, 16  ;;  %v1815_v60 = vshrl.u32 %v1801_v46, 16 }
 0x4bb   : > { %v5058_v61 = vpop.eup %5057  ;;  %4945 = vxpose.binary.xlu0.c.b16.start.end [1/2] (short) (narrow) %v1832_v53, %v1828_v48, 16  ;;  %v1807_v62 = vsel %vm828_vm1, 0, %v1806_v55 }
 0x4bc   : > { %v1840_v1 = vpack.i.b16 %v1839_v59, %v1838_v58  ;;  %v1820_v2 = vpack.i.b16 %v1807_v62, %v1779_v52  ;;  %v1823_v4 = vshrl.u32 %v1807_v62, 16  ;;  %v1620_v9 = vmul.f32 %v5058_v61, %v5054_v14 }
 0x4bd   : > { %v1816_v11 = vpack.i.b16 %v1815_v60, %v1814_v0  ;;  %v1593_v14 = vsub.f32 %v5875_v43, %v1589_v20 }
 0x4be   : > { %4939 = vxpose.binary.xlu1.c.b16.start.end [1/2] (short) (narrow) %v1840_v1, %v1836_v57, 16  ;;  %v1824_v12 = vpack.i.b16 %v1823_v4, %v1822_v63  ;;  %v1624_v6 = vpack.c.bf16 %v1620_v9, %v1620_v9 }
 0x4bf   : > { %v1600_v18 = vmul.f32 1.442695, %v1593_v14 }
 0x4c0   : > { %4942 = vxpose.binary.xlu2.c.b16.start.end [1/2] (short) (narrow) %v1824_v12, %v1820_v2, 16  ;;  %v2064_v13 = vsel %vm1489_vm3, %v1624_v6, 0 }
 0x4c1   : > { %2073 = vmatpush.bf16.xpose.msra.mxu0 %v2064_v13 }
 0x4e0   : > { %v1607_v15 = vpop.xlane.xlu0 %1606 }
 0x4e1   : > { %5059 = vrcp.f32 %v1607_v15 }
 0x4e2   : > { %5061 = vpow2.f32 %v1600_v18 }
 0x4e3   : > { %5063 = vpow2.f32 %v1594_v24 }
 0x4e7   : > { %v5060_v16 = vpop.eup %5059 }
 0x4e8   : > { %v1619_v17 = vmul.f32 %v5060_v16, %v5890_v51  ;;  %v5062_v25 = vpop.eup %5061 }
 0x4e9   : > { %v1611_v26 = vsel %vm1489_vm3, %v5062_v25, 0.0  ;;  %v5064_v3 = vpop.eup %5063 }
 0x4ea   : > { %v1623_v7 = vpack.c.bf16 %v1619_v17, %v1619_v17  ;;  %v1602_v51 = vsel %vm1489_vm3, %v5064_v3, 0.0 }
 0x4ec   : > { %v2045_v19 = vsel %vm1489_vm3, %v1623_v7, 0 }
 0x4ed   : > { %2054 = vmatpush.bf16.xpose.msra.mxu3 %v2045_v19 }
 0x531   : > { %1612 = vadd.xlane.f32.xlu2 %v1611_v26 }
 0x539   : > { %1603 = vadd.xlane.f32.xlu2 %v1602_v51 }
 0x561   : > { %v4943_v27 = vpop.trf.xlu2 }
 0x562   : > { %4948 = vxpose.binary.xlu2.c.b16.start.end [1/2] (short) (narrow) %v1816_v11, %v1812_v56, 16 }
 0x567   : > { %v4946_v37 = vpop.trf.xlu0 }
 0x568   : > { %v1970_v40 = vrot.slane %v4946_v37, 4 }
 0x569   : > { %v4944_v28 = vpop.trf.xlu2 }
 0x56a   : > { %v4940_v34 = vpop.trf.xlu1 }
 0x56b   : > { %v1976_v36 = vrot.slane %v4940_v34, 4 }
 0x56d   : > { %v1977_v38 = vsel %vm828_vm1, %v1976_v36, %v4943_v27 }
 0x56e   : > { %v1981_v41 = vperm.slane %v1977_v38, %v5717_v23 }
 0x56f   : > { %v4947_v49 = vpop.trf.xlu0 }
 0x570   : > { %v1982_v46 = vrot.slane %v1981_v41, 4  ;;  %v1990_v53 = vrot.slane %v4947_v49, 4 }
 0x572   : > { %v4941_v39 = vpop.trf.xlu1 }
 0x573   : > { %v1996_v42 = vrot.slane %v4941_v39, 4 }
 0x575   : > { %v1997_v50 = vsel %vm828_vm1, %v1996_v42, %v4944_v28 }
 0x576   : > { %v2001_v54 = vperm.slane %v1997_v50, %v5717_v23 }
 0x578   : > { %v2002_v58 = vrot.slane %v2001_v54, 4 }
 0x5a4   : > { %v1613_v5 = vpop.xlane.xlu2 %1612 }
 0x5a5   : > { %5065 = vrcp.f32 %v1613_v5 }
 0x5ab   : > { %v5066_v43 = vpop.eup %5065 }
 0x5ac   : > { %v1604_v29 = vpop.xlane.xlu2 %1603  ;;  %v1621_v30 = vmul.f32 %v5066_v43, %v5062_v25 }
 0x5ad   : > { %5067 = vrcp.f32 %v1604_v29 }
 0x5ae   : > { %v1625_v47 = vpack.c.bf16 %v1621_v30, %v1621_v30 }
 0x5b0   : > { %v2083_v10 = vsel %vm1489_vm3, %v1625_v47, 0 }
 0x5b1   : > { %2092 = vmatpush.bf16.xpose.msra.mxu1 %v2083_v10 }
 0x5b3   : > { %v5068_v8 = vpop.eup %5067 }
 0x5b4   : > { %v1618_v31 = vmul.f32 %v5068_v8, %v5064_v3 }
 0x5b6   : > { %v1622_v32 = vpack.c.bf16 %v1618_v31, %v1618_v31 }
 0x5b8   : > { %v2026_v33 = vsel %vm1489_vm3, %v1622_v32, 0 }
 0x5b9   : > { %2035 = vmatpush.bf16.xpose.msrb.mxu2 %v2026_v33 }
 0x603   : > { %v4949_v44 = vpop.trf.xlu2 }
 0x604   : > { %v1971_v45 = vsel %vm828_vm1, %v1970_v40, %v4949_v44 }
 0x605   : > { %v1975_v48 = vperm.slane %v1971_v45, %v5717_v23 }
 0x607   : > { %v1983_v52 = vsel %vm828_vm1, %v1982_v46, %v1975_v48 }
 0x608   : > { %v1987_v55 = vperm.slane %v1983_v52, %v5729_v35 }
 0x60a   : > { %v1988_v60 = vrot.slane %v1987_v55, 4  ;;  %v2013_v63 = vshrl.u32 %v1987_v55, 16 }
 0x60b   : > { %v4950_v56 = vpop.trf.xlu2 }
 0x60c   : > { %v1991_v57 = vsel %vm828_vm1, %v1990_v53, %v4950_v56  ;;  %v1989_v4 = vsel %vm828_vm1, 0, %v1988_v60 }
 0x60d   : > { %v1995_v59 = vperm.slane %v1991_v57, %v5717_v23  ;;  %v2019_v6 = vshrl.u32 %v1989_v4, 16 }
 0x60f   : > { %v2003_v61 = vsel %vm828_vm1, %v2002_v58, %v1995_v59 }
 0x610   : > { %v2007_v62 = vperm.slane %v2003_v61, %v5729_v35 }
 0x612   : > { %v2008_v0 = vrot.slane %v2007_v62, 4  ;;  %v2014_v1 = vshrl.u32 %v2007_v62, 16  ;;  %v2012_v2 = vpack.i.b16 %v2007_v62, %v1987_v55 }
 0x614   : > { %4613 = vmatmul.msk.bf16.vlgmr.msrb.gmra.mxu2 %vm1489_vm3, %v2012_v2  ;;  %v2015_v9 = vpack.i.b16 %v2014_v1, %v2013_v63  ;;  %v2009_v11 = vsel %vm828_vm1, 0, %v2008_v0 }
 0x615   : > { %v2018_v12 = vpack.i.b16 %v2009_v11, %v1989_v4  ;;  %v2020_v13 = vshrl.u32 %v2009_v11, 16 }
 0x616   : > { %4614 = vmatmul.msk.bf16.vlgmr.msra.gmra.mxu3 %vm1489_vm3, %v2015_v9 }
 0x617   : > { %4615 = vmatmul.msk.bf16.vlgmr.msra.gmra.mxu0 %vm1489_vm3, %v2018_v12  ;;  %v2021_v15 = vpack.i.b16 %v2020_v13, %v2019_v6 }
 0x619   : > { %4616 = vmatmul.msk.bf16.vlgmr.msra.gmra.mxu1 %vm1489_vm3, %v2021_v15 }
 0x694   : > { %v2075_v16 = vpop.f32.mrf.mxu0 }
 0x696   : > { %v2094_v17 = vpop.f32.mrf.mxu1 }
 0x697   : > { %v2037_v7 = vpop.f32.mrf.mxu2 }
 0x698   : > { %v4951_v19 = vpack.i.bf16 %v2037_v7, %v2075_v16 }
 0x699   : > { %v2056_v20 = vpop.f32.mrf.mxu3 }
 0x69a   : > { %v4958_v14 = vpack.i.bf16 %v2056_v20, %v2094_v17  ;;  %4952 = vxpose.xlu0.b32.start.end [1/1] (short) (narrow) %v4951_v19, 8 }
 0x69c   : > { %4959 = vxpose.xlu2.b32.start.end [1/1] (short) (narrow) %v4958_v14, 8  ;;  %v2077_v18 = vpop.f32.mrf.mxu0 }
 0x69e   : > { %v2096_v21 = vpop.f32.mrf.mxu1 }
 0x69f   : > { %v2039_v22 = vpop.f32.mrf.mxu2 }
 0x6a1   : > { %v2058_v24 = vpop.f32.mrf.mxu3 }
 0x735   : > { %v4960_v25 = vpop.trf.xlu2 }
 0x736   : > { %v4964_v26 = vunpack.i.h.bf16 %v4960_v25  ;;  %v4961_v3 = vunpack.i.l.bf16 %v4960_v25 }
 0x738   : > { %v2240_v51 = vrot.slane %v4964_v26, 4  ;;  %v2238_v27 = vrot.slane %v4961_v3, 4 }
 0x73a   : > { %v2239_v28 = vsel %vm828_vm1, %v2238_v27, %v4964_v26  ;;  %v2241_v5 = vsel %vm828_vm1, %v4961_v3, %v2240_v51 }
 0x73b   : > { %v2245_v43 = vperm.slane %v2239_v28, %v5717_v23  ;;  %v2249_v29 = vperm.slane %v2241_v5, %v5717_v23  ;;  %v4760_v5 = vld [vmem:[#allocation8 + $0x8] sm:$0xff] }
 0x73c   : > { %2383 = vmatpush.bf16.msra.mxu2 %v4760_v5 }
 0x73d   : > { %v2250_v32 = vrot.slane %v2245_v43, 4  ;;  %v2262_v33 = vrot.slane %v2249_v29, 4 }
 0x73e   : > { %v4953_v30 = vpop.trf.xlu0 }
 0x73f   : > { %v4957_v47 = vunpack.i.h.bf16 %v4953_v30  ;;  %v4954_v10 = vunpack.i.l.bf16 %v4953_v30 }
 0x741   : > { %v2228_v8 = vrot.slane %v4957_v47, 4  ;;  %v2226_v31 = vrot.slane %v4954_v10, 4 }
 0x743   : > { %v2227_v34 = vsel %vm828_vm1, %v2226_v31, %v4957_v47  ;;  %v2229_v36 = vsel %vm828_vm1, %v4954_v10, %v2228_v8 }
 0x744   : > { %v2233_v37 = vperm.slane %v2227_v34, %v5717_v23  ;;  %v2237_v38 = vperm.slane %v2229_v36, %v5717_v23 }
 0x746   : > { %v2251_v39 = vsel %vm828_vm1, %v2250_v32, %v2233_v37  ;;  %v2252_v40 = vrot.slane %v2233_v37, 4  ;;  %v2263_v41 = vsel %vm828_vm1, %v2262_v33, %v2237_v38  ;;  %v2264_v42 = vrot.slane %v2237_v38, 4  ;;  %v5036_v33 = vld [vmem:[%s6429_s9] ss:$0 sm:$0xff] }
 0x747   : > { %v2257_v44 = vperm.slane %v2251_v39, %v5729_v35  ;;  %v2269_v45 = vperm.slane %v2263_v41, %v5729_v35  ;;  %v5099_v37 = vld [vmem:[%s5661_s30] sm:$0xff]  ;;  %v5412_v41 = vmov 32.0   ;;  %s6498_s30 = sshll.u32 %s5655_s12, 3 }
 0x748   : > { %v2253_v46 = vsel %vm828_vm1, %v2245_v43, %v2252_v40  ;;  %v2265_v48 = vsel %vm828_vm1, %v2249_v29, %v2264_v42  ;;  %v4759_v43 = vld [vmem:[#allocation8] sm:$0xff]  ;;  %5069 = vrcp.f32 %v5412_v41  ;;  %s709_s15 = scalar_lea.vmem [#allocation14], %s6498_s30 }
 0x749   : > { %v2261_v49 = vperm.slane %v2253_v46, %v5729_v35  ;;  %v2273_v50 = vperm.slane %v2265_v48, %v5729_v35  ;;  %v2274_v52 = vrot.slane %v2257_v44, 4  ;;  %v2278_v54 = vrot.slane %v2269_v45, 4  ;;  %2384 = vmatpush.bf16.msra.mxu2 %v4759_v43  ;;  %v4767_v41 = vld [vmem:[%s6490_s24 + $0x10] sm:$0xff]  ;;  %s4425_s8 = sshll.u32 %s709_s15, 4  ;;  %s4426_s8 = int_to_ptr.vmem [resolvable:$true] %s4425_s8 }
 0x74b   : > { %v2276_v53 = vrot.slane %v2261_v49, 4  ;;  %v2280_v55 = vrot.slane %v2273_v50, 4  ;;  %v2275_v0 = vsel %vm828_vm1, 0.0, %v2274_v52  ;;  %v2279_v1 = vsel %vm828_vm1, 0.0, %v2278_v54 }
 0x74d   : > { %v2277_v56 = vsel %vm828_vm1, 0.0, %v2276_v53  ;;  %v2281_v57 = vsel %vm828_vm1, 0.0, %v2280_v55  ;;  %v2282_v58 = vsel %vm828_vm1, %v2276_v53, %v2257_v44  ;;  %v2293_v59 = vsel %vm828_vm1, %v2280_v55, %v2269_v45 }
 0x74e   : > { %v2286_v60 = vperm.slane %v2282_v58, %v5717_v23  ;;  %v2287_v61 = vrot.slane %v2277_v56, 4  ;;  %v2297_v62 = vperm.slane %v2293_v59, %v5717_v23  ;;  %v2298_v63 = vrot.slane %v2281_v57, 4  ;;  %v5070_v42 = vpop.eup %5069  ;;  %v4762_v56 = vld [vmem:[#allocation11 + $0x8] sm:$0xff]  ;;  %v4761_v57 = vld [vmem:[#allocation11] sm:$0xff] }
 0x74f   : > { %v2397_v44 = vmul.f32 32.0, %v5070_v42  ;;  %vm2401_vm6 = vweird.f32 %v5070_v42  ;;  %2460 = vmatpush.bf16.msrb.mxu3 %v4762_v56 }
 0x750   : > { %v2288_v2 = vsel %vm828_vm1, %v2287_v61, %v2275_v0  ;;  %v2299_v4 = vsel %vm828_vm1, %v2298_v63, %v2279_v1  ;;  %v2306_v9 = vrot.slane %v2286_v60, 4  ;;  %v2318_v11 = vrot.slane %v2297_v62, 4 }
 0x751   : > { %v2292_v12 = vperm.slane %v2288_v2, %v5717_v23  ;;  %v2303_v6 = vperm.slane %v2299_v4, %v5717_v23  ;;  %v2398_v45 = vsub.f32 1.0, %v2397_v44  ;;  %v5037_v4 = vld [vmem:[%s6430_s10] ss:$0 sm:$0xff]  ;;  %v4771_v44 = vld [vmem:[%s6426_s6 + $0x10] sm:$0xff] }
 0x753   : > { %v2307_v13 = vsel %vm828_vm1, %v2292_v12, %v2306_v9  ;;  %v2319_v15 = vsel %vm828_vm1, %v2303_v6, %v2318_v11  ;;  %v2304_v16 = vrot.slane %v2292_v12, 4  ;;  %v2316_v17 = vrot.slane %v2303_v6, 4  ;;  %2461 = vmatpush.bf16.msrb.mxu3 %v4761_v57  ;;  %v5038_v11 = vld [vmem:[#allocation10] ss:$0 sm:$0xff]  ;;  %v5041_v57 = vld [vmem:[%s6494_s19] ss:$0 sm:$0xff] }
 0x754   : > { %v2315_v7 = vperm.slane %v2307_v13, %v5729_v35  ;;  %v2327_v19 = vperm.slane %v2319_v15, %v5729_v35  ;;  %v2399_v46 = vmul.f32 %v5070_v42, %v2398_v45 }
 0x755   : > { %v2305_v20 = vsel %vm828_vm1, %v2304_v16, %v2286_v60  ;;  %v2317_v14 = vsel %vm828_vm1, %v2316_v17, %v2297_v62  ;;  %v4766_v16 = vld [vmem:[%s6491_s3 + $0x18] sm:$0xff]  ;;  %v4765_v17 = vld [vmem:[%s6491_s3 + $0x10] sm:$0xff] }
 0x756   : > { %v2334_v18 = vrot.slane %v2315_v7, 4  ;;  %v2332_v21 = vrot.slane %v2327_v19, 4  ;;  %v2311_v22 = vperm.slane %v2305_v20, %v5729_v35  ;;  %v2323_v24 = vperm.slane %v2317_v14, %v5729_v35  ;;  %2521 = vmatpush.bf16.msrb.mxu0 %v4766_v16  ;;  %v5039_v20 = vld [vmem:[%s6492_s21] ss:$0 sm:$0xff] }
 0x757   : > { %v2400_v48 = vadd.f32 %v5070_v42, %v2399_v46 }
 0x758   : > { %v2335_v25 = vsel %vm828_vm1, %v2327_v19, %v2334_v18  ;;  %v2333_v26 = vsel %vm828_vm1, %v2332_v21, %v2315_v7  ;;  %v2328_v3 = vrot.slane %v2323_v24, 4  ;;  %v2330_v51 = vrot.slane %v2311_v22, 4  ;;  %v4764_v7 = vld [vmem:[%s6491_s3 + $0x8] sm:$0xff]  ;;  %v4763_v19 = vld [vmem:[%s6491_s3] sm:$0xff] }
 0x759   : > { %2345 = vrot.lane.b32.xlu2 %v2335_v25, %s5409_s0  ;;  %2341 = vrot.lane.b32.xlu0 %v2333_v26, %s6455_s1  ;;  %v5996_v49 = vsel %vm2401_vm6, %v5070_v42, %v2400_v48  ;;  %v4769_v42 = vld [vmem:[%s6424_s4 + $0x10] sm:$0xff] }
 0x75a   : > { %v2331_v27 = vsel %vm828_vm1, %v2323_v24, %v2330_v51  ;;  %v2329_v28 = vsel %vm828_vm1, %v2328_v3, %v2311_v22  ;;  %2522 = vmatpush.bf16.msrb.mxu0 %v4765_v17 }
 0x75b   : > { %2337 = vrot.lane.b32.xlu1 %v2331_v27, %s6454_s2  ;;  %s6497_s2 = sld [smem:[#allocation39_spill]] }
 0x75e   : > { %2523 = vmatpush.bf16.msrb.mxu0 %v4764_v7 }
 0x761   : > { %s5331_s27 = scalar_lea.hbm %s6497_s2, 16 }
 0x762   : > { %2524 = vmatpush.bf16.msrb.mxu0 %v4763_v19 }
 0x7b3   : > { %v2346_v10 = vpop.permute.xlu2 %2345 }
 0x7cb   : > { %v2342_v30 = vpop.permute.xlu0 %2341 }
 0x7cd   : > { %v2338_v29 = vpop.permute.xlu1 %2337 }
 0x7ce   : > { %v2348_v47 = vsel %vm1489_vm3, %v2329_v28, %v2338_v29  ;;  %v5040_v29 = vld [vmem:[%s6493_s16] ss:$0 sm:$0xff] }
 0x7cf   : > { %v2350_v8 = vsel %vm2349_vm4, %v2348_v47, %v2342_v30 }
 0x7d0   : > { %v2352_v31 = vsel %vm2351_vm5, %v2350_v8, %v2346_v10 }
 0x7d1   : > { %v2353_v32 = vpack.c.bf16 %v2352_v31, %v2352_v31 }
 0x7d3   : > { %4625 = vmatmul.msk.bf16.vlgmr.msra.gmra.mxu2 %vm734_vm0, %v2353_v32 }
 0x856   : > { %v2386_v34 = vpop.f32.mrf.mxu2 }
 0x857   : > { %v2387_v36 = vadd.f32 %v5036_v33, %v2386_v34 }
 0x859   : > { %v2390_v38 = vadd.f32 %v5099_v37, %v2387_v36 }
 0x85b   : > { %v2393_v39 = vsel %vm734_vm0, %v2390_v38, 0.0 }
 0x85c   : > { %2394 = vadd.xlane.f32.xlu1 %v2393_v39  ;;  %v4770_v39 = vld [vmem:[%s6424_s4 + $0x18] sm:$0xff] }
 0x85d   : > { %2630 = vmatpush.bf16.msrb.mxu2 %v4770_v39 }
 0x85e   : > { %v2388_v40 = vpop.f32.mrf.mxu2 }
 0x85f   : > { %v4772_v40 = vld [vmem:[%s6426_s6 + $0x18] sm:$0xff] }
 0x860   : > { %2665 = vmatpush.bf16.msra.mxu3 %v4772_v40 }
 0x861   : > { %2631 = vmatpush.bf16.msrb.mxu2 %v4769_v42 }
 0x864   : > { %2666 = vmatpush.bf16.msra.mxu3 %v4771_v44 }
 0x8cf   : > { %v2395_v50 = vpop.xlane.xlu1 %2394 }
 0x8d0   : > { %v2403_v52 = vmul.f32 %v5996_v49, %v2395_v50 }
 0x8d2   : > { %v2404_v53 = vsub.f32 %v2390_v38, %v2403_v52  ;;  %v4768_v38 = vld [vmem:[%s6490_s24 + $0x18] sm:$0xff] }
 0x8d3   : > { %2595 = vmatpush.bf16.msrb.mxu1 %v4768_v38 }
 0x8d4   : > { %v2405_v54 = vmul.f32 %v2404_v53, %v2404_v53 }
 0x8d6   : > { %v2406_v55 = vsel %vm734_vm0, %v2405_v54, 0.0 }
 0x8d7   : > { %2407 = vadd.xlane.f32.xlu0 %v2406_v55  ;;  %2596 = vmatpush.bf16.msrb.mxu1 %v4767_v41 }
 0x94a   : > { %v2408_v58 = vpop.xlane.xlu0 %2407 }
 0x94b   : > { %v2409_v59 = vmul.f32 %v2408_v58, %v5996_v49 }
 0x94d   : > { %v2410_v60 = vadd.f32 1e-12, %v2409_v59  ;;  %v5042_v59 = vld [vmem:[#allocation13] ss:$0 sm:$0xff] }
 0x94f   : > { %5071 = vrsqrt.f32 %v2410_v60  ;;  %vm2417_vm8 = vweird.f32 %v2410_v60 }
 0x955   : > { %v5072_v61 = vpop.eup %5071 }
 0x956   : > { %v2412_v62 = vmul.f32 %v5072_v61, %v2410_v60  ;;  %vm2418_vm7 = vweird.f32 %v5072_v61 }
 0x957   : > { %vm2419_vm9 = vmor %vm2417_vm8, %vm2418_vm7 }
 0x958   : > { %v2413_v63 = vmul.f32 %v5072_v61, %v2412_v62 }
 0x95a   : > { %v2414_v0 = vmul.f32 0.5, %v2413_v63 }
 0x95c   : > { %v2415_v1 = vsub.f32 1.5, %v2414_v0  ;;  %v5043_v0 = vld [vmem:[#allocation7 + $0x1] ss:$0 sm:$0xff] }
 0x95e   : > { %v2416_v2 = vmul.f32 %v5072_v61, %v2415_v1 }
 0x960   : > { %v2420_v9 = vsel %vm2419_vm9, %v5072_v61, %v2416_v2 }
 0x961   : > { %v2421_v12 = vmul.f32 %v2420_v9, %v2404_v53 }
 0x963   : > { %v2425_v6 = vmul.f32 %v5037_v4, %v2421_v12  ;;  %v5044_v4 = vld [vmem:[%s6425_s5 + $0x1] ss:$0 sm:$0xff] }
 0x965   : > { %v2429_v13 = vadd.f32 %v5038_v11, %v2425_v6 }
 0x967   : > { %v2430_v15 = vpack.c.bf16 %v2429_v13, %v2429_v13 }
 0x969   : > { %4634 = vmatmul.msk.bf16.vlgmr.msrb.gmra.mxu3 %vm734_vm0, %v2430_v15 }
 0x9ec   : > { %v2463_v14 = vpop.f32.mrf.mxu3 }
 0x9ed   : > { %v2464_v18 = vadd.f32 %v5039_v20, %v2463_v14 }
 0x9ef   : > { %v2468_v21 = vmul.f32 0.044715, %v2464_v18  ;;  %v2467_v27 = vmul.f32 0.5, %v2464_v18 }
 0x9f1   : > { %v2469_v22 = vmul.f32 %v2468_v21, %v2464_v18 }
 0x9f3   : > { %v2470_v24 = vmul.f32 %v2469_v22, %v2464_v18 }
 0x9f4   : > { %v2465_v25 = vpop.f32.mrf.mxu3 }
 0x9f5   : > { %v2471_v26 = vadd.f32 %v2470_v24, %v2464_v18 }
 0x9f7   : > { %v2472_v3 = vmul.f32 0.7978846, %v2471_v26 }
 0x9f9   : > { %5073 = vtanh.f32 %v2472_v3 }
 0x9ff   : > { %v5074_v51 = vpop.eup %5073 }
 0xa00   : > { %v2474_v28 = vadd.f32 1.0, %v5074_v51 }
 0xa02   : > { %v2475_v5 = vmul.f32 %v2474_v28, %v2467_v27 }
 0xa04   : > { %v2476_v43 = vpack.c.bf16 %v2475_v5, %v2475_v5 }
 0xa06   : > { %4651 = vmatmul.msk.bf16.vlgmr.msrb.gmra.mxu0 %vm2513_vm10, %v2476_v43 }
 0xa83   : > { %v2526_v30 = vpop.f32.mrf.mxu0 }
 0xa84   : > { %v2527_v47 = vadd.f32 %v5040_v29, %v2526_v30 }
 0xa86   : > { %v2530_v10 = vadd.f32 %v2527_v47, %v2429_v13 }
 0xa88   : > { %v2533_v8 = vsel %vm734_vm0, %v2530_v10, 0.0 }
 0xa89   : > { %2534 = vadd.xlane.f32.xlu2 %v2533_v8 }
 0xa8b   : > { %v2528_v31 = vpop.f32.mrf.mxu0 }
 0xafc   : > { %v2535_v32 = vpop.xlane.xlu2 %2534 }
 0xafd   : > { %v2536_v33 = vmul.f32 %v2535_v32, %v5996_v49 }
 0xaff   : > { %v2537_v34 = vsub.f32 %v2530_v10, %v2536_v33 }
 0xb01   : > { %v2538_v36 = vmul.f32 %v2537_v34, %v2537_v34 }
 0xb03   : > { %v2539_v37 = vsel %vm734_vm0, %v2538_v36, 0.0 }
 0xb04   : > { %2540 = vadd.xlane.f32.xlu1 %v2539_v37 }
 0xb77   : > { %v2541_v45 = vpop.xlane.xlu1 %2540 }
 0xb78   : > { %v2542_v46 = vmul.f32 %v2541_v45, %v5996_v49 }
 0xb7a   : > { %v2543_v48 = vadd.f32 1e-12, %v2542_v46 }
 0xb7c   : > { %5075 = vrsqrt.f32 %v2543_v48  ;;  %vm2550_vm12 = vweird.f32 %v2543_v48 }
 0xb82   : > { %v5076_v50 = vpop.eup %5075 }
 0xb83   : > { %v2545_v52 = vmul.f32 %v5076_v50, %v2543_v48  ;;  %vm2551_vm11 = vweird.f32 %v5076_v50 }
 0xb84   : > { %vm2552_vm13 = vmor %vm2550_vm12, %vm2551_vm11 }
 0xb85   : > { %v2546_v53 = vmul.f32 %v5076_v50, %v2545_v52 }
 0xb87   : > { %v2547_v54 = vmul.f32 0.5, %v2546_v53 }
 0xb89   : > { %v2548_v55 = vsub.f32 1.5, %v2547_v54 }
 0xb8b   : > { %v2549_v56 = vmul.f32 %v5076_v50, %v2548_v55 }
 0xb8d   : > { %v2553_v58 = vsel %vm2552_vm13, %v5076_v50, %v2549_v56 }
 0xb8e   : > { %v2554_v60 = vmul.f32 %v2553_v58, %v2537_v34 }
 0xb90   : > { %v2558_v61 = vmul.f32 %v5041_v57, %v2554_v60 }
 0xb92   : > { %v6049_v62 = vadd.f32 %v5042_v59, %v2558_v61 }
 0xb94   : > { %v2563_v63 = vpack.c.bf16 %v6049_v62, %v6049_v62 }
 0xb96   : > { %4664 = vmatmul.msk.bf16.vlgmr.msrb.gmra.mxu1 %vm734_vm0, %v2563_v63  ;;  %4678 = vmatmul.msk.bf16.vlgmr.msrb.gmra.mxu2 %vm734_vm0, %v2563_v63 }
 0xb97   : > { %4692 = vmatmul.msk.bf16.vlgmr.msra.gmra.mxu3 %vm734_vm0, %v2563_v63 }
 0xc13   : > { %v2598_v1 = vpop.f32.mrf.mxu1 }
 0xc14   : > { %v2599_v2 = vadd.f32 %v5043_v0, %v2598_v1 }
 0xc16   : > { %2679 = vrot.lane.b32.xlu2 %v2599_v2, %s5406_s22  ;;  %2676 = vrot.lane.b32.xlu1 %v2599_v2, %s5404_s14  ;;  %v2684_v18 = vrot.slane %v2599_v2, 4 }
 0xc19   : > { %v2633_v9 = vpop.f32.mrf.mxu2 }
 0xc1a   : > { %v2634_v11 = vadd.f32 %v5044_v4, %v2633_v9  ;;  %v6061_v12 = vpop.f32.mrf.mxu3 }
 0xc1b   : > { %v2600_v6 = vpop.f32.mrf.mxu1 }
 0xc1c   : > { %2753 = vrot.lane.b32.xlu0 %v2634_v11, %s5406_s22  ;;  %v4965_v13 = vpack.i.bf16 %v2599_v2, %v2634_v11  ;;  %v2758_v21 = vrot.slane %v2634_v11, 4 }
 0xc1e   : > { %2750 = vrot.lane.b32.xlu2 %v2634_v11, %s5404_s14  ;;  %4966 = vrot.lane.b32.xlu1 %v4965_v13, %s5405_s11 }
 0xc21   : > { %v2635_v15 = vpop.f32.mrf.mxu2 }
 0xc22   : > { %v2670_v16 = vpop.f32.mrf.mxu3 }
 0xc70   : > { %v2680_v17 = vpop.permute.xlu2 %2679 }
 0xc71   : > { %v2694_v51 = vrot.slane %v2680_v17, 4 }
 0xc78   : > { %v2751_v7 = vpop.permute.xlu2 %2750 }
 0xc79   : > { %v2756_v14 = vrot.slane %v2751_v7, 4  ;;  %v2759_v3 = vsel %vm828_vm1, %v2751_v7, %v2758_v21 }
 0xc7a   : > { %v2767_v10 = vperm.slane %v2759_v3, %v5717_v23 }
 0xc7b   : > { %v2757_v26 = vsel %vm828_vm1, %v2756_v14, %v2634_v11 }
 0xc7c   : > { %v2763_v47 = vperm.slane %v2757_v26, %v5717_v23  ;;  %v2794_v48 = vrot.slane %v2767_v10, 4 }
 0xc7e   : > { %v2782_v46 = vrot.slane %v2763_v47, 4 }
 0xc88   : > { %v2677_v19 = vpop.permute.xlu1 %2676 }
 0xc89   : > { %v2682_v20 = vrot.slane %v2677_v19, 4  ;;  %v2685_v24 = vsel %vm828_vm1, %v2677_v19, %v2684_v18 }
 0xc8a   : > { %v2693_v5 = vperm.slane %v2685_v24, %v5717_v23 }
 0xc8b   : > { %v2683_v22 = vsel %vm828_vm1, %v2682_v20, %v2599_v2 }
 0xc8c   : > { %v2689_v27 = vperm.slane %v2683_v22, %v5717_v23  ;;  %v2720_v38 = vrot.slane %v2693_v5, 4 }
 0xc8e   : > { %v2754_v25 = vpop.permute.xlu0 %2753  ;;  %v2708_v34 = vrot.slane %v2689_v27, 4 }
 0xc8f   : > { %v2768_v43 = vrot.slane %v2754_v25, 4 }
 0xc90   : > { %v4967_v28 = vpop.permute.xlu1 %4966 }
 0xc91   : > { %v4969_v29 = vunpack.i.h.bf16 %v4967_v28  ;;  %v4968_v30 = vunpack.i.l.bf16 %v4967_v28 }
 0xc93   : > { %v2695_v8 = vsel %vm828_vm1, %v2694_v51, %v4969_v29  ;;  %v2696_v31 = vrot.slane %v4969_v29, 4  ;;  %v2769_v32 = vsel %vm828_vm1, %v2768_v43, %v4968_v30  ;;  %v2770_v33 = vrot.slane %v4968_v30, 4 }
 0xc94   : > { %v2701_v36 = vperm.slane %v2695_v8, %v5717_v23  ;;  %v2775_v37 = vperm.slane %v2769_v32, %v5717_v23 }
 0xc95   : > { %v2697_v39 = vsel %vm828_vm1, %v2680_v17, %v2696_v31  ;;  %v2771_v40 = vsel %vm828_vm1, %v2754_v25, %v2770_v33 }
 0xc96   : > { %v2705_v41 = vperm.slane %v2697_v39, %v5717_v23  ;;  %v2706_v42 = vrot.slane %v2701_v36, 4  ;;  %v2709_v44 = vsel %vm828_vm1, %v2701_v36, %v2708_v34  ;;  %v2779_v45 = vperm.slane %v2771_v40, %v5717_v23 }
 0xc97   : > { %v2717_v50 = vperm.slane %v2709_v44, %v5729_v35  ;;  %v2780_v52 = vrot.slane %v2775_v37, 4  ;;  %v2783_v60 = vsel %vm828_vm1, %v2775_v37, %v2782_v46 }
 0xc98   : > { %v2707_v53 = vsel %vm828_vm1, %v2706_v42, %v2689_v27  ;;  %v2718_v54 = vrot.slane %v2705_v41, 4  ;;  %v2721_v55 = vsel %vm828_vm1, %v2705_v41, %v2720_v38  ;;  %v2792_v56 = vrot.slane %v2779_v45, 4 }
 0xc99   : > { %v2713_v57 = vperm.slane %v2707_v53, %v5729_v35  ;;  %v2732_v58 = vrot.slane %v2717_v50, 4  ;;  %v2729_v59 = vperm.slane %v2721_v55, %v5729_v35  ;;  %v2740_v61 = vpack.c.bf16 %v2717_v50, %v2717_v50 }
 0xc9a   : > { %v2719_v63 = vsel %vm828_vm1, %v2718_v54, %v2693_v5  ;;  %v2795_v0 = vsel %vm828_vm1, %v2779_v45, %v2794_v48  ;;  %v2781_v1 = vsel %vm828_vm1, %v2780_v52, %v2763_v47  ;;  %v2793_v11 = vsel %vm828_vm1, %v2792_v56, %v2767_v10 }
 0xc9b   : > { %v2730_v2 = vrot.slane %v2713_v57, 4  ;;  %v2733_v4 = vsel %vm828_vm1, 0.0, %v2732_v58  ;;  %v2725_v9 = vperm.slane %v2719_v63, %v5729_v35  ;;  %v2738_v6 = vpack.c.bf16 %v2713_v57, %v2713_v57 }
 0xc9c   : > { %v2736_v13 = vrot.slane %v2729_v59, 4  ;;  %v2744_v15 = vpack.c.bf16 %v2729_v59, %v2729_v59  ;;  %v2803_v16 = vperm.slane %v2795_v0, %v5729_v35  ;;  %v2741_v17 = vpack.c.bf16 %v2733_v4, %v2733_v4 }
 0xc9d   : > { %v2734_v7 = vrot.slane %v2725_v9, 4  ;;  %v2742_v19 = vpack.c.bf16 %v2725_v9, %v2725_v9  ;;  %v2787_v20 = vperm.slane %v2781_v1, %v5729_v35  ;;  %v2731_v14 = vsel %vm828_vm1, 0.0, %v2730_v2 }
 0xc9e   : > { %v2737_v18 = vsel %vm828_vm1, 0.0, %v2736_v13  ;;  %v2900_v21 = vrot.slane %v2744_v15, 4  ;;  %v2810_v22 = vrot.slane %v2803_v16, 4  ;;  %v2818_v3 = vpack.c.bf16 %v2803_v16, %v2803_v16  ;;  %v5045_v16 = vld [vmem:[%s6427_s7 + $0x1] ss:$0 sm:$0xff] }
 0xc9f   : > { %v2735_v24 = vsel %vm828_vm1, 0.0, %v2734_v7  ;;  %v2745_v25 = vpack.c.bf16 %v2737_v18, %v2737_v18  ;;  %v2894_v26 = vrot.slane %v2742_v19, 4  ;;  %v2804_v5 = vrot.slane %v2787_v20, 4 }
 0xca0   : > { %v2743_v51 = vpack.c.bf16 %v2735_v24, %v2735_v24  ;;  %v2901_v27 = vsel %vm828_vm1, %v2900_v21, %v2740_v61  ;;  %v2811_v28 = vsel %vm828_vm1, 0.0, %v2810_v22  ;;  %v2739_v10 = vpack.c.bf16 %v2731_v14, %v2731_v14 }
 0xca1   : > { %v2895_v43 = vsel %vm828_vm1, %v2894_v26, %v2738_v6  ;;  %v2905_v29 = vperm.slane %v2901_v27, %v5717_v23  ;;  %v2920_v30 = vrot.slane %v2745_v25, 4  ;;  %v2819_v47 = vpack.c.bf16 %v2811_v28, %v2811_v28 }
 0xca2   : > { %v2914_v8 = vrot.slane %v2743_v51, 4  ;;  %v2805_v31 = vsel %vm828_vm1, 0.0, %v2804_v5  ;;  %v2799_v32 = vperm.slane %v2793_v11, %v5729_v35  ;;  %v2812_v36 = vpack.c.bf16 %v2787_v20, %v2787_v20 }
 0xca3   : > { %v2906_v33 = vrot.slane %v2905_v29, 4  ;;  %v2921_v34 = vsel %vm828_vm1, %v2920_v30, %v2741_v17  ;;  %4970 = vxpose.binary.xlu2.c.b16.start.end [1/2] (short) (narrow) %v2819_v47, %v2818_v3, 16  ;;  %v2813_v37 = vpack.c.bf16 %v2805_v31, %v2805_v31  ;;  %v2899_v39 = vperm.slane %v2895_v43, %v5717_v23 }
 0xca4   : > { %v2808_v38 = vrot.slane %v2799_v32, 4  ;;  %v2915_v40 = vsel %vm828_vm1, %v2914_v8, %v2739_v10  ;;  %v2925_v42 = vperm.slane %v2921_v34, %v5717_v23  ;;  %v2791_v45 = vperm.slane %v2783_v60, %v5729_v35 }
 0xca5   : > { %4976 = vxpose.binary.xlu0.c.b16.start.end [1/2] (short) (narrow) %v2813_v37, %v2812_v36, 16  ;;  %v2919_v41 = vperm.slane %v2915_v40, %v5717_v23  ;;  %v2907_v46 = vsel %vm828_vm1, %v2906_v33, %v2899_v39  ;;  %v2816_v48 = vpack.c.bf16 %v2799_v32, %v2799_v32 }
 0xca6   : > { %v2809_v44 = vsel %vm828_vm1, 0.0, %v2808_v38  ;;  %v6115_v52 = vperm.slane %v2907_v46, %v5729_v35  ;;  %v2926_v53 = vrot.slane %v2925_v42, 4  ;;  %v2806_v57 = vrot.slane %v2791_v45, 4 }
 0xca7   : > { %v2817_v50 = vpack.c.bf16 %v2809_v44, %v2809_v44  ;;  %v2814_v13 = vpack.c.bf16 %v2791_v45, %v2791_v45  ;;  %v6146_v17 = vadd.f32 %v5045_v16, %v6061_v12 }
 0xca8   : > { %v2927_v54 = vsel %vm828_vm1, %v2926_v53, %v2919_v41  ;;  %v2912_v55 = vrot.slane %v6115_v52, 4  ;;  %v2937_v58 = vshrl.u32 %v6115_v52, 16  ;;  %v2807_v11 = vsel %vm828_vm1, 0.0, %v2806_v57 }
 0xca9   : > { %4973 = vxpose.binary.xlu1.c.b16.start.end [1/2] (short) (narrow) %v2817_v50, %v2816_v48, 16  ;;  %v6120_v56 = vperm.slane %v2927_v54, %v5729_v35  ;;  %v2815_v15 = vpack.c.bf16 %v2807_v11, %v2807_v11 }
 0xcaa   : > { %v6127_v61 = vsel %vm828_vm1, 0, %v2912_v55 }
 0xcab   : > { %v2936_v59 = vpack.i.b16 %v6120_v56, %v6115_v52  ;;  %v2938_v60 = vshrl.u32 %v6120_v56, 16  ;;  %v2932_v63 = vrot.slane %v6120_v56, 4  ;;  %v2943_v4 = vshrl.u32 %v6127_v61, 16 }
 0xcac   : > { %v2832_v52 = vrot.slane %v6146_v17, 4 }
 0xcad   : > { %v6130_v0 = vpack.i.b16 %v2938_v60, %v2937_v58  ;;  %v6133_v1 = vsel %vm828_vm1, 0, %v2932_v63 }
 0xcae   : > { %v2942_v2 = vpack.i.b16 %v6133_v1, %v6127_v61  ;;  %v2944_v9 = vshrl.u32 %v6133_v1, 16 }
 0xcb0   : > { %v6140_v6 = vpack.i.b16 %v2944_v9, %v2943_v4 }
 0xcb5   : > { %4979 = vxpose.binary.xlu0.c.b16.start.end [1/2] (short) (narrow) %v2815_v15, %v2814_v13, 16 }
 0xd03   : > { %2827 = vrot.lane.b32.xlu1 %v6146_v17, %s5406_s22 }
 0xd0b   : > { %2824 = vrot.lane.b32.xlu1 %v6146_v17, %s5404_s14  ;;  %s6496_s14 = smov 8  }
 0xd44   : > { %v4971_v19 = vpop.trf.xlu2 }
 0xd45   : > { %v3080_v18 = vrot.slane %v4971_v19, 4 }
 0xd4c   : > { %v4972_v12 = vpop.trf.xlu2 }
 0xd4d   : > { %v3108_v27 = vrot.slane %v4972_v12, 4 }
 0xd51   : > { %v4977_v7 = vpop.trf.xlu0 }
 0xd55   : > { %v4974_v20 = vpop.trf.xlu1 }
 0xd56   : > { %v3074_v22 = vrot.slane %v4974_v20, 4 }
 0xd58   : > { %v3075_v3 = vsel %vm828_vm1, %v3074_v22, %v4977_v7 }
 0xd59   : > { %v4978_v14 = vpop.trf.xlu0  ;;  %v3079_v5 = vperm.slane %v3075_v3, %v5717_v23 }
 0xd5b   : > { %v3088_v41 = vrot.slane %v3079_v5, 4 }
 0xd5d   : > { %v4975_v25 = vpop.trf.xlu1 }
 0xd5e   : > { %v3102_v51 = vrot.slane %v4975_v25, 4 }
 0xd60   : > { %v3103_v29 = vsel %vm828_vm1, %v3102_v51, %v4978_v14 }
 0xd61   : > { %v4980_v21 = vpop.trf.xlu0  ;;  %v3107_v8 = vperm.slane %v3103_v29, %v5717_v23 }
 0xd62   : > { %v3081_v24 = vsel %vm828_vm1, %v3080_v18, %v4980_v21 }
 0xd63   : > { %v3085_v26 = vperm.slane %v3081_v24, %v5717_v23  ;;  %v3116_v40 = vrot.slane %v3107_v8, 4 }
 0xd65   : > { %v3086_v28 = vrot.slane %v3085_v26, 4  ;;  %v3089_v44 = vsel %vm828_vm1, %v3085_v26, %v3088_v41 }
 0xd66   : > { %v3097_v46 = vperm.slane %v3089_v44, %v5729_v35 }
 0xd67   : > { %v3087_v47 = vsel %vm828_vm1, %v3086_v28, %v3079_v5 }
 0xd68   : > { %v3093_v32 = vperm.slane %v3087_v47, %v5729_v35  ;;  %v3150_v50 = vshrl.u32 %v3097_v46, 16  ;;  %v3100_v15 = vrot.slane %v3097_v46, 4 }
 0xd69   : > { %v4981_v43 = vpop.trf.xlu0 }
 0xd6a   : > { %v3109_v30 = vsel %vm828_vm1, %v3108_v27, %v4981_v43  ;;  %v3134_v36 = vshrl.u32 %v3093_v32, 16  ;;  %v3098_v57 = vrot.slane %v3093_v32, 4  ;;  %v3101_v7 = vsel %vm828_vm1, 0, %v3100_v15 }
 0xd6b   : > { %v3113_v10 = vperm.slane %v3109_v30, %v5717_v23  ;;  %v3158_v20 = vshrl.u32 %v3101_v7, 16 }
 0xd6c   : > { %v3099_v60 = vsel %vm828_vm1, 0, %v3098_v57 }
 0xd6d   : > { %v3114_v31 = vrot.slane %v3113_v10, 4  ;;  %v3117_v42 = vsel %vm828_vm1, %v3113_v10, %v3116_v40  ;;  %v3142_v4 = vshrl.u32 %v3099_v60, 16 }
 0xd6e   : > { %v3125_v45 = vperm.slane %v3117_v42, %v5729_v35 }
 0xd6f   : > { %v3115_v33 = vsel %vm828_vm1, %v3114_v31, %v3107_v8 }
 0xd70   : > { %v3121_v34 = vperm.slane %v3115_v33, %v5729_v35  ;;  %v3151_v48 = vshrl.u32 %v3125_v45, 16  ;;  %v3148_v53 = vpack.i.b16 %v3125_v45, %v3097_v46  ;;  %v3128_v13 = vrot.slane %v3125_v45, 4 }
 0xd72   : > { %v3135_v37 = vshrl.u32 %v3121_v34, 16  ;;  %v3132_v38 = vpack.i.b16 %v3121_v34, %v3093_v32  ;;  %v3152_v54 = vpack.i.b16 %v3151_v48, %v3150_v50  ;;  %v3126_v55 = vrot.slane %v3121_v34, 4 }
 0xd73   : > { %v3129_v16 = vsel %vm828_vm1, 0, %v3128_v13 }
 0xd74   : > { %v3136_v39 = vpack.i.b16 %v3135_v37, %v3134_v36  ;;  %v3127_v58 = vsel %vm828_vm1, 0, %v3126_v55  ;;  %v3159_v19 = vshrl.u32 %v3129_v16, 16  ;;  %v3156_v14 = vpack.i.b16 %v3129_v16, %v3101_v7 }
 0xd75   : > { %v3143_v63 = vshrl.u32 %v3127_v58, 16  ;;  %v3140_v9 = vpack.i.b16 %v3127_v58, %v3099_v60 }
 0xd76   : > { %4982 = vxpose.binary.xlu0.c.b16.start.end [1/2] (short) (narrow) %v3136_v39, %v3132_v38, 16  ;;  %v3160_v18 = vpack.i.b16 %v3159_v19, %v3158_v20 }
 0xd77   : > { %v3144_v11 = vpack.i.b16 %v3143_v63, %v3142_v4 }
 0xd86   : > { %4985 = vxpose.binary.xlu0.c.b16.start.end [1/2] (short) (narrow) %v3152_v54, %v3148_v53, 16 }
 0xd96   : > { %4988 = vxpose.binary.xlu0.c.b16.start.end [1/2] (short) (narrow) %v3144_v11, %v3140_v9, 16  ;;  %v2828_v11 = vpop.permute.xlu1 %2827 }
 0xd97   : > { %v2842_v15 = vrot.slane %v2828_v11, 4 }
 0xd9e   : > { %v2825_v13 = vpop.permute.xlu1 %2824 }
 0xd9f   : > { %v2830_v56 = vrot.slane %v2825_v13, 4 }
 0xda1   : > { %v2831_v7 = vsel %vm828_vm1, %v2830_v56, %v6146_v17 }
 0xda2   : > { %v2837_v19 = vperm.slane %v2831_v7, %v5717_v23 }
 0xda6   : > { %4991 = vxpose.binary.xlu0.c.b16.start.end [1/2] (short) (narrow) %v3160_v18, %v3156_v14, 16 }
 0xe14   : > { %2821 = vrot.lane.b32.xlu0 %v6146_v17, %s5405_s11 }
 0xe22   : > { %v4983_v21 = vpop.trf.xlu0 }
 0xe2a   : > { %v4984_v22 = vpop.trf.xlu0 }
 0xe32   : > { %v4986_v24 = vpop.trf.xlu0 }
 0xe33   : > { %v3290_v3 = vrot.slane %v4986_v24, 4 }
 0xe35   : > { %v3291_v28 = vsel %vm828_vm1, %v3290_v3, %v4983_v21 }
 0xe36   : > { %v3295_v29 = vperm.slane %v3291_v28, %v5717_v23 }
 0xe3a   : > { %v4987_v25 = vpop.trf.xlu0 }
 0xe3b   : > { %v3310_v47 = vrot.slane %v4987_v25, 4 }
 0xe3d   : > { %v3311_v32 = vsel %vm828_vm1, %v3310_v47, %v4984_v22  ;;  %v2856_v47 = vrot.slane %v2837_v19, 4 }
 0xe3e   : > { %v3315_v37 = vperm.slane %v3311_v32, %v5717_v23 }
 0xe42   : > { %v4989_v26 = vpop.trf.xlu0 }
 0xe4a   : > { %v4990_v12 = vpop.trf.xlu0 }
 0xe52   : > { %v4992_v51 = vpop.trf.xlu0 }
 0xe53   : > { %v3296_v27 = vrot.slane %v4992_v51, 4 }
 0xe55   : > { %v3297_v5 = vsel %vm828_vm1, %v3296_v27, %v4989_v26 }
 0xe56   : > { %v3301_v43 = vperm.slane %v3297_v5, %v5717_v23 }
 0xe58   : > { %v3302_v30 = vrot.slane %v3301_v43, 4 }
 0xe5a   : > { %v4993_v10 = vpop.trf.xlu0  ;;  %v3303_v8 = vsel %vm828_vm1, %v3302_v30, %v3295_v29 }
 0xe5b   : > { %v3316_v31 = vrot.slane %v4993_v10, 4  ;;  %v3307_v34 = vperm.slane %v3303_v8, %v5729_v35 }
 0xe5d   : > { %v3317_v33 = vsel %vm828_vm1, %v3316_v31, %v4990_v12  ;;  %v3308_v39 = vrot.slane %v3307_v34, 4  ;;  %v3333_v42 = vshrl.u32 %v3307_v34, 16 }
 0xe5e   : > { %v3321_v36 = vperm.slane %v3317_v33, %v5717_v23 }
 0xe5f   : > { %v3309_v46 = vsel %vm828_vm1, 0, %v3308_v39 }
 0xe60   : > { %v3322_v38 = vrot.slane %v3321_v36, 4  ;;  %v3339_v57 = vshrl.u32 %v3309_v46, 16 }
 0xe62   : > { %v3323_v40 = vsel %vm828_vm1, %v3322_v38, %v3315_v37 }
 0xe63   : > { %v3327_v41 = vperm.slane %v3323_v40, %v5729_v35 }
 0xe65   : > { %v3332_v44 = vpack.i.b16 %v3327_v41, %v3307_v34  ;;  %v3334_v45 = vshrl.u32 %v3327_v41, 16  ;;  %v3328_v48 = vrot.slane %v3327_v41, 4 }
 0xe67   : > { %v3346_v50 = vsel %vm1493_vm2, %v3332_v44, 0  ;;  %v3335_v53 = vpack.i.b16 %v3334_v45, %v3333_v42  ;;  %v3329_v54 = vsel %vm828_vm1, 0, %v3328_v48 }
 0xe68   : > { %3355 = vmatpush.bf16.msra.mxu0 %v3346_v50  ;;  %v3338_v55 = vpack.i.b16 %v3329_v54, %v3309_v46  ;;  %v3340_v58 = vshrl.u32 %v3329_v54, 16  ;;  %v5100_v50 = vld [vmem:[%s627_s23] ss:$0 sm:$0xff]  ;;  %s6495_s23 = smov 16  }
 0xe69   : > { %v3365_v60 = vsel %vm1493_vm2, %v3335_v53, 0 }
 0xe6a   : > { %3374 = vmatpush.bf16.msra.mxu1 %v3365_v60  ;;  %v3384_v63 = vsel %vm1493_vm2, %v3338_v55, 0  ;;  %v3341_v4 = vpack.i.b16 %v3340_v58, %v3339_v57 }
 0xe6b   : > { %4693 = vmatmul.msk.bf16.vlgmr.msra.gmra.mxu0 %vm1489_vm3, %v2936_v59  ;;  %3393 = vmatpush.bf16.msra.mxu2 %v3384_v63  ;;  %v2833_v59 = vsel %vm828_vm1, %v2825_v13, %v2832_v52 }
 0xe6c   : > { %v3403_v9 = vsel %vm1493_vm2, %v3341_v4, 0  ;;  %v2841_v16 = vperm.slane %v2833_v59, %v5717_v23 }
 0xe6d   : > { %4694 = vmatmul.msk.bf16.vlgmr.msra.gmra.mxu1 %vm1489_vm3, %v6130_v0  ;;  %3412 = vmatpush.bf16.msrb.mxu3 %v3403_v9 }
 0xe6e   : > { %4695 = vmatmul.msk.bf16.vlgmr.msra.gmra.mxu2 %vm1489_vm3, %v2942_v2  ;;  %v2868_v20 = vrot.slane %v2841_v16, 4 }
 0xe70   : > { %4696 = vmatmul.msk.bf16.vlgmr.msrb.gmra.mxu3 %vm1489_vm3, %v6140_v6 }
 0xe86   : > { %v2822_v0 = vpop.permute.xlu0 %2821 }
 0xe87   : > { %v2843_v61 = vsel %vm828_vm1, %v2842_v15, %v2822_v0  ;;  %v2844_v1 = vrot.slane %v2822_v0, 4 }
 0xe88   : > { %v2849_v2 = vperm.slane %v2843_v61, %v5717_v23 }
 0xe89   : > { %v2845_v6 = vsel %vm828_vm1, %v2828_v11, %v2844_v1 }
 0xe8a   : > { %v2853_v14 = vperm.slane %v2845_v6, %v5717_v23  ;;  %v2854_v18 = vrot.slane %v2849_v2, 4  ;;  %v2857_v33 = vsel %vm828_vm1, %v2849_v2, %v2856_v47 }
 0xe8b   : > { %v2865_v34 = vperm.slane %v2857_v33, %v5729_v35 }
 0xe8c   : > { %v2866_v21 = vrot.slane %v2853_v14, 4  ;;  %v2869_v22 = vsel %vm828_vm1, %v2853_v14, %v2868_v20  ;;  %v2855_v24 = vsel %vm828_vm1, %v2854_v18, %v2837_v19 }
 0xe8d   : > { %v2877_v17 = vperm.slane %v2869_v22, %v5729_v35  ;;  %v2861_v25 = vperm.slane %v2855_v24, %v5729_v35  ;;  %v2880_v36 = vrot.slane %v2865_v34, 4  ;;  %v2888_v38 = vpack.c.bf16 %v2865_v34, %v2865_v34 }
 0xe8e   : > { %v2867_v26 = vsel %vm828_vm1, %v2866_v21, %v2841_v16 }
 0xe8f   : > { %v2884_v12 = vrot.slane %v2877_v17, 4  ;;  %v2878_v3 = vrot.slane %v2861_v25, 4  ;;  %v2873_v51 = vperm.slane %v2867_v26, %v5729_v35  ;;  %v2892_v5 = vpack.c.bf16 %v2877_v17, %v2877_v17 }
 0xe90   : > { %v2886_v10 = vpack.c.bf16 %v2861_v25, %v2861_v25  ;;  %v2881_v37 = vsel %vm828_vm1, 0.0, %v2880_v36 }
 0xe91   : > { %v2885_v27 = vsel %vm828_vm1, 0.0, %v2884_v12  ;;  %v2879_v28 = vsel %vm828_vm1, 0.0, %v2878_v3  ;;  %v2882_v30 = vrot.slane %v2873_v51, 4  ;;  %v2890_v31 = vpack.c.bf16 %v2873_v51, %v2873_v51 }
 0xe92   : > { %v2893_v43 = vpack.c.bf16 %v2885_v27, %v2885_v27  ;;  %v2887_v29 = vpack.c.bf16 %v2879_v28, %v2879_v28  ;;  %v2889_v39 = vpack.c.bf16 %v2881_v37, %v2881_v37 }
 0xe93   : > { %v2883_v8 = vsel %vm828_vm1, 0.0, %v2882_v30 }
 0xe94   : > { %5000 = vxpose.binary.xlu0.c.b16.start.end [1/2] (short) (narrow) %v2893_v43, %v2892_v5, 16  ;;  %v2891_v32 = vpack.c.bf16 %v2883_v8, %v2883_v8 }
 0xe95   : > { %4997 = vxpose.binary.xlu2.c.b16.start.end [1/2] (short) (narrow) %v2887_v29, %v2886_v10, 16 }
 0xe96   : > { %4994 = vxpose.binary.xlu1.c.b16.start.end [1/2] (short) (narrow) %v2891_v32, %v2890_v31, 16 }
 0xea5   : > { %5003 = vxpose.binary.xlu2.c.b16.start.end [1/2] (short) (narrow) %v2889_v39, %v2888_v38, 16 }
 0xee8   : > { %v3357_v40 = vpop.f32.mrf.mxu0 }
 0xee9   : > { %v3418_v54 = vmul.f32 0.35355338, %v3357_v40 }
 0xeea   : > { %v3376_v41 = vpop.f32.mrf.mxu1 }
 0xeeb   : > { %v6232_v58 = vadd.f32 %v5100_v50, %v3418_v54  ;;  %v3419_v4 = vmul.f32 0.35355338, %v3376_v41 }
 0xeed   : > { %v3426_v63 = vsel %vm1489_vm3, %v6232_v58, -inf  ;;  %v6236_v9 = vadd.f32 %v5100_v50, %v3419_v4 }
 0xeef   : > { %v3429_v13 = vsel %vm1489_vm3, %v6236_v9, -inf }
 0xef0   : > { %v3359_v42 = vpop.f32.mrf.mxu0 }
 0xef1   : > { %v3395_v44 = vpop.f32.mrf.mxu2 }
 0xef2   : > { %v3420_v45 = vmul.f32 0.35355338, %v3395_v44  ;;  %v3378_v46 = vpop.f32.mrf.mxu1 }
 0xef3   : > { %v3414_v48 = vpop.f32.mrf.mxu3 }
 0xef4   : > { %v6228_v53 = vadd.f32 %v5100_v50, %v3420_v45  ;;  %v3421_v11 = vmul.f32 0.35355338, %v3414_v48 }
 0xef6   : > { %v3432_v55 = vsel %vm1489_vm3, %v6228_v53, -inf  ;;  %v6240_v52 = vadd.f32 %v5100_v50, %v3421_v11 }
 0xef7   : > { %3433 = vmax.xlane.f32.xlu1 %v3432_v55 }
 0xef8   : > { %v3435_v56 = vsel %vm1489_vm3, %v6240_v52, -inf }
 0xef9   : > { %v3397_v57 = vpop.f32.mrf.mxu2 }
 0xefb   : > { %v3416_v60 = vpop.f32.mrf.mxu3 }
 0xeff   : > { %3427 = vmax.xlane.f32.xlu1 %v3426_v63 }
 0xf16   : > { %3430 = vmax.xlane.f32.xlu2 %v3429_v13 }
 0xf1e   : > { %3436 = vmax.xlane.f32.xlu2 %v3435_v56 }
 0xf36   : > { %v4998_v59 = vpop.trf.xlu2 }
 0xf3e   : > { %v4999_v15 = vpop.trf.xlu2 }
 0xf40   : > { %v5001_v16 = vpop.trf.xlu0 }
 0xf41   : > { %v3608_v7 = vrot.slane %v5001_v16, 4 }
 0xf42   : > { %v4995_v0 = vpop.trf.xlu1 }
 0xf43   : > { %v3602_v61 = vrot.slane %v4995_v0, 4 }
 0xf45   : > { %v3603_v1 = vsel %vm828_vm1, %v3602_v61, %v4998_v59 }
 0xf46   : > { %v5004_v2 = vpop.trf.xlu2  ;;  %v3607_v6 = vperm.slane %v3603_v1, %v5717_v23 }
 0xf47   : > { %v3609_v19 = vsel %vm828_vm1, %v3608_v7, %v5004_v2 }
 0xf48   : > { %v3613_v20 = vperm.slane %v3609_v19, %v5717_v23  ;;  %v5002_v14 = vpop.trf.xlu0  ;;  %v3616_v18 = vrot.slane %v3607_v6, 4 }
 0xf49   : > { %v3636_v17 = vrot.slane %v5002_v14, 4 }
 0xf4a   : > { %v3614_v21 = vrot.slane %v3613_v20, 4  ;;  %v3617_v22 = vsel %vm828_vm1, %v3613_v20, %v3616_v18  ;;  %v4996_v24 = vpop.trf.xlu1 }
 0xf4b   : > { %v3630_v26 = vrot.slane %v4996_v24, 4  ;;  %v3625_v12 = vperm.slane %v3617_v22, %v5729_v35 }
 0xf4c   : > { %v3615_v25 = vsel %vm828_vm1, %v3614_v21, %v3607_v6 }
 0xf4d   : > { %v3631_v3 = vsel %vm828_vm1, %v3630_v26, %v4999_v15  ;;  %v6253_v27 = vperm.slane %v3615_v25, %v5729_v35  ;;  %v3628_v30 = vrot.slane %v3625_v12, 4  ;;  %v3678_v34 = vshrl.u32 %v3625_v12, 16 }
 0xf4e   : > { %v5005_v51 = vpop.trf.xlu2  ;;  %v3635_v28 = vperm.slane %v3631_v3, %v5717_v23 }
 0xf4f   : > { %v3637_v5 = vsel %vm828_vm1, %v3636_v17, %v5005_v51  ;;  %v3626_v8 = vrot.slane %v6253_v27, 4  ;;  %v3629_v36 = vsel %vm828_vm1, 0, %v3628_v30  ;;  %v3662_v40 = vshrl.u32 %v6253_v27, 16 }
 0xf50   : > { %v3641_v43 = vperm.slane %v3637_v5, %v5717_v23  ;;  %v3644_v29 = vrot.slane %v3635_v28, 4  ;;  %v3686_v50 = vshrl.u32 %v3629_v36, 16 }
 0xf51   : > { %v3627_v41 = vsel %vm828_vm1, 0, %v3626_v8 }
 0xf52   : > { %v3642_v47 = vrot.slane %v3641_v43, 4  ;;  %v3645_v10 = vsel %vm828_vm1, %v3641_v43, %v3644_v29  ;;  %v3670_v63 = vshrl.u32 %v3627_v41, 16 }
 0xf53   : > { %v3653_v32 = vperm.slane %v3645_v10, %v5729_v35 }
 0xf54   : > { %v3643_v31 = vsel %vm828_vm1, %v3642_v47, %v3635_v28 }
 0xf55   : > { %v3649_v33 = vperm.slane %v3643_v31, %v5729_v35  ;;  %v3676_v37 = vpack.i.b16 %v3653_v32, %v3625_v12  ;;  %v3679_v38 = vshrl.u32 %v3653_v32, 16  ;;  %v3656_v39 = vrot.slane %v3653_v32, 4 }
 0xf57   : > { %v3654_v42 = vrot.slane %v3649_v33, 4  ;;  %v3660_v44 = vpack.i.b16 %v3649_v33, %v6253_v27  ;;  %v3663_v45 = vshrl.u32 %v3649_v33, 16  ;;  %v3680_v46 = vpack.i.b16 %v3679_v38, %v3678_v34 }
 0xf58   : > { %v3657_v48 = vsel %vm828_vm1, 0, %v3656_v39 }
 0xf59   : > { %v3655_v54 = vsel %vm828_vm1, 0, %v3654_v42  ;;  %v3684_v55 = vpack.i.b16 %v3657_v48, %v3629_v36  ;;  %v3687_v57 = vshrl.u32 %v3657_v48, 16  ;;  %v3664_v60 = vpack.i.b16 %v3663_v45, %v3662_v40 }
 0xf5a   : > { %v3671_v4 = vshrl.u32 %v3655_v54, 16  ;;  %v3668_v13 = vpack.i.b16 %v3655_v54, %v3627_v41 }
 0xf5b   : > { %v3688_v11 = vpack.i.b16 %v3687_v57, %v3686_v50 }
 0xf5c   : > { %v3672_v56 = vpack.i.b16 %v3671_v4, %v3670_v63 }
 0xf5e   : > { %5009 = vxpose.binary.xlu2.c.b16.start.end [1/2] (short) (narrow) %v3672_v56, %v3668_v13, 16 }
 0xf6a   : > { %v3434_v59 = vpop.xlane.xlu1 %3433 }
 0xf6b   : > { %v3440_v6 = vsub.f32 %v6228_v53, %v3434_v59 }
 0xf6d   : > { %v3446_v20 = vmul.f32 1.442695, %v3440_v6 }
 0xf72   : > { %v3428_v15 = vpop.xlane.xlu1 %3427 }
 0xf73   : > { %v3438_v16 = vsub.f32 %v6232_v58, %v3428_v15 }
 0xf75   : > { %v3442_v0 = vmul.f32 1.442695, %v3438_v16 }
 0xf77   : > { %5077 = vpow2.f32 %v3442_v0 }
 0xf7d   : > { %v5078_v7 = vpop.eup %5077 }
 0xf7e   : > { %v3450_v61 = vsel %vm1489_vm3, %v5078_v7, 0.0 }
 0xf7f   : > { %3451 = vadd.xlane.f32.xlu0 %v3450_v61 }
 0xf89   : > { %v3431_v1 = vpop.xlane.xlu2 %3430 }
 0xf8a   : > { %v3439_v2 = vsub.f32 %v6236_v9, %v3431_v1 }
 0xf8c   : > { %v3444_v19 = vmul.f32 1.442695, %v3439_v2 }
 0xf8e   : > { %5079 = vpow2.f32 %v3444_v19 }
 0xf8f   : > { %5081 = vpow2.f32 %v3446_v20 }
 0xf91   : > { %v3437_v22 = vpop.xlane.xlu2 %3436 }
 0xf92   : > { %v3441_v24 = vsub.f32 %v6240_v52, %v3437_v22 }
 0xf94   : > { %v5080_v14 = vpop.eup %5079  ;;  %v3448_v17 = vmul.f32 1.442695, %v3441_v24 }
 0xf95   : > { %v3453_v18 = vsel %vm1489_vm3, %v5080_v14, 0.0  ;;  %v5082_v58 = vpop.eup %5081 }
 0xf96   : > { %3454 = vadd.xlane.f32.xlu1 %v3453_v18  ;;  %v3456_v21 = vsel %vm1489_vm3, %v5082_v58, 0.0  ;;  %5083 = vpow2.f32 %v3448_v17 }
 0xf9c   : > { %v5084_v9 = vpop.eup %5083 }
 0xf9d   : > { %v3459_v53 = vsel %vm1489_vm3, %v5084_v9, 0.0 }
 0xf9e   : > { %3457 = vadd.xlane.f32.xlu1 %v3456_v21 }
 0xfa8   : > { %5012 = vxpose.binary.xlu0.c.b16.start.end [1/2] (short) (narrow) %v3680_v46, %v3676_v37, 16 }
 0xfcf   : > { %3460 = vadd.xlane.f32.xlu2 %v3459_v53 }
 0xfd8   : > { %5006 = vxpose.binary.xlu1.c.b16.start.end [1/2] (short) (narrow) %v3688_v11, %v3684_v55, 16 }
 0xff2   : > { %v3452_v25 = vpop.xlane.xlu0 %3451 }
 0xff3   : > { %5085 = vrcp.f32 %v3452_v25 }
 0xff8   : > { %5015 = vxpose.binary.xlu2.c.b16.start.end [1/2] (short) (narrow) %v3664_v60, %v3660_v44, 16 }
 0xff9   : > { %v5086_v26 = vpop.eup %5085 }
 0xffa   : > { %v3466_v12 = vmul.f32 %v5086_v26, %v5078_v7 }
 0xffc   : > { %v3470_v3 = vpack.c.bf16 %v3466_v12, %v3466_v12 }
 0xffe   : > { %v3874_v51 = vsel %vm1489_vm3, %v3470_v3, 0 }
 0xfff   : > { %3883 = vmatpush.bf16.xpose.msrb.mxu0 %v3874_v51  ;;  %v5010_v31 = vpop.trf.xlu2 }
0x1007   : > { %v5011_v32 = vpop.trf.xlu2 }
0x1009   : > { %v3455_v27 = vpop.xlane.xlu1 %3454 }
0x100a   : > { %5087 = vrcp.f32 %v3455_v27 }
0x1010   : > { %v5088_v28 = vpop.eup %5087 }
0x1011   : > { %v3458_v52 = vpop.xlane.xlu1 %3457  ;;  %v3467_v5 = vmul.f32 %v5088_v28, %v5080_v14 }
0x1012   : > { %5089 = vrcp.f32 %v3458_v52 }
0x1013   : > { %v3471_v43 = vpack.c.bf16 %v3467_v5, %v3467_v5 }
0x1015   : > { %v3893_v29 = vsel %vm1489_vm3, %v3471_v43, 0 }
0x1016   : > { %3902 = vmatpush.bf16.xpose.msrb.mxu1 %v3893_v29 }
0x1018   : > { %v5090_v30 = vpop.eup %5089 }
0x1019   : > { %v3468_v47 = vmul.f32 %v5090_v30, %v5082_v58 }
0x101b   : > { %v3472_v10 = vpack.c.bf16 %v3468_v47, %v3468_v47 }
0x101d   : > { %v3912_v8 = vsel %vm1489_vm3, %v3472_v10, 0 }
0x101e   : > { %3921 = vmatpush.bf16.xpose.msrb.mxu2 %v3912_v8 }
0x1042   : > { %v3461_v33 = vpop.xlane.xlu2 %3460 }
0x1043   : > { %5091 = vrcp.f32 %v3461_v33 }
0x1049   : > { %v5092_v34 = vpop.eup %5091 }
0x104a   : > { %v3469_v36 = vmul.f32 %v5092_v34, %v5084_v9 }
0x104c   : > { %v3473_v37 = vpack.c.bf16 %v3469_v36, %v3469_v36 }
0x104e   : > { %v3931_v38 = vsel %vm1489_vm3, %v3473_v37, 0 }
0x104f   : > { %3940 = vmatpush.bf16.xpose.msra.mxu3 %v3931_v38 }
0x1054   : > { %v5013_v41 = vpop.trf.xlu0 }
0x1055   : > { %v3818_v45 = vrot.slane %v5013_v41, 4 }
0x105c   : > { %v5014_v60 = vpop.trf.xlu0 }
0x105d   : > { %v3838_v11 = vrot.slane %v5014_v60, 4 }
0x1084   : > { %v5007_v39 = vpop.trf.xlu1 }
0x1085   : > { %v3824_v40 = vrot.slane %v5007_v39, 4 }
0x1087   : > { %v3825_v42 = vsel %vm828_vm1, %v3824_v40, %v5010_v31 }
0x1088   : > { %v3829_v46 = vperm.slane %v3825_v42, %v5717_v23 }
0x108a   : > { %v3830_v55 = vrot.slane %v3829_v46, 4 }
0x108c   : > { %v5008_v44 = vpop.trf.xlu1 }
0x108d   : > { %v3844_v48 = vrot.slane %v5008_v44, 4 }
0x108f   : > { %v3845_v63 = vsel %vm828_vm1, %v3844_v48, %v5011_v32 }
0x1090   : > { %v3849_v13 = vperm.slane %v3845_v63, %v5717_v23 }
0x1092   : > { %v3850_v16 = vrot.slane %v3849_v13, 4 }
0x1099   : > { %v5016_v50 = vpop.trf.xlu2 }
0x109a   : > { %v3819_v54 = vsel %vm828_vm1, %v3818_v45, %v5016_v50 }
0x109b   : > { %v3823_v57 = vperm.slane %v3819_v54, %v5717_v23 }
0x109d   : > { %v3831_v4 = vsel %vm828_vm1, %v3830_v55, %v3823_v57 }
0x109e   : > { %v3835_v56 = vperm.slane %v3831_v4, %v5729_v35 }
0x10a0   : > { %v3836_v7 = vrot.slane %v3835_v56, 4  ;;  %v3861_v2 = vshrl.u32 %v3835_v56, 16 }
0x10a1   : > { %v5017_v59 = vpop.trf.xlu2 }
0x10a2   : > { %v3839_v15 = vsel %vm828_vm1, %v3838_v11, %v5017_v59  ;;  %v3837_v14 = vsel %vm828_vm1, 0, %v3836_v7 }
0x10a3   : > { %v3843_v0 = vperm.slane %v3839_v15, %v5717_v23  ;;  %v3867_v22 = vshrl.u32 %v3837_v14, 16 }
0x10a5   : > { %v3851_v61 = vsel %vm828_vm1, %v3850_v16, %v3843_v0 }
0x10a6   : > { %v3855_v1 = vperm.slane %v3851_v61, %v5729_v35 }
0x10a8   : > { %v3856_v6 = vrot.slane %v3855_v1, 4  ;;  %v3862_v19 = vshrl.u32 %v3855_v1, 16  ;;  %v3860_v20 = vpack.i.b16 %v3855_v1, %v3835_v56 }
0x10aa   : > { %4697 = vmatmul.msk.bf16.vlgmr.msrb.gmra.mxu0 %vm1489_vm3, %v3860_v20  ;;  %v3863_v18 = vpack.i.b16 %v3862_v19, %v3861_v2  ;;  %v3857_v58 = vsel %vm828_vm1, 0, %v3856_v6 }
0x10ab   : > { %v3866_v21 = vpack.i.b16 %v3857_v58, %v3837_v14  ;;  %v3868_v24 = vshrl.u32 %v3857_v58, 16 }
0x10ac   : > { %4698 = vmatmul.msk.bf16.vlgmr.msrb.gmra.mxu1 %vm1489_vm3, %v3863_v18 }
0x10ad   : > { %4699 = vmatmul.msk.bf16.vlgmr.msrb.gmra.mxu2 %vm1489_vm3, %v3866_v21  ;;  %v3869_v17 = vpack.i.b16 %v3868_v24, %v3867_v22 }
0x10af   : > { %4700 = vmatmul.msk.bf16.vlgmr.msra.gmra.mxu3 %vm1489_vm3, %v3869_v17 }
0x1127   : > { %v3885_v9 = vpop.f32.mrf.mxu0 }
0x1129   : > { %v3904_v53 = vpop.f32.mrf.mxu1 }
0x112f   : > { %v3887_v25 = vpop.f32.mrf.mxu0 }
0x1130   : > { %v3923_v26 = vpop.f32.mrf.mxu2 }
0x1131   : > { %v5018_v12 = vpack.i.bf16 %v3885_v9, %v3923_v26  ;;  %v3906_v3 = vpop.f32.mrf.mxu1 }
0x1132   : > { %v3942_v51 = vpop.f32.mrf.mxu3 }
0x1133   : > { %v5025_v27 = vpack.i.bf16 %v3904_v53, %v3942_v51  ;;  %5019 = vxpose.xlu0.b32.start.end [1/1] (short) (narrow) %v5018_v12, 8 }
0x1135   : > { %5026 = vxpose.xlu1.b32.start.end [1/1] (short) (narrow) %v5025_v27, 8 }
0x1138   : > { %v3925_v28 = vpop.f32.mrf.mxu2 }
0x113a   : > { %v3944_v52 = vpop.f32.mrf.mxu3 }
0x11d7   : > { %v5020_v5 = vpop.trf.xlu0 }
0x11d8   : > { %v5024_v43 = vunpack.i.h.bf16 %v5020_v5  ;;  %v5021_v29 = vunpack.i.l.bf16 %v5020_v5 }
0x11d9   : > { %v5027_v30 = vpop.trf.xlu1 }
0x11da   : > { %v4076_v47 = vrot.slane %v5024_v43, 4  ;;  %v4074_v10 = vrot.slane %v5021_v29, 4  ;;  %v5031_v8 = vunpack.i.h.bf16 %v5027_v30  ;;  %v5028_v31 = vunpack.i.l.bf16 %v5027_v30 }
0x11dc   : > { %v4075_v32 = vsel %vm828_vm1, %v4074_v10, %v5024_v43  ;;  %v4077_v33 = vsel %vm828_vm1, %v5021_v29, %v4076_v47  ;;  %v4088_v34 = vrot.slane %v5031_v8, 4  ;;  %v4086_v38 = vrot.slane %v5028_v31, 4 }
0x11dd   : > { %v4081_v36 = vperm.slane %v4075_v32, %v5717_v23  ;;  %v4085_v37 = vperm.slane %v4077_v33, %v5717_v23  ;;  %v4773_v32 = vld [vmem:[#allocation8 + $0x10] sm:$0xff] }
0x11de   : > { %v4089_v39 = vsel %vm828_vm1, %v5028_v31, %v4088_v34  ;;  %v4087_v42 = vsel %vm828_vm1, %v4086_v38, %v5031_v8  ;;  %v4774_v31 = vld [vmem:[#allocation8 + $0x18] sm:$0xff] }
0x11df   : > { %v4100_v40 = vrot.slane %v4081_v36, 4  ;;  %v4112_v41 = vrot.slane %v4085_v37, 4  ;;  %v4097_v44 = vperm.slane %v4089_v39, %v5717_v23  ;;  %v4093_v45 = vperm.slane %v4087_v42, %v5717_v23  ;;  %4231 = vmatpush.bf16.msra.mxu0 %v4774_v31 }
0x11e1   : > { %v4110_v46 = vrot.slane %v4097_v44, 4  ;;  %v4113_v48 = vsel %vm828_vm1, %v4097_v44, %v4112_v41  ;;  %v4098_v50 = vrot.slane %v4093_v45, 4  ;;  %v4101_v54 = vsel %vm828_vm1, %v4093_v45, %v4100_v40  ;;  %v5046_v40 = vld [vmem:[%s6429_s9 + $0x1] ss:$0 sm:$0xff] }
0x11e2   : > { %v4121_v55 = vperm.slane %v4113_v48, %v5729_v35  ;;  %v4109_v57 = vperm.slane %v4101_v54, %v5729_v35 }
0x11e3   : > { %v4111_v60 = vsel %vm828_vm1, %v4110_v46, %v4085_v37  ;;  %v4099_v63 = vsel %vm828_vm1, %v4098_v50, %v4081_v36  ;;  %4232 = vmatpush.bf16.msra.mxu0 %v4773_v32 }
0x11e4   : > { %v4117_v4 = vperm.slane %v4111_v60, %v5729_v35  ;;  %v4128_v11 = vrot.slane %v4121_v55, 4  ;;  %v4105_v13 = vperm.slane %v4099_v63, %v5729_v35  ;;  %v4124_v56 = vrot.slane %v4109_v57, 4  ;;  %v4776_v60 = vld [vmem:[#allocation11 + $0x18] sm:$0xff]  ;;  %v4775_v63 = vld [vmem:[#allocation11 + $0x10] sm:$0xff] }
0x11e5   : > { %4305 = vmatpush.bf16.msra.mxu1 %v4776_v60 }
0x11e6   : > { %v4126_v59 = vrot.slane %v4117_v4, 4  ;;  %v4129_v15 = vsel %vm828_vm1, 0.0, %v4128_v11  ;;  %v4141_v16 = vsel %vm828_vm1, %v4128_v11, %v4117_v4  ;;  %v4125_v0 = vsel %vm828_vm1, 0.0, %v4124_v56 }
0x11e7   : > { %v4122_v7 = vrot.slane %v4105_v13, 4  ;;  %v4130_v61 = vsel %vm828_vm1, %v4124_v56, %v4105_v13  ;;  %v4145_v1 = vperm.slane %v4141_v16, %v5717_v23  ;;  %v4135_v19 = vrot.slane %v4125_v0, 4 }
0x11e8   : > { %v4127_v2 = vsel %vm828_vm1, 0.0, %v4126_v59  ;;  %v4134_v6 = vperm.slane %v4130_v61, %v5717_v23  ;;  %v4146_v20 = vrot.slane %v4129_v15, 4 }
0x11e9   : > { %v4123_v14 = vsel %vm828_vm1, 0.0, %v4122_v7  ;;  %v4166_v18 = vrot.slane %v4145_v1, 4  ;;  %4306 = vmatpush.bf16.msra.mxu1 %v4775_v63  ;;  %v5047_v7 = vld [vmem:[%s6430_s10 + $0x1] ss:$0 sm:$0xff] }
0x11ea   : > { %v4136_v58 = vsel %vm828_vm1, %v4135_v19, %v4123_v14  ;;  %v4147_v21 = vsel %vm828_vm1, %v4146_v20, %v4127_v2  ;;  %v4154_v22 = vrot.slane %v4134_v6, 4  ;;  %v4780_v14 = vld [vmem:[%s6491_s3 + $0x38] sm:$0xff] }
0x11eb   : > { %v4140_v24 = vperm.slane %v4136_v58, %v5717_v23  ;;  %v4151_v17 = vperm.slane %v4147_v21, %v5717_v23  ;;  %4367 = vmatpush.bf16.msra.mxu2 %v4780_v14  ;;  %v4778_v58 = vld [vmem:[%s6491_s3 + $0x28] sm:$0xff]  ;;  %v4777_v21 = vld [vmem:[%s6491_s3 + $0x20] sm:$0xff] }
0x11ed   : > { %v4155_v9 = vsel %vm828_vm1, %v4140_v24, %v4154_v22  ;;  %v4167_v53 = vsel %vm828_vm1, %v4151_v17, %v4166_v18  ;;  %v4152_v25 = vrot.slane %v4140_v24, 4  ;;  %v4164_v26 = vrot.slane %v4151_v17, 4  ;;  %v4779_v18 = vld [vmem:[%s6491_s3 + $0x30] sm:$0xff]  ;;  %v5049_v22 = vld [vmem:[%s6492_s21 + $0x1] ss:$0 sm:$0xff] }
0x11ee   : > { %v4163_v12 = vperm.slane %v4155_v9, %v5729_v35  ;;  %v4175_v3 = vperm.slane %v4167_v53, %v5729_v35 }
0x11ef   : > { %v4153_v51 = vsel %vm828_vm1, %v4152_v25, %v4134_v6  ;;  %v4165_v27 = vsel %vm828_vm1, %v4164_v26, %v4145_v1  ;;  %v5048_v1 = vld [vmem:[#allocation10 + $0x1] ss:$0 sm:$0xff]  ;;  %4368 = vmatpush.bf16.msra.mxu2 %v4779_v18 }
0x11f0   : > { %v4182_v28 = vrot.slane %v4163_v12, 4  ;;  %v4180_v52 = vrot.slane %v4175_v3, 4  ;;  %v4159_v5 = vperm.slane %v4153_v51, %v5729_v35  ;;  %v4171_v23 = vperm.slane %v4165_v27, %v5729_v35 }
0x11f2   : > { %v4183_v43 = vsel %vm828_vm1, %v4175_v3, %v4182_v28  ;;  %v4181_v29 = vsel %vm828_vm1, %v4180_v52, %v4163_v12  ;;  %v4176_v30 = vrot.slane %v4171_v23, 4  ;;  %v4178_v47 = vrot.slane %v4159_v5, 4 }
0x11f3   : > { %4193 = vrot.lane.b32.xlu1 %v4183_v43, %s5409_s0  ;;  %4189 = vrot.lane.b32.xlu0 %v4181_v29, %s6495_s23  ;;  %s4750_s0 = sshll.u32 %s5532_s20, 3  ;;  %s4413_s23 = scalar_lea.sflag [#allocation4], %s5655_s12 }
0x11f4   : > { %v4179_v10 = vsel %vm828_vm1, %v4171_v23, %v4178_v47  ;;  %v4177_v8 = vsel %vm828_vm1, %v4176_v30, %v4159_v5  ;;  %4369 = vmatpush.bf16.msra.mxu2 %v4778_v58  ;;  %v5050_v23 = vld [vmem:[%s6493_s16 + $0x1] ss:$0 sm:$0xff]  ;;  %s4423_s25 = scalar_lea.hbm %s6497_s2, %s4750_s0 }
0x11f5   : > { %4185 = vrot.lane.b32.xlu2 %v4179_v10, %s6496_s14  ;;  %s4427_s20 = sshll.u32 %s4423_s25, 4  ;;  %s4428_s20 = int_to_ptr.hbm [resolvable:$true] %s4427_s20 }
0x11f6   : > { %s5325_s14 = sshra.s32 %s4428_s20, 4  ;;  %s5326_s14 = int_to_ptr.hbm [resolvable:$true] %s5325_s14 }
0x11f7   : > { %s5327_s11 = scalar_lea.hbm %s5326_s14, 8  ;;  %p5332_p7 = scmp.lt.s32.totalorder %s5326_s14, %s6497_s2 }
0x11f8   : > { %4370 = vmatpush.bf16.msra.mxu2 %v4777_v21  ;;  %p5328_p1 = scmp.ne.s32.totalorder %s5326_s14, %s5327_s11  ;;  %p5333_p9 = scmp.lt.s32.totalorder %s5331_s27, %s5327_s11 }
0x11fa   : > { %p5329_p3 = pnand %p5328_p1, %p5598_p0  ;;  %p5334_p8 = por %p5333_p9, %p5332_p7 }
0x11fc   : > { %p5330_p13 = pneg %p5329_p3 }
0x11fe   : > { %p5335_p10 = pnand %p5334_p8, %p5330_p13 }
0x124f   : > { %v4186_v35 = vpop.permute.xlu2 %4185 }
0x1250   : > { %v4196_v33 = vsel %vm1489_vm3, %v4177_v8, %v4186_v35 }
0x1265   : > { %v4194_v34 = vpop.permute.xlu1 %4193  ;;  %v4190_v36 = vpop.permute.xlu0 %4189 }
0x1266   : > { %v4197_v37 = vsel %vm2349_vm4, %v4196_v33, %v4190_v36 }
0x1267   : > { %v4198_v38 = vsel %vm2351_vm5, %v4197_v37, %v4194_v34 }
0x1268   : > { %v4199_v39 = vpack.c.bf16 %v4198_v38, %v4198_v38 }
0x126a   : > { %4710 = vmatmul.msk.bf16.vlgmr.msra.gmra.mxu0 %vm734_vm0, %v4199_v39 }
0x12e7   : > { %v4234_v41 = vpop.f32.mrf.mxu0 }
0x12e8   : > { %v4235_v42 = vadd.f32 %v5046_v40, %v4234_v41 }
0x12ea   : > { %v4238_v44 = vadd.f32 %v4235_v42, %v6049_v62 }
0x12ec   : > { %v4243_v45 = vsel %vm734_vm0, %v4238_v44, 0.0 }
0x12ed   : > { %4244 = vadd.xlane.f32.xlu1 %v4243_v45  ;;  %v5051_v45 = vld [vmem:[%s6494_s19 + $0x1] ss:$0 sm:$0xff] }
0x12ef   : > { %v4236_v46 = vpop.f32.mrf.mxu0 }
0x1360   : > { %v4245_v48 = vpop.xlane.xlu1 %4244 }
0x1361   : > { %v4246_v50 = vmul.f32 %v4245_v48, %v5996_v49  ;;  %v5052_v48 = vld [vmem:[#allocation13 + $0x1] ss:$0 sm:$0xff] }
0x1363   : > { %v4247_v54 = vsub.f32 %v4238_v44, %v4246_v50 }
0x1365   : > { %v4248_v55 = vmul.f32 %v4247_v54, %v4247_v54 }
0x1367   : > { %v4249_v57 = vsel %vm734_vm0, %v4248_v55, 0.0 }
0x1368   : > { %4250 = vadd.xlane.f32.xlu2 %v4249_v57 }
0x13db   : > { %v4251_v4 = vpop.xlane.xlu2 %4250 }
0x13dc   : > { %v4252_v11 = vmul.f32 %v4251_v4, %v5996_v49 }
0x13de   : > { %v4253_v62 = vadd.f32 1e-12, %v4252_v11 }
0x13e0   : > { %5093 = vrsqrt.f32 %v4253_v62  ;;  %vm4260_vm15 = vweird.f32 %v4253_v62 }
0x13e6   : > { %v5094_v13 = vpop.eup %5093 }
0x13e7   : > { %v4255_v56 = vmul.f32 %v5094_v13, %v4253_v62  ;;  %vm4261_vm14 = vweird.f32 %v5094_v13 }
0x13e8   : > { %vm4262_vm1 = vmor %vm4260_vm15, %vm4261_vm14 }
0x13e9   : > { %v4256_v59 = vmul.f32 %v5094_v13, %v4255_v56 }
0x13eb   : > { %v4257_v15 = vmul.f32 0.5, %v4256_v59 }
0x13ed   : > { %v4258_v16 = vsub.f32 1.5, %v4257_v15 }
0x13ef   : > { %v4259_v0 = vmul.f32 %v5094_v13, %v4258_v16 }
0x13f1   : > { %v4263_v61 = vsel %vm4262_vm1, %v5094_v13, %v4259_v0 }
0x13f2   : > { %v4264_v2 = vmul.f32 %v4263_v61, %v4247_v54 }
0x13f4   : > { %v4268_v6 = vmul.f32 %v5047_v7, %v4264_v2 }
0x13f6   : > { %v4272_v19 = vadd.f32 %v5048_v1, %v4268_v6 }
0x13f8   : > { %v4273_v20 = vpack.c.bf16 %v4272_v19, %v4272_v19 }
0x13fa   : > { %4721 = vmatmul.msk.bf16.vlgmr.msra.gmra.mxu1 %vm734_vm0, %v4273_v20 }
0x1477   : > { %v4308_v24 = vpop.f32.mrf.mxu1 }
0x1478   : > { %v4309_v17 = vadd.f32 %v5049_v22, %v4308_v24 }
0x147a   : > { %v4313_v9 = vmul.f32 0.044715, %v4309_v17  ;;  %v4312_v27 = vmul.f32 0.5, %v4309_v17 }
0x147c   : > { %v4314_v53 = vmul.f32 %v4313_v9, %v4309_v17 }
0x147e   : > { %v4315_v25 = vmul.f32 %v4314_v53, %v4309_v17 }
0x147f   : > { %v4310_v26 = vpop.f32.mrf.mxu1 }
0x1480   : > { %v4316_v12 = vadd.f32 %v4315_v25, %v4309_v17 }
0x1482   : > { %v4317_v3 = vmul.f32 0.7978846, %v4316_v12 }
0x1484   : > { %5095 = vtanh.f32 %v4317_v3 }
0x148a   : > { %v5096_v51 = vpop.eup %5095 }
0x148b   : > { %v4319_v28 = vadd.f32 1.0, %v5096_v51 }
0x148d   : > { %v4320_v52 = vmul.f32 %v4319_v28, %v4312_v27 }
0x148f   : > { %v4321_v5 = vpack.c.bf16 %v4320_v52, %v4320_v52 }
0x1491   : > { %4747 = vmatmul.msk.bf16.vlgmr.msra.gmra.mxu2 %vm2513_vm10, %v4321_v5 }
0x1514   : > { %v4372_v43 = vpop.f32.mrf.mxu2 }
0x1515   : > { %v4373_v29 = vadd.f32 %v5050_v23, %v4372_v43 }
0x1517   : > { %v4376_v30 = vadd.f32 %v4373_v29, %v4272_v19 }
0x1519   : > { %v4381_v47 = vsel %vm734_vm0, %v4376_v30, 0.0 }
0x151a   : > { %4382 = vadd.xlane.f32.xlu0 %v4381_v47 }
0x151c   : > { %v4374_v10 = vpop.f32.mrf.mxu2 }
0x158d   : > { %v4383_v8 = vpop.xlane.xlu0 %4382 }
0x158e   : > { %v4384_v31 = vmul.f32 %v4383_v8, %v5996_v49 }
0x1590   : > { %v4385_v32 = vsub.f32 %v4376_v30, %v4384_v31 }
0x1592   : > { %v4386_v35 = vmul.f32 %v4385_v32, %v4385_v32 }
0x1594   : > { %v4387_v33 = vsel %vm734_vm0, %v4386_v35, 0.0 }
0x1595   : > { %4388 = vadd.xlane.f32.xlu1 %v4387_v33 }
0x1608   : > { %v4389_v34 = vpop.xlane.xlu1 %4388 }
0x1609   : > { %v4390_v36 = vmul.f32 %v4389_v34, %v5996_v49 }
0x160b   : > { %v4391_v37 = vadd.f32 1e-12, %v4390_v36 }
0x160d   : > { %5097 = vrsqrt.f32 %v4391_v37  ;;  %vm4398_vm3 = vweird.f32 %v4391_v37 }
0x1613   : > { %v5098_v38 = vpop.eup %5097 }
0x1614   : > { %v4393_v39 = vmul.f32 %v5098_v38, %v4391_v37  ;;  %vm4399_vm2 = vweird.f32 %v5098_v38 }
0x1615   : > { %vm4400_vm4 = vmor %vm4398_vm3, %vm4399_vm2 }
0x1616   : > { %v4394_v40 = vmul.f32 %v5098_v38, %v4393_v39 }
0x1618   : > { %v4395_v41 = vmul.f32 0.5, %v4394_v40 }
0x161a   : > { %v4396_v42 = vsub.f32 1.5, %v4395_v41 }
0x161c   : > { %v4397_v44 = vmul.f32 %v5098_v38, %v4396_v42 }
0x161e   : > { %v4401_v49 = vsel %vm4400_vm4, %v5098_v38, %v4397_v44 }
0x161f   : > { %v4402_v46 = vmul.f32 %v4401_v49, %v4385_v32 }
0x1621   : > { %v4406_v50 = vmul.f32 %v5051_v45, %v4402_v46 }
0x1623   : > { %v4410_v54 = vadd.f32 %v5052_v48, %v4406_v50 }
0x1625   : > { %4411 = vst.msk [vmem:[%s709_s15] sm:$0xff] %vm734_vm0, %v4410_v54 }
0x1626   : > { %5338 = shalt.err (!%p5335_p10)
}
0x1627   : > { %4805 = dma.vmem_to_hbm [thread:$0]  (%p5598_p0), %s4426_s8, 128, %s4428_s20, %s4413_s23  }
0x1628 PF: > { %s6499_s12 = sld [smem:[#allocation21_spill]] }
0x1629   : > { %s6501_s25 = sld [smem:[#allocation23_spill]] }
0x162e   : > { %s4439_s30 = sand.u32 1, %s6499_s12  }
0x162f   : > { %p6502_p11 = scmp.ge.s32.totalorder %s6501_s25, 2  ;;  %s4440_s15 = scalar_lea.sflag [#allocation4], %s4439_s30 }
0x1631   : > { %p4831_p5 = pnand %p6502_p11, %p5606_p6 }
0x1633   : > { %p4832_p12 = pneg %p4831_p5 }
0x1635   : > { %5376 = dma.done.wait (%p4832_p12), %s4440_s15, 128  }
0x1636   : > { %5378 = vsyncadd (%p4832_p12), %s4440_s15, 4294967168  ;;  %s6503_s30 = sld [smem:[#allocation24_spill]]  ;;  %s6506_s27 = smov %s5385_s28 }
0x1637   : > { %s6504_s14 = sld [smem:[#allocation22_spill]] }
0x1638   : > { %s6505_s29 = sld [smem:[#allocation25_spill]] }
0x163c   : > { %p36_p2 = scmp.ge.s32.totalorder %s6503_s30, 4  }
0x163d   : > { %s6507_s28 = smov %s6504_s14 }
0x163e   :  { %38 = sbr.rel (!%p36_p2) target bundleno = 23 (0x17), region = 186 }
0x1643   :  { %4446 = vsyncpa [#allocation3], 1 }
0x1644   :  { %4448 = vsyncpa [#allocation3 + $0x1], 1 }
0x1645   :  { %4449 = vsyncpa [#allocation6], 1 }
0x1646   :  { %4451 = vsyncpa [#allocation6 + $0x1], 1 }
0x1647   :  { %4452 = vsyncpa [#allocation9], 1 }
0x1648   :  { %4453 = vsyncpa [#allocation12], 1 }
0x1649   :  { %4454 = vsyncpa [#allocation4], 1 }
0x164a   :  { %4456 = vsyncpa [#allocation4 + $0x1], 1 }

</bundles_post_ra>
